<compile_context>
chip_gen: v7x
topology: tpu7x:2x2x1
jax: 0.10.0
libtpu: 0.0.40
codegen_flags: <defaults>
</compile_context>

<pallas_src>
import functools

import jax
import jax.numpy as jnp
from jax.experimental import pallas as pl

# ----------------------- tiny BERT config (synthetic) -----------------------
VOCAB = 100
TYPE_VOCAB = 2
MAX_POS = 16
HIDDEN = 32
N_HEADS = 4
HEAD_DIM = HIDDEN // N_HEADS
INTER = 64
N_LAYERS = 2
N_CLASSES = 3
LN_EPS = 1e-12


# ------------------------------ kernel helpers -------------------------------
def _layernorm(x, g, b):
    mean = jnp.mean(x, axis=-1, keepdims=True)
    xc = x - mean
    var = jnp.mean(xc * xc, axis=-1, keepdims=True)
    return xc * jax.lax.rsqrt(var + LN_EPS) * g + b


def _gelu(y):
    # TODO(synk): HF BERT uses exact erf-GELU; tanh approximation keeps the
    # transcendental on the Mosaic-safe EUP path (numerics differ ~1e-3).
    c = 0.7978845608028654  # sqrt(2/pi)
    return 0.5 * y * (1.0 + jnp.tanh(c * (y + 0.044715 * y * y * y)))


# ------------------------------ fused Pallas kernel --------------------------
def _bert_fused_kernel(
        emb_ref, addmask_ref, labels_ref,
        emb_g_ref, emb_b_ref,
        wqkv_ref, bqkv_ref, wo_ref, bo_ref, ln1g_ref, ln1b_ref,
        wi_ref, bi_ref, wf_ref, bf_ref, ln2g_ref, ln2b_ref,
        pool_w_ref, pool_b_ref, cls_w_ref, cls_b_ref,
        hs_ref, logits_ref, loss_ref,
        *, batch, seq):
    f32 = jnp.float32
    scale = 1.0 / (HEAD_DIM ** 0.5)

    # Embedding LayerNorm (no fake zero-residual input).
    x = _layernorm(emb_ref[...], emb_g_ref[...], emb_b_ref[...])
    hs_ref[0] = x

    for l in range(N_LAYERS):
        # Fused QKV projection: a single (B*S, 3H) matmul (lane-denser output).
        qkv = jnp.dot(x, wqkv_ref[l], preferred_element_type=f32) + bqkv_ref[l]
        wo_l = wo_ref[l]

        # Attention: statically unrolled over (batch, head); everything stays
        # in registers / VMEM.  The output projection is fused head-wise
        # (ctx_h @ wo[h*dh:(h+1)*dh, :]) so the per-head results are combined
        # with full-lane-width adds instead of lane-offset scatters.
        attn_rows = []
        for b in range(batch):
            m = addmask_ref[b:b + 1, :]                  # (1, S), shared by all heads
            acc = jnp.zeros((seq, HIDDEN), f32)
            for h in range(N_HEADS):
                q = qkv[b * seq:(b + 1) * seq, h * HEAD_DIM:(h + 1) * HEAD_DIM]
                k = qkv[b * seq:(b + 1) * seq,
                        HIDDEN + h * HEAD_DIM:HIDDEN + (h + 1) * HEAD_DIM]
                v = qkv[b * seq:(b + 1) * seq,
                        2 * HIDDEN + h * HEAD_DIM:2 * HIDDEN + (h + 1) * HEAD_DIM]
                s = jax.lax.dot_general(q, k, (((1,), (1,)), ((), ())),
                                        preferred_element_type=f32) * scale + m
                s = s - jnp.max(s, axis=-1, keepdims=True)
                p = jnp.exp(s)
                p = p / jnp.sum(p, axis=-1, keepdims=True)
                ctx_h = jnp.dot(p, v, preferred_element_type=f32)          # (S, dh)
                acc = acc + jnp.dot(ctx_h,
                                    wo_l[h * HEAD_DIM:(h + 1) * HEAD_DIM, :],
                                    preferred_element_type=f32)            # (S, H)
            attn_rows.append(acc)
        attn = jnp.concatenate(attn_rows, axis=0) + bo_ref[l]              # (B*S, H)

        x = _layernorm(attn + x, ln1g_ref[l], ln1b_ref[l])
        inter = _gelu(jnp.dot(x, wi_ref[l], preferred_element_type=f32) + bi_ref[l])
        ffn = jnp.dot(inter, wf_ref[l], preferred_element_type=f32) + bf_ref[l]
        x = _layernorm(ffn + x, ln2g_ref[l], ln2b_ref[l])
        hs_ref[l + 1] = x

    # Pooler + classifier + mean cross-entropy, fused into the kernel tail.
    # CLS rows (row b*S of x) are extracted with a tiny 0/1 selection matmul
    # to avoid sub-tile gathers.
    row_ids = jax.lax.broadcasted_iota(jnp.int32, (batch, batch * seq), 0)
    col_ids = jax.lax.broadcasted_iota(jnp.int32, (batch, batch * seq), 1)
    sel = (col_ids == row_ids * seq).astype(f32)                           # (B, B*S)
    cls = jnp.dot(sel, x, preferred_element_type=f32)                      # (B, H)
    pooled = jnp.tanh(jnp.dot(cls, pool_w_ref[...], preferred_element_type=f32)
                      + pool_b_ref[...])
    logits = jnp.dot(pooled, cls_w_ref[...], preferred_element_type=f32) + cls_b_ref[...]
    logits_ref[...] = logits

    mx = jnp.max(logits, axis=-1, keepdims=True)
    z = logits - mx
    lse = jnp.log(jnp.sum(jnp.exp(z), axis=-1, keepdims=True))
    logp = z - lse
    onehot = (jax.lax.broadcasted_iota(jnp.int32, (batch, N_CLASSES), 1)
              == labels_ref[...]).astype(f32)
    nll = -jnp.sum(onehot * logp, axis=-1, keepdims=True)                  # (B, 1)
    loss_ref[...] = jnp.sum(nll, axis=0, keepdims=True) / batch


# ----------------------------- parameter setup ------------------------------
def init_params(key):
    def normal(k, shape):
        return (jax.random.normal(k, shape, jnp.float32) * 0.02).astype(jnp.float32)

    keys = iter(jax.random.split(key, 4 + N_LAYERS * 8))
    params = {
        "word_emb": normal(next(keys), (VOCAB, HIDDEN)),
        "pos_emb": normal(next(keys), (MAX_POS, HIDDEN)),
        "type_emb": normal(next(keys), (TYPE_VOCAB, HIDDEN)),
        "emb_ln_g": jnp.ones((HIDDEN,), jnp.float32),
        "emb_ln_b": jnp.zeros((HIDDEN,), jnp.float32),
        "pool_w": normal(next(keys), (HIDDEN, HIDDEN)),
        "pool_b": jnp.zeros((HIDDEN,), jnp.float32),
        "cls_b": jnp.zeros((N_CLASSES,), jnp.float32),
        "layers": [],
    }
    for _ in range(N_LAYERS):
        layer = {
            "wq": normal(next(keys), (HIDDEN, HIDDEN)), "bq": jnp.zeros((HIDDEN,), jnp.float32),
            "wk": normal(next(keys), (HIDDEN, HIDDEN)), "bk": jnp.zeros((HIDDEN,), jnp.float32),
            "wv": normal(next(keys), (HIDDEN, HIDDEN)), "bv": jnp.zeros((HIDDEN,), jnp.float32),
            "wo": normal(next(keys), (HIDDEN, HIDDEN)), "bo": jnp.zeros((HIDDEN,), jnp.float32),
            "ln1_g": jnp.ones((HIDDEN,), jnp.float32), "ln1_b": jnp.zeros((HIDDEN,), jnp.float32),
            "wi": normal(next(keys), (HIDDEN, INTER)), "bi": jnp.zeros((INTER,), jnp.float32),
            "wf": normal(next(keys), (INTER, HIDDEN)), "bf": jnp.zeros((HIDDEN,), jnp.float32),
            "ln2_g": jnp.ones((HIDDEN,), jnp.float32), "ln2_b": jnp.zeros((HIDDEN,), jnp.float32),
        }
        params["layers"].append(layer)
    # classifier weight drawn from the remaining split keys (deterministic
    # from the caller's seed; fixes the hardcoded-PRNGKey issue).
    params["cls_w"] = normal(next(keys), (HIDDEN, N_CLASSES))
    return params


# --------------------------------- forward ----------------------------------
def bert_classifier_forward(params, input_ids, mask, token_type_ids, labels):
    B, S = input_ids.shape

    # Embedding gathers are XLA glue; everything else happens in one kernel.
    emb = (params["word_emb"][input_ids]
           + params["pos_emb"][jnp.arange(S)][None, :, :]
           + params["type_emb"][token_type_ids]).reshape(B * S, HIDDEN).astype(jnp.float32)
    add_mask = (1.0 - mask.astype(jnp.float32)) * -1e9          # (B, S), shared across heads

    layers = params["layers"]
    wqkv = jnp.stack([jnp.concatenate([l["wq"], l["wk"], l["wv"]], axis=1) for l in layers])
    bqkv = jnp.stack([jnp.concatenate([l["bq"], l["bk"], l["bv"]]).reshape(1, 3 * HIDDEN)
                      for l in layers])
    wo = jnp.stack([l["wo"] for l in layers])
    bo = jnp.stack([l["bo"].reshape(1, HIDDEN) for l in layers])
    ln1g = jnp.stack([l["ln1_g"].reshape(1, HIDDEN) for l in layers])
    ln1b = jnp.stack([l["ln1_b"].reshape(1, HIDDEN) for l in layers])
    wi = jnp.stack([l["wi"] for l in layers])
    bi = jnp.stack([l["bi"].reshape(1, INTER) for l in layers])
    wf = jnp.stack([l["wf"] for l in layers])
    bf = jnp.stack([l["bf"].reshape(1, HIDDEN) for l in layers])
    ln2g = jnp.stack([l["ln2_g"].reshape(1, HIDDEN) for l in layers])
    ln2b = jnp.stack([l["ln2_b"].reshape(1, HIDDEN) for l in layers])

    hs, logits, loss = pl.pallas_call(
        functools.partial(_bert_fused_kernel, batch=B, seq=S),
        out_shape=(
            jax.ShapeDtypeStruct((N_LAYERS + 1, B * S, HIDDEN), jnp.float32),
            jax.ShapeDtypeStruct((B, N_CLASSES), jnp.float32),
            jax.ShapeDtypeStruct((1, 1), jnp.float32),
        ),
    )(emb, add_mask, labels.astype(jnp.int32).reshape(B, 1),
      params["emb_ln_g"].reshape(1, HIDDEN), params["emb_ln_b"].reshape(1, HIDDEN),
      wqkv, bqkv, wo, bo, ln1g, ln1b, wi, bi, wf, bf, ln2g, ln2b,
      params["pool_w"], params["pool_b"].reshape(1, HIDDEN),
      params["cls_w"], params["cls_b"].reshape(1, N_CLASSES))

    hidden_states = tuple(hs[i].reshape(B, S, HIDDEN) for i in range(N_LAYERS + 1))
    return loss[0, 0], logits, hidden_states


# ----------------------------------- main ------------------------------------
if __name__ == "__main__":
    key = jax.random.PRNGKey(0)
    pkey, ikey, lkey = jax.random.split(key, 3)
    params = init_params(pkey)

    B, S = 2, 8
    input_ids = jax.random.randint(ikey, (B, S), 0, VOCAB, dtype=jnp.int32)
    attention_mask = jnp.ones((B, S), jnp.int32).at[1, 6:].set(0)   # some padding
    token_type_ids = jnp.zeros((B, S), jnp.int32)
    labels = jax.random.randint(lkey, (B,), 0, N_CLASSES, dtype=jnp.int32)

    loss, logits, hidden_states = bert_classifier_forward(
        params, input_ids, attention_mask, token_type_ids, labels)

    jax.block_until_ready(loss)
    jax.block_until_ready(logits)
    for h in hidden_states:
        jax.block_until_ready(h)

    assert logits.shape == (B, N_CLASSES)
    assert len(hidden_states) == N_LAYERS + 1
    assert all(h.shape == (B, S, HIDDEN) for h in hidden_states)
    print("KERNEL_OK")
</pallas_src>

<mosaic_0001>
module attributes {stable_mosaic.version = 11 : i64} {
  func.func @_bert_fused_kernel(%arg0: memref<16x32xf32, #tpu.memory_space<vmem>>, %arg1: memref<2x8xf32, #tpu.memory_space<vmem>>, %arg2: memref<2x1xi32, #tpu.memory_space<vmem>>, %arg3: memref<1x32xf32, #tpu.memory_space<vmem>>, %arg4: memref<1x32xf32, #tpu.memory_space<vmem>>, %arg5: memref<2x32x96xf32, #tpu.memory_space<vmem>>, %arg6: memref<2x1x96xf32, #tpu.memory_space<vmem>>, %arg7: memref<2x32x32xf32, #tpu.memory_space<vmem>>, %arg8: memref<2x1x32xf32, #tpu.memory_space<vmem>>, %arg9: memref<2x1x32xf32, #tpu.memory_space<vmem>>, %arg10: memref<2x1x32xf32, #tpu.memory_space<vmem>>, %arg11: memref<2x32x64xf32, #tpu.memory_space<vmem>>, %arg12: memref<2x1x64xf32, #tpu.memory_space<vmem>>, %arg13: memref<2x64x32xf32, #tpu.memory_space<vmem>>, %arg14: memref<2x1x32xf32, #tpu.memory_space<vmem>>, %arg15: memref<2x1x32xf32, #tpu.memory_space<vmem>>, %arg16: memref<2x1x32xf32, #tpu.memory_space<vmem>>, %arg17: memref<32x32xf32, #tpu.memory_space<vmem>>, %arg18: memref<1x32xf32, #tpu.memory_space<vmem>>, %arg19: memref<32x3xf32, #tpu.memory_space<vmem>>, %arg20: memref<1x3xf32, #tpu.memory_space<vmem>>, %arg21: memref<3x16x32xf32, #tpu.memory_space<vmem>>, %arg22: memref<2x3xf32, #tpu.memory_space<vmem>>, %arg23: memref<1x1xf32, #tpu.memory_space<vmem>>) attributes {dimension_semantics = [], scalar_prefetch = 0 : i64, scratch_operands = 0 : i64, tpu.core_type = #tpu.core_type<tc>} {
    %c0 = arith.constant 0 : index
    %c0_0 = arith.constant 0 : index
    %0 = vector.load %arg0[%c0, %c0_0] : memref<16x32xf32, #tpu.memory_space<vmem>>, vector<16x32xf32>
    %c0_1 = arith.constant 0 : index
    %c0_2 = arith.constant 0 : index
    %1 = vector.load %arg3[%c0_1, %c0_2] : memref<1x32xf32, #tpu.memory_space<vmem>>, vector<1x32xf32>
    %c0_3 = arith.constant 0 : index
    %c0_4 = arith.constant 0 : index
    %2 = vector.load %arg4[%c0_3, %c0_4] : memref<1x32xf32, #tpu.memory_space<vmem>>, vector<1x32xf32>
    %cst = arith.constant dense<0.000000e+00> : vector<16xf32>
    %3 = vector.multi_reduction <add>, %0, %cst [1] : vector<16x32xf32> to vector<16xf32>
    %4 = vector.shape_cast %3 : vector<16xf32> to vector<16x1xf32>
    %cst_5 = arith.constant 3.200000e+01 : f32
    %5 = vector.broadcast %cst_5 : f32 to vector<16x1xf32>
    %6 = arith.divf %4, %5 : vector<16x1xf32>
    %7 = vector.broadcast %6 : vector<16x1xf32> to vector<16x32xf32>
    %8 = arith.subf %0, %7 : vector<16x32xf32>
    %9 = arith.mulf %8, %8 : vector<16x32xf32>
    %cst_6 = arith.constant dense<0.000000e+00> : vector<16xf32>
    %10 = vector.multi_reduction <add>, %9, %cst_6 [1] : vector<16x32xf32> to vector<16xf32>
    %11 = vector.shape_cast %10 : vector<16xf32> to vector<16x1xf32>
    %cst_7 = arith.constant 3.200000e+01 : f32
    %12 = vector.broadcast %cst_7 : f32 to vector<16x1xf32>
    %13 = arith.divf %11, %12 : vector<16x1xf32>
    %cst_8 = arith.constant 9.99999996E-13 : f32
    %14 = vector.broadcast %cst_8 : f32 to vector<16x1xf32>
    %15 = arith.addf %13, %14 : vector<16x1xf32>
    %16 = math.rsqrt %15 : vector<16x1xf32>
    %17 = vector.broadcast %16 : vector<16x1xf32> to vector<16x32xf32>
    %18 = arith.mulf %8, %17 : vector<16x32xf32>
    %19 = vector.broadcast %1 : vector<1x32xf32> to vector<16x32xf32>
    %20 = arith.mulf %18, %19 : vector<16x32xf32>
    %21 = vector.broadcast %2 : vector<1x32xf32> to vector<16x32xf32>
    %22 = arith.addf %20, %21 : vector<16x32xf32>
    %c0_9 = arith.constant 0 : index
    %c0_10 = arith.constant 0 : index
    %c0_11 = arith.constant 0 : index
    %23 = vector.load %arg21[%c0_9, %c0_10, %c0_11] : memref<3x16x32xf32, #tpu.memory_space<vmem>>, vector<1x16x32xf32>
    %24 = vector.shape_cast %23 : vector<1x16x32xf32> to vector<16x32xf32>
    %25 = vector.shape_cast %22 : vector<16x32xf32> to vector<1x16x32xf32>
    tpu.vector_store %arg21[%c0_9, %c0_10, %c0_11], %25 {strides = array<i32>} : memref<3x16x32xf32, #tpu.memory_space<vmem>>, vector<1x16x32xf32>,
    %c0_12 = arith.constant 0 : index
    %c0_13 = arith.constant 0 : index
    %c0_14 = arith.constant 0 : index
    %26 = vector.load %arg5[%c0_12, %c0_13, %c0_14] : memref<2x32x96xf32, #tpu.memory_space<vmem>>, vector<1x32x96xf32>
    %27 = vector.shape_cast %26 : vector<1x32x96xf32> to vector<32x96xf32>
    %cst_15 = arith.constant dense<0.000000e+00> : vector<16x96xf32>
    %28 = tpu.matmul %22, %27, %cst_15 {dimension_numbers = #tpu.dot_dimension_numbers<[1], [0], [0], [1], [0, 0, 1, 1], [], []>} : vector<16x32xf32>, vector<32x96xf32>, vector<16x96xf32> -> vector<16x96xf32>
    %c0_16 = arith.constant 0 : index
    %c0_17 = arith.constant 0 : index
    %c0_18 = arith.constant 0 : index
    %29 = vector.load %arg6[%c0_16, %c0_17, %c0_18] : memref<2x1x96xf32, #tpu.memory_space<vmem>>, vector<1x1x96xf32>
    %30 = vector.shape_cast %29 : vector<1x1x96xf32> to vector<1x96xf32>
    %31 = vector.broadcast %30 : vector<1x96xf32> to vector<16x96xf32>
    %32 = arith.addf %28, %31 : vector<16x96xf32>
    %c0_19 = arith.constant 0 : index
    %c0_20 = arith.constant 0 : index
    %c0_21 = arith.constant 0 : index
    %33 = vector.load %arg7[%c0_19, %c0_20, %c0_21] : memref<2x32x32xf32, #tpu.memory_space<vmem>>, vector<1x32x32xf32>
    %34 = vector.shape_cast %33 : vector<1x32x32xf32> to vector<32x32xf32>
    %c0_22 = arith.constant 0 : index
    %c0_23 = arith.constant 0 : index
    %35 = vector.load %arg1[%c0_22, %c0_23] : memref<2x8xf32, #tpu.memory_space<vmem>>, vector<1x8xf32>
    %cst_24 = arith.constant 0.000000e+00 : f32
    %36 = vector.broadcast %cst_24 : f32 to vector<8x32xf32>
    %37 = vector.extract_strided_slice %32 {offsets = [0, 0], sizes = [8, 8], strides = [1, 1]} : vector<16x96xf32> to vector<8x8xf32>
    %38 = vector.extract_strided_slice %32 {offsets = [0, 32], sizes = [8, 8], strides = [1, 1]} : vector<16x96xf32> to vector<8x8xf32>
    %39 = vector.extract_strided_slice %32 {offsets = [0, 64], sizes = [8, 8], strides = [1, 1]} : vector<16x96xf32> to vector<8x8xf32>
    %cst_25 = arith.constant dense<0.000000e+00> : vector<8x8xf32>
    %40 = tpu.matmul %37, %38, %cst_25 {dimension_numbers = #tpu.dot_dimension_numbers<[1], [1], [0], [0], [0, 0, 1, 0], [], []>} : vector<8x8xf32>, vector<8x8xf32>, vector<8x8xf32> -> vector<8x8xf32>
    %cst_26 = arith.constant 0.353553385 : f32
    %41 = vector.broadcast %cst_26 : f32 to vector<8x8xf32>
    %42 = arith.mulf %40, %41 : vector<8x8xf32>
    %43 = vector.broadcast %35 : vector<1x8xf32> to vector<8x8xf32>
    %44 = arith.addf %42, %43 : vector<8x8xf32>
    %cst_27 = arith.constant dense<0xFF800000> : vector<8xf32>
    %45 = vector.multi_reduction <maximumf>, %44, %cst_27 [1] : vector<8x8xf32> to vector<8xf32>
    %46 = vector.shape_cast %45 : vector<8xf32> to vector<8x1xf32>
    %47 = vector.broadcast %46 : vector<8x1xf32> to vector<8x8xf32>
    %48 = arith.subf %44, %47 : vector<8x8xf32>
    %49 = math.exp %48 : vector<8x8xf32>
    %cst_28 = arith.constant dense<0.000000e+00> : vector<8xf32>
    %50 = vector.multi_reduction <add>, %49, %cst_28 [1] : vector<8x8xf32> to vector<8xf32>
    %51 = vector.shape_cast %50 : vector<8xf32> to vector<8x1xf32>
    %52 = vector.broadcast %51 : vector<8x1xf32> to vector<8x8xf32>
    %53 = arith.divf %49, %52 : vector<8x8xf32>
    %cst_29 = arith.constant dense<0.000000e+00> : vector<8x8xf32>
    %54 = tpu.matmul %53, %39, %cst_29 {dimension_numbers = #tpu.dot_dimension_numbers<[1], [0], [0], [1], [0, 0, 1, 1], [], []>} : vector<8x8xf32>, vector<8x8xf32>, vector<8x8xf32> -> vector<8x8xf32>
    %55 = vector.extract_strided_slice %34 {offsets = [0, 0], sizes = [8, 32], strides = [1, 1]} : vector<32x32xf32> to vector<8x32xf32>
    %cst_30 = arith.constant dense<0.000000e+00> : vector<8x32xf32>
    %56 = tpu.matmul %54, %55, %cst_30 {dimension_numbers = #tpu.dot_dimension_numbers<[1], [0], [0], [1], [0, 0, 1, 1], [], []>} : vector<8x8xf32>, vector<8x32xf32>, vector<8x32xf32> -> vector<8x32xf32>
    %57 = arith.addf %36, %56 : vector<8x32xf32>
    %58 = vector.extract_strided_slice %32 {offsets = [0, 8], sizes = [8, 8], strides = [1, 1]} : vector<16x96xf32> to vector<8x8xf32>
    %59 = vector.extract_strided_slice %32 {offsets = [0, 40], sizes = [8, 8], strides = [1, 1]} : vector<16x96xf32> to vector<8x8xf32>
    %60 = vector.extract_strided_slice %32 {offsets = [0, 72], sizes = [8, 8], strides = [1, 1]} : vector<16x96xf32> to vector<8x8xf32>
    %cst_31 = arith.constant dense<0.000000e+00> : vector<8x8xf32>
    %61 = tpu.matmul %58, %59, %cst_31 {dimension_numbers = #tpu.dot_dimension_numbers<[1], [1], [0], [0], [0, 0, 1, 0], [], []>} : vector<8x8xf32>, vector<8x8xf32>, vector<8x8xf32> -> vector<8x8xf32>
    %cst_32 = arith.constant 0.353553385 : f32
    %62 = vector.broadcast %cst_32 : f32 to vector<8x8xf32>
    %63 = arith.mulf %61, %62 : vector<8x8xf32>
    %64 = vector.broadcast %35 : vector<1x8xf32> to vector<8x8xf32>
    %65 = arith.addf %63, %64 : vector<8x8xf32>
    %cst_33 = arith.constant dense<0xFF800000> : vector<8xf32>
    %66 = vector.multi_reduction <maximumf>, %65, %cst_33 [1] : vector<8x8xf32> to vector<8xf32>
    %67 = vector.shape_cast %66 : vector<8xf32> to vector<8x1xf32>
    %68 = vector.broadcast %67 : vector<8x1xf32> to vector<8x8xf32>
    %69 = arith.subf %65, %68 : vector<8x8xf32>
    %70 = math.exp %69 : vector<8x8xf32>
    %cst_34 = arith.constant dense<0.000000e+00> : vector<8xf32>
    %71 = vector.multi_reduction <add>, %70, %cst_34 [1] : vector<8x8xf32> to vector<8xf32>
    %72 = vector.shape_cast %71 : vector<8xf32> to vector<8x1xf32>
    %73 = vector.broadcast %72 : vector<8x1xf32> to vector<8x8xf32>
    %74 = arith.divf %70, %73 : vector<8x8xf32>
    %cst_35 = arith.constant dense<0.000000e+00> : vector<8x8xf32>
    %75 = tpu.matmul %74, %60, %cst_35 {dimension_numbers = #tpu.dot_dimension_numbers<[1], [0], [0], [1], [0, 0, 1, 1], [], []>} : vector<8x8xf32>, vector<8x8xf32>, vector<8x8xf32> -> vector<8x8xf32>
    %76 = vector.extract_strided_slice %34 {offsets = [8, 0], sizes = [8, 32], strides = [1, 1]} : vector<32x32xf32> to vector<8x32xf32>
    %cst_36 = arith.constant dense<0.000000e+00> : vector<8x32xf32>
    %77 = tpu.matmul %75, %76, %cst_36 {dimension_numbers = #tpu.dot_dimension_numbers<[1], [0], [0], [1], [0, 0, 1, 1], [], []>} : vector<8x8xf32>, vector<8x32xf32>, vector<8x32xf32> -> vector<8x32xf32>
    %78 = arith.addf %57, %77 : vector<8x32xf32>
    %79 = vector.extract_strided_slice %32 {offsets = [0, 16], sizes = [8, 8], strides = [1, 1]} : vector<16x96xf32> to vector<8x8xf32>
    %80 = vector.extract_strided_slice %32 {offsets = [0, 48], sizes = [8, 8], strides = [1, 1]} : vector<16x96xf32> to vector<8x8xf32>
    %81 = vector.extract_strided_slice %32 {offsets = [0, 80], sizes = [8, 8], strides = [1, 1]} : vector<16x96xf32> to vector<8x8xf32>
    %cst_37 = arith.constant dense<0.000000e+00> : vector<8x8xf32>
    %82 = tpu.matmul %79, %80, %cst_37 {dimension_numbers = #tpu.dot_dimension_numbers<[1], [1], [0], [0], [0, 0, 1, 0], [], []>} : vector<8x8xf32>, vector<8x8xf32>, vector<8x8xf32> -> vector<8x8xf32>
    %cst_38 = arith.constant 0.353553385 : f32
    %83 = vector.broadcast %cst_38 : f32 to vector<8x8xf32>
    %84 = arith.mulf %82, %83 : vector<8x8xf32>
    %85 = vector.broadcast %35 : vector<1x8xf32> to vector<8x8xf32>
    %86 = arith.addf %84, %85 : vector<8x8xf32>
    %cst_39 = arith.constant dense<0xFF800000> : vector<8xf32>
    %87 = vector.multi_reduction <maximumf>, %86, %cst_39 [1] : vector<8x8xf32> to vector<8xf32>
    %88 = vector.shape_cast %87 : vector<8xf32> to vector<8x1xf32>
    %89 = vector.broadcast %88 : vector<8x1xf32> to vector<8x8xf32>
    %90 = arith.subf %86, %89 : vector<8x8xf32>
    %91 = math.exp %90 : vector<8x8xf32>
    %cst_40 = arith.constant dense<0.000000e+00> : vector<8xf32>
    %92 = vector.multi_reduction <add>, %91, %cst_40 [1] : vector<8x8xf32> to vector<8xf32>
    %93 = vector.shape_cast %92 : vector<8xf32> to vector<8x1xf32>
    %94 = vector.broadcast %93 : vector<8x1xf32> to vector<8x8xf32>
    %95 = arith.divf %91, %94 : vector<8x8xf32>
    %cst_41 = arith.constant dense<0.000000e+00> : vector<8x8xf32>
    %96 = tpu.matmul %95, %81, %cst_41 {dimension_numbers = #tpu.dot_dimension_numbers<[1], [0], [0], [1], [0, 0, 1, 1], [], []>} : vector<8x8xf32>, vector<8x8xf32>, vector<8x8xf32> -> vector<8x8xf32>
    %97 = vector.extract_strided_slice %34 {offsets = [16, 0], sizes = [8, 32], strides = [1, 1]} : vector<32x32xf32> to vector<8x32xf32>
    %cst_42 = arith.constant dense<0.000000e+00> : vector<8x32xf32>
    %98 = tpu.matmul %96, %97, %cst_42 {dimension_numbers = #tpu.dot_dimension_numbers<[1], [0], [0], [1], [0, 0, 1, 1], [], []>} : vector<8x8xf32>, vector<8x32xf32>, vector<8x32xf32> -> vector<8x32xf32>
    %99 = arith.addf %78, %98 : vector<8x32xf32>
    %100 = vector.extract_strided_slice %32 {offsets = [0, 24], sizes = [8, 8], strides = [1, 1]} : vector<16x96xf32> to vector<8x8xf32>
    %101 = vector.extract_strided_slice %32 {offsets = [0, 56], sizes = [8, 8], strides = [1, 1]} : vector<16x96xf32> to vector<8x8xf32>
    %102 = vector.extract_strided_slice %32 {offsets = [0, 88], sizes = [8, 8], strides = [1, 1]} : vector<16x96xf32> to vector<8x8xf32>
    %cst_43 = arith.constant dense<0.000000e+00> : vector<8x8xf32>
    %103 = tpu.matmul %100, %101, %cst_43 {dimension_numbers = #tpu.dot_dimension_numbers<[1], [1], [0], [0], [0, 0, 1, 0], [], []>} : vector<8x8xf32>, vector<8x8xf32>, vector<8x8xf32> -> vector<8x8xf32>
    %cst_44 = arith.constant 0.353553385 : f32
    %104 = vector.broadcast %cst_44 : f32 to vector<8x8xf32>
    %105 = arith.mulf %103, %104 : vector<8x8xf32>
    %106 = vector.broadcast %35 : vector<1x8xf32> to vector<8x8xf32>
    %107 = arith.addf %105, %106 : vector<8x8xf32>
    %cst_45 = arith.constant dense<0xFF800000> : vector<8xf32>
    %108 = vector.multi_reduction <maximumf>, %107, %cst_45 [1] : vector<8x8xf32> to vector<8xf32>
    %109 = vector.shape_cast %108 : vector<8xf32> to vector<8x1xf32>
    %110 = vector.broadcast %109 : vector<8x1xf32> to vector<8x8xf32>
    %111 = arith.subf %107, %110 : vector<8x8xf32>
    %112 = math.exp %111 : vector<8x8xf32>
    %cst_46 = arith.constant dense<0.000000e+00> : vector<8xf32>
    %113 = vector.multi_reduction <add>, %112, %cst_46 [1] : vector<8x8xf32> to vector<8xf32>
    %114 = vector.shape_cast %113 : vector<8xf32> to vector<8x1xf32>
    %115 = vector.broadcast %114 : vector<8x1xf32> to vector<8x8xf32>
    %116 = arith.divf %112, %115 : vector<8x8xf32>
    %cst_47 = arith.constant dense<0.000000e+00> : vector<8x8xf32>
    %117 = tpu.matmul %116, %102, %cst_47 {dimension_numbers = #tpu.dot_dimension_numbers<[1], [0], [0], [1], [0, 0, 1, 1], [], []>} : vector<8x8xf32>, vector<8x8xf32>, vector<8x8xf32> -> vector<8x8xf32>
    %118 = vector.extract_strided_slice %34 {offsets = [24, 0], sizes = [8, 32], strides = [1, 1]} : vector<32x32xf32> to vector<8x32xf32>
    %cst_48 = arith.constant dense<0.000000e+00> : vector<8x32xf32>
    %119 = tpu.matmul %117, %118, %cst_48 {dimension_numbers = #tpu.dot_dimension_numbers<[1], [0], [0], [1], [0, 0, 1, 1], [], []>} : vector<8x8xf32>, vector<8x32xf32>, vector<8x32xf32> -> vector<8x32xf32>
    %120 = arith.addf %99, %119 : vector<8x32xf32>
    %c1 = arith.constant 1 : index
    %c0_49 = arith.constant 0 : index
    %121 = vector.load %arg1[%c1, %c0_49] : memref<2x8xf32, #tpu.memory_space<vmem>>, vector<1x8xf32>
    %cst_50 = arith.constant 0.000000e+00 : f32
    %122 = vector.broadcast %cst_50 : f32 to vector<8x32xf32>
    %123 = vector.extract_strided_slice %32 {offsets = [8, 0], sizes = [8, 8], strides = [1, 1]} : vector<16x96xf32> to vector<8x8xf32>
    %124 = vector.extract_strided_slice %32 {offsets = [8, 32], sizes = [8, 8], strides = [1, 1]} : vector<16x96xf32> to vector<8x8xf32>
    %125 = vector.extract_strided_slice %32 {offsets = [8, 64], sizes = [8, 8], strides = [1, 1]} : vector<16x96xf32> to vector<8x8xf32>
    %cst_51 = arith.constant dense<0.000000e+00> : vector<8x8xf32>
    %126 = tpu.matmul %123, %124, %cst_51 {dimension_numbers = #tpu.dot_dimension_numbers<[1], [1], [0], [0], [0, 0, 1, 0], [], []>} : vector<8x8xf32>, vector<8x8xf32>, vector<8x8xf32> -> vector<8x8xf32>
    %cst_52 = arith.constant 0.353553385 : f32
    %127 = vector.broadcast %cst_52 : f32 to vector<8x8xf32>
    %128 = arith.mulf %126, %127 : vector<8x8xf32>
    %129 = vector.broadcast %121 : vector<1x8xf32> to vector<8x8xf32>
    %130 = arith.addf %128, %129 : vector<8x8xf32>
    %cst_53 = arith.constant dense<0xFF800000> : vector<8xf32>
    %131 = vector.multi_reduction <maximumf>, %130, %cst_53 [1] : vector<8x8xf32> to vector<8xf32>
    %132 = vector.shape_cast %131 : vector<8xf32> to vector<8x1xf32>
    %133 = vector.broadcast %132 : vector<8x1xf32> to vector<8x8xf32>
    %134 = arith.subf %130, %133 : vector<8x8xf32>
    %135 = math.exp %134 : vector<8x8xf32>
    %cst_54 = arith.constant dense<0.000000e+00> : vector<8xf32>
    %136 = vector.multi_reduction <add>, %135, %cst_54 [1] : vector<8x8xf32> to vector<8xf32>
    %137 = vector.shape_cast %136 : vector<8xf32> to vector<8x1xf32>
    %138 = vector.broadcast %137 : vector<8x1xf32> to vector<8x8xf32>
    %139 = arith.divf %135, %138 : vector<8x8xf32>
    %cst_55 = arith.constant dense<0.000000e+00> : vector<8x8xf32>
    %140 = tpu.matmul %139, %125, %cst_55 {dimension_numbers = #tpu.dot_dimension_numbers<[1], [0], [0], [1], [0, 0, 1, 1], [], []>} : vector<8x8xf32>, vector<8x8xf32>, vector<8x8xf32> -> vector<8x8xf32>
    %141 = vector.extract_strided_slice %34 {offsets = [0, 0], sizes = [8, 32], strides = [1, 1]} : vector<32x32xf32> to vector<8x32xf32>
    %cst_56 = arith.constant dense<0.000000e+00> : vector<8x32xf32>
    %142 = tpu.matmul %140, %141, %cst_56 {dimension_numbers = #tpu.dot_dimension_numbers<[1], [0], [0], [1], [0, 0, 1, 1], [], []>} : vector<8x8xf32>, vector<8x32xf32>, vector<8x32xf32> -> vector<8x32xf32>
    %143 = arith.addf %122, %142 : vector<8x32xf32>
    %144 = vector.extract_strided_slice %32 {offsets = [8, 8], sizes = [8, 8], strides = [1, 1]} : vector<16x96xf32> to vector<8x8xf32>
    %145 = vector.extract_strided_slice %32 {offsets = [8, 40], sizes = [8, 8], strides = [1, 1]} : vector<16x96xf32> to vector<8x8xf32>
    %146 = vector.extract_strided_slice %32 {offsets = [8, 72], sizes = [8, 8], strides = [1, 1]} : vector<16x96xf32> to vector<8x8xf32>
    %cst_57 = arith.constant dense<0.000000e+00> : vector<8x8xf32>
    %147 = tpu.matmul %144, %145, %cst_57 {dimension_numbers = #tpu.dot_dimension_numbers<[1], [1], [0], [0], [0, 0, 1, 0], [], []>} : vector<8x8xf32>, vector<8x8xf32>, vector<8x8xf32> -> vector<8x8xf32>
    %cst_58 = arith.constant 0.353553385 : f32
    %148 = vector.broadcast %cst_58 : f32 to vector<8x8xf32>
    %149 = arith.mulf %147, %148 : vector<8x8xf32>
    %150 = vector.broadcast %121 : vector<1x8xf32> to vector<8x8xf32>
    %151 = arith.addf %149, %150 : vector<8x8xf32>
    %cst_59 = arith.constant dense<0xFF800000> : vector<8xf32>
    %152 = vector.multi_reduction <maximumf>, %151, %cst_59 [1] : vector<8x8xf32> to vector<8xf32>
    %153 = vector.shape_cast %152 : vector<8xf32> to vector<8x1xf32>
    %154 = vector.broadcast %153 : vector<8x1xf32> to vector<8x8xf32>
    %155 = arith.subf %151, %154 : vector<8x8xf32>
    %156 = math.exp %155 : vector<8x8xf32>
    %cst_60 = arith.constant dense<0.000000e+00> : vector<8xf32>
    %157 = vector.multi_reduction <add>, %156, %cst_60 [1] : vector<8x8xf32> to vector<8xf32>
    %158 = vector.shape_cast %157 : vector<8xf32> to vector<8x1xf32>
    %159 = vector.broadcast %158 : vector<8x1xf32> to vector<8x8xf32>
    %160 = arith.divf %156, %159 : vector<8x8xf32>
    %cst_61 = arith.constant dense<0.000000e+00> : vector<8x8xf32>
    %161 = tpu.matmul %160, %146, %cst_61 {dimension_numbers = #tpu.dot_dimension_numbers<[1], [0], [0], [1], [0, 0, 1, 1], [], []>} : vector<8x8xf32>, vector<8x8xf32>, vector<8x8xf32> -> vector<8x8xf32>
    %162 = vector.extract_strided_slice %34 {offsets = [8, 0], sizes = [8, 32], strides = [1, 1]} : vector<32x32xf32> to vector<8x32xf32>
    %cst_62 = arith.constant dense<0.000000e+00> : vector<8x32xf32>
    %163 = tpu.matmul %161, %162, %cst_62 {dimension_numbers = #tpu.dot_dimension_numbers<[1], [0], [0], [1], [0, 0, 1, 1], [], []>} : vector<8x8xf32>, vector<8x32xf32>, vector<8x32xf32> -> vector<8x32xf32>
    %164 = arith.addf %143, %163 : vector<8x32xf32>
    %165 = vector.extract_strided_slice %32 {offsets = [8, 16], sizes = [8, 8], strides = [1, 1]} : vector<16x96xf32> to vector<8x8xf32>
    %166 = vector.extract_strided_slice %32 {offsets = [8, 48], sizes = [8, 8], strides = [1, 1]} : vector<16x96xf32> to vector<8x8xf32>
    %167 = vector.extract_strided_slice %32 {offsets = [8, 80], sizes = [8, 8], strides = [1, 1]} : vector<16x96xf32> to vector<8x8xf32>
    %cst_63 = arith.constant dense<0.000000e+00> : vector<8x8xf32>
    %168 = tpu.matmul %165, %166, %cst_63 {dimension_numbers = #tpu.dot_dimension_numbers<[1], [1], [0], [0], [0, 0, 1, 0], [], []>} : vector<8x8xf32>, vector<8x8xf32>, vector<8x8xf32> -> vector<8x8xf32>
    %cst_64 = arith.constant 0.353553385 : f32
    %169 = vector.broadcast %cst_64 : f32 to vector<8x8xf32>
    %170 = arith.mulf %168, %169 : vector<8x8xf32>
    %171 = vector.broadcast %121 : vector<1x8xf32> to vector<8x8xf32>
    %172 = arith.addf %170, %171 : vector<8x8xf32>
    %cst_65 = arith.constant dense<0xFF800000> : vector<8xf32>
    %173 = vector.multi_reduction <maximumf>, %172, %cst_65 [1] : vector<8x8xf32> to vector<8xf32>
    %174 = vector.shape_cast %173 : vector<8xf32> to vector<8x1xf32>
    %175 = vector.broadcast %174 : vector<8x1xf32> to vector<8x8xf32>
    %176 = arith.subf %172, %175 : vector<8x8xf32>
    %177 = math.exp %176 : vector<8x8xf32>
    %cst_66 = arith.constant dense<0.000000e+00> : vector<8xf32>
    %178 = vector.multi_reduction <add>, %177, %cst_66 [1] : vector<8x8xf32> to vector<8xf32>
    %179 = vector.shape_cast %178 : vector<8xf32> to vector<8x1xf32>
    %180 = vector.broadcast %179 : vector<8x1xf32> to vector<8x8xf32>
    %181 = arith.divf %177, %180 : vector<8x8xf32>
    %cst_67 = arith.constant dense<0.000000e+00> : vector<8x8xf32>
    %182 = tpu.matmul %181, %167, %cst_67 {dimension_numbers = #tpu.dot_dimension_numbers<[1], [0], [0], [1], [0, 0, 1, 1], [], []>} : vector<8x8xf32>, vector<8x8xf32>, vector<8x8xf32> -> vector<8x8xf32>
    %183 = vector.extract_strided_slice %34 {offsets = [16, 0], sizes = [8, 32], strides = [1, 1]} : vector<32x32xf32> to vector<8x32xf32>
    %cst_68 = arith.constant dense<0.000000e+00> : vector<8x32xf32>
    %184 = tpu.matmul %182, %183, %cst_68 {dimension_numbers = #tpu.dot_dimension_numbers<[1], [0], [0], [1], [0, 0, 1, 1], [], []>} : vector<8x8xf32>, vector<8x32xf32>, vector<8x32xf32> -> vector<8x32xf32>
    %185 = arith.addf %164, %184 : vector<8x32xf32>
    %186 = vector.extract_strided_slice %32 {offsets = [8, 24], sizes = [8, 8], strides = [1, 1]} : vector<16x96xf32> to vector<8x8xf32>
    %187 = vector.extract_strided_slice %32 {offsets = [8, 56], sizes = [8, 8], strides = [1, 1]} : vector<16x96xf32> to vector<8x8xf32>
    %188 = vector.extract_strided_slice %32 {offsets = [8, 88], sizes = [8, 8], strides = [1, 1]} : vector<16x96xf32> to vector<8x8xf32>
    %cst_69 = arith.constant dense<0.000000e+00> : vector<8x8xf32>
    %189 = tpu.matmul %186, %187, %cst_69 {dimension_numbers = #tpu.dot_dimension_numbers<[1], [1], [0], [0], [0, 0, 1, 0], [], []>} : vector<8x8xf32>, vector<8x8xf32>, vector<8x8xf32> -> vector<8x8xf32>
    %cst_70 = arith.constant 0.353553385 : f32
    %190 = vector.broadcast %cst_70 : f32 to vector<8x8xf32>
    %191 = arith.mulf %189, %190 : vector<8x8xf32>
    %192 = vector.broadcast %121 : vector<1x8xf32> to vector<8x8xf32>
    %193 = arith.addf %191, %192 : vector<8x8xf32>
    %cst_71 = arith.constant dense<0xFF800000> : vector<8xf32>
    %194 = vector.multi_reduction <maximumf>, %193, %cst_71 [1] : vector<8x8xf32> to vector<8xf32>
    %195 = vector.shape_cast %194 : vector<8xf32> to vector<8x1xf32>
    %196 = vector.broadcast %195 : vector<8x1xf32> to vector<8x8xf32>
    %197 = arith.subf %193, %196 : vector<8x8xf32>
    %198 = math.exp %197 : vector<8x8xf32>
    %cst_72 = arith.constant dense<0.000000e+00> : vector<8xf32>
    %199 = vector.multi_reduction <add>, %198, %cst_72 [1] : vector<8x8xf32> to vector<8xf32>
    %200 = vector.shape_cast %199 : vector<8xf32> to vector<8x1xf32>
    %201 = vector.broadcast %200 : vector<8x1xf32> to vector<8x8xf32>
    %202 = arith.divf %198, %201 : vector<8x8xf32>
    %cst_73 = arith.constant dense<0.000000e+00> : vector<8x8xf32>
    %203 = tpu.matmul %202, %188, %cst_73 {dimension_numbers = #tpu.dot_dimension_numbers<[1], [0], [0], [1], [0, 0, 1, 1], [], []>} : vector<8x8xf32>, vector<8x8xf32>, vector<8x8xf32> -> vector<8x8xf32>
    %204 = vector.extract_strided_slice %34 {offsets = [24, 0], sizes = [8, 32], strides = [1, 1]} : vector<32x32xf32> to vector<8x32xf32>
    %cst_74 = arith.constant dense<0.000000e+00> : vector<8x32xf32>
    %205 = tpu.matmul %203, %204, %cst_74 {dimension_numbers = #tpu.dot_dimension_numbers<[1], [0], [0], [1], [0, 0, 1, 1], [], []>} : vector<8x8xf32>, vector<8x32xf32>, vector<8x32xf32> -> vector<8x32xf32>
    %206 = arith.addf %185, %205 : vector<8x32xf32>
    %207 = tpu.concatenate %120, %206 in 0 : vector<8x32xf32>, vector<8x32xf32> -> vector<16x32xf32>
    %c0_75 = arith.constant 0 : index
    %c0_76 = arith.constant 0 : index
    %c0_77 = arith.constant 0 : index
    %208 = vector.load %arg8[%c0_75, %c0_76, %c0_77] : memref<2x1x32xf32, #tpu.memory_space<vmem>>, vector<1x1x32xf32>
    %209 = vector.shape_cast %208 : vector<1x1x32xf32> to vector<1x32xf32>
    %210 = vector.broadcast %209 : vector<1x32xf32> to vector<16x32xf32>
    %211 = arith.addf %207, %210 : vector<16x32xf32>
    %212 = arith.addf %211, %22 : vector<16x32xf32>
    %c0_78 = arith.constant 0 : index
    %c0_79 = arith.constant 0 : index
    %c0_80 = arith.constant 0 : index
    %213 = vector.load %arg9[%c0_78, %c0_79, %c0_80] : memref<2x1x32xf32, #tpu.memory_space<vmem>>, vector<1x1x32xf32>
    %214 = vector.shape_cast %213 : vector<1x1x32xf32> to vector<1x32xf32>
    %c0_81 = arith.constant 0 : index
    %c0_82 = arith.constant 0 : index
    %c0_83 = arith.constant 0 : index
    %215 = vector.load %arg10[%c0_81, %c0_82, %c0_83] : memref<2x1x32xf32, #tpu.memory_space<vmem>>, vector<1x1x32xf32>
    %216 = vector.shape_cast %215 : vector<1x1x32xf32> to vector<1x32xf32>
    %cst_84 = arith.constant dense<0.000000e+00> : vector<16xf32>
    %217 = vector.multi_reduction <add>, %212, %cst_84 [1] : vector<16x32xf32> to vector<16xf32>
    %218 = vector.shape_cast %217 : vector<16xf32> to vector<16x1xf32>
    %cst_85 = arith.constant 3.200000e+01 : f32
    %219 = vector.broadcast %cst_85 : f32 to vector<16x1xf32>
    %220 = arith.divf %218, %219 : vector<16x1xf32>
    %221 = vector.broadcast %220 : vector<16x1xf32> to vector<16x32xf32>
    %222 = arith.subf %212, %221 : vector<16x32xf32>
    %223 = arith.mulf %222, %222 : vector<16x32xf32>
    %cst_86 = arith.constant dense<0.000000e+00> : vector<16xf32>
    %224 = vector.multi_reduction <add>, %223, %cst_86 [1] : vector<16x32xf32> to vector<16xf32>
    %225 = vector.shape_cast %224 : vector<16xf32> to vector<16x1xf32>
    %cst_87 = arith.constant 3.200000e+01 : f32
    %226 = vector.broadcast %cst_87 : f32 to vector<16x1xf32>
    %227 = arith.divf %225, %226 : vector<16x1xf32>
    %cst_88 = arith.constant 9.99999996E-13 : f32
    %228 = vector.broadcast %cst_88 : f32 to vector<16x1xf32>
    %229 = arith.addf %227, %228 : vector<16x1xf32>
    %230 = math.rsqrt %229 : vector<16x1xf32>
    %231 = vector.broadcast %230 : vector<16x1xf32> to vector<16x32xf32>
    %232 = arith.mulf %222, %231 : vector<16x32xf32>
    %233 = vector.broadcast %214 : vector<1x32xf32> to vector<16x32xf32>
    %234 = arith.mulf %232, %233 : vector<16x32xf32>
    %235 = vector.broadcast %216 : vector<1x32xf32> to vector<16x32xf32>
    %236 = arith.addf %234, %235 : vector<16x32xf32>
    %c0_89 = arith.constant 0 : index
    %c0_90 = arith.constant 0 : index
    %c0_91 = arith.constant 0 : index
    %237 = vector.load %arg11[%c0_89, %c0_90, %c0_91] : memref<2x32x64xf32, #tpu.memory_space<vmem>>, vector<1x32x64xf32>
    %238 = vector.shape_cast %237 : vector<1x32x64xf32> to vector<32x64xf32>
    %cst_92 = arith.constant dense<0.000000e+00> : vector<16x64xf32>
    %239 = tpu.matmul %236, %238, %cst_92 {dimension_numbers = #tpu.dot_dimension_numbers<[1], [0], [0], [1], [0, 0, 1, 1], [], []>} : vector<16x32xf32>, vector<32x64xf32>, vector<16x64xf32> -> vector<16x64xf32>
    %c0_93 = arith.constant 0 : index
    %c0_94 = arith.constant 0 : index
    %c0_95 = arith.constant 0 : index
    %240 = vector.load %arg12[%c0_93, %c0_94, %c0_95] : memref<2x1x64xf32, #tpu.memory_space<vmem>>, vector<1x1x64xf32>
    %241 = vector.shape_cast %240 : vector<1x1x64xf32> to vector<1x64xf32>
    %242 = vector.broadcast %241 : vector<1x64xf32> to vector<16x64xf32>
    %243 = arith.addf %239, %242 : vector<16x64xf32>
    %cst_96 = arith.constant 5.000000e-01 : f32
    %244 = vector.broadcast %cst_96 : f32 to vector<16x64xf32>
    %245 = arith.mulf %244, %243 : vector<16x64xf32>
    %cst_97 = arith.constant 4.471500e-02 : f32
    %246 = vector.broadcast %cst_97 : f32 to vector<16x64xf32>
    %247 = arith.mulf %246, %243 : vector<16x64xf32>
    %248 = arith.mulf %247, %243 : vector<16x64xf32>
    %249 = arith.mulf %248, %243 : vector<16x64xf32>
    %250 = arith.addf %243, %249 : vector<16x64xf32>
    %cst_98 = arith.constant 0.797884583 : f32
    %251 = vector.broadcast %cst_98 : f32 to vector<16x64xf32>
    %252 = arith.mulf %251, %250 : vector<16x64xf32>
    %253 = math.tanh %252 : vector<16x64xf32>
    %cst_99 = arith.constant 1.000000e+00 : f32
    %254 = vector.broadcast %cst_99 : f32 to vector<16x64xf32>
    %255 = arith.addf %254, %253 : vector<16x64xf32>
    %256 = arith.mulf %245, %255 : vector<16x64xf32>
    %c0_100 = arith.constant 0 : index
    %c0_101 = arith.constant 0 : index
    %c0_102 = arith.constant 0 : index
    %257 = vector.load %arg13[%c0_100, %c0_101, %c0_102] : memref<2x64x32xf32, #tpu.memory_space<vmem>>, vector<1x64x32xf32>
    %258 = vector.shape_cast %257 : vector<1x64x32xf32> to vector<64x32xf32>
    %cst_103 = arith.constant dense<0.000000e+00> : vector<16x32xf32>
    %259 = tpu.matmul %256, %258, %cst_103 {dimension_numbers = #tpu.dot_dimension_numbers<[1], [0], [0], [1], [0, 0, 1, 1], [], []>} : vector<16x64xf32>, vector<64x32xf32>, vector<16x32xf32> -> vector<16x32xf32>
    %c0_104 = arith.constant 0 : index
    %c0_105 = arith.constant 0 : index
    %c0_106 = arith.constant 0 : index
    %260 = vector.load %arg14[%c0_104, %c0_105, %c0_106] : memref<2x1x32xf32, #tpu.memory_space<vmem>>, vector<1x1x32xf32>
    %261 = vector.shape_cast %260 : vector<1x1x32xf32> to vector<1x32xf32>
    %262 = vector.broadcast %261 : vector<1x32xf32> to vector<16x32xf32>
    %263 = arith.addf %259, %262 : vector<16x32xf32>
    %264 = arith.addf %263, %236 : vector<16x32xf32>
    %c0_107 = arith.constant 0 : index
    %c0_108 = arith.constant 0 : index
    %c0_109 = arith.constant 0 : index
    %265 = vector.load %arg15[%c0_107, %c0_108, %c0_109] : memref<2x1x32xf32, #tpu.memory_space<vmem>>, vector<1x1x32xf32>
    %266 = vector.shape_cast %265 : vector<1x1x32xf32> to vector<1x32xf32>
    %c0_110 = arith.constant 0 : index
    %c0_111 = arith.constant 0 : index
    %c0_112 = arith.constant 0 : index
    %267 = vector.load %arg16[%c0_110, %c0_111, %c0_112] : memref<2x1x32xf32, #tpu.memory_space<vmem>>, vector<1x1x32xf32>
    %268 = vector.shape_cast %267 : vector<1x1x32xf32> to vector<1x32xf32>
    %cst_113 = arith.constant dense<0.000000e+00> : vector<16xf32>
    %269 = vector.multi_reduction <add>, %264, %cst_113 [1] : vector<16x32xf32> to vector<16xf32>
    %270 = vector.shape_cast %269 : vector<16xf32> to vector<16x1xf32>
    %cst_114 = arith.constant 3.200000e+01 : f32
    %271 = vector.broadcast %cst_114 : f32 to vector<16x1xf32>
    %272 = arith.divf %270, %271 : vector<16x1xf32>
    %273 = vector.broadcast %272 : vector<16x1xf32> to vector<16x32xf32>
    %274 = arith.subf %264, %273 : vector<16x32xf32>
    %275 = arith.mulf %274, %274 : vector<16x32xf32>
    %cst_115 = arith.constant dense<0.000000e+00> : vector<16xf32>
    %276 = vector.multi_reduction <add>, %275, %cst_115 [1] : vector<16x32xf32> to vector<16xf32>
    %277 = vector.shape_cast %276 : vector<16xf32> to vector<16x1xf32>
    %cst_116 = arith.constant 3.200000e+01 : f32
    %278 = vector.broadcast %cst_116 : f32 to vector<16x1xf32>
    %279 = arith.divf %277, %278 : vector<16x1xf32>
    %cst_117 = arith.constant 9.99999996E-13 : f32
    %280 = vector.broadcast %cst_117 : f32 to vector<16x1xf32>
    %281 = arith.addf %279, %280 : vector<16x1xf32>
    %282 = math.rsqrt %281 : vector<16x1xf32>
    %283 = vector.broadcast %282 : vector<16x1xf32> to vector<16x32xf32>
    %284 = arith.mulf %274, %283 : vector<16x32xf32>
    %285 = vector.broadcast %266 : vector<1x32xf32> to vector<16x32xf32>
    %286 = arith.mulf %284, %285 : vector<16x32xf32>
    %287 = vector.broadcast %268 : vector<1x32xf32> to vector<16x32xf32>
    %288 = arith.addf %286, %287 : vector<16x32xf32>
    %c1_118 = arith.constant 1 : index
    %c0_119 = arith.constant 0 : index
    %c0_120 = arith.constant 0 : index
    %289 = vector.load %arg21[%c1_118, %c0_119, %c0_120] : memref<3x16x32xf32, #tpu.memory_space<vmem>>, vector<1x16x32xf32>
    %290 = vector.shape_cast %289 : vector<1x16x32xf32> to vector<16x32xf32>
    %291 = vector.shape_cast %288 : vector<16x32xf32> to vector<1x16x32xf32>
    tpu.vector_store %arg21[%c1_118, %c0_119, %c0_120], %291 {strides = array<i32>} : memref<3x16x32xf32, #tpu.memory_space<vmem>>, vector<1x16x32xf32>,
    %c1_121 = arith.constant 1 : index
    %c0_122 = arith.constant 0 : index
    %c0_123 = arith.constant 0 : index
    %292 = vector.load %arg5[%c1_121, %c0_122, %c0_123] : memref<2x32x96xf32, #tpu.memory_space<vmem>>, vector<1x32x96xf32>
    %293 = vector.shape_cast %292 : vector<1x32x96xf32> to vector<32x96xf32>
    %cst_124 = arith.constant dense<0.000000e+00> : vector<16x96xf32>
    %294 = tpu.matmul %288, %293, %cst_124 {dimension_numbers = #tpu.dot_dimension_numbers<[1], [0], [0], [1], [0, 0, 1, 1], [], []>} : vector<16x32xf32>, vector<32x96xf32>, vector<16x96xf32> -> vector<16x96xf32>
    %c1_125 = arith.constant 1 : index
    %c0_126 = arith.constant 0 : index
    %c0_127 = arith.constant 0 : index
    %295 = vector.load %arg6[%c1_125, %c0_126, %c0_127] : memref<2x1x96xf32, #tpu.memory_space<vmem>>, vector<1x1x96xf32>
    %296 = vector.shape_cast %295 : vector<1x1x96xf32> to vector<1x96xf32>
    %297 = vector.broadcast %296 : vector<1x96xf32> to vector<16x96xf32>
    %298 = arith.addf %294, %297 : vector<16x96xf32>
    %c1_128 = arith.constant 1 : index
    %c0_129 = arith.constant 0 : index
    %c0_130 = arith.constant 0 : index
    %299 = vector.load %arg7[%c1_128, %c0_129, %c0_130] : memref<2x32x32xf32, #tpu.memory_space<vmem>>, vector<1x32x32xf32>
    %300 = vector.shape_cast %299 : vector<1x32x32xf32> to vector<32x32xf32>
    %c0_131 = arith.constant 0 : index
    %c0_132 = arith.constant 0 : index
    %301 = vector.load %arg1[%c0_131, %c0_132] : memref<2x8xf32, #tpu.memory_space<vmem>>, vector<1x8xf32>
    %cst_133 = arith.constant 0.000000e+00 : f32
    %302 = vector.broadcast %cst_133 : f32 to vector<8x32xf32>
    %303 = vector.extract_strided_slice %298 {offsets = [0, 0], sizes = [8, 8], strides = [1, 1]} : vector<16x96xf32> to vector<8x8xf32>
    %304 = vector.extract_strided_slice %298 {offsets = [0, 32], sizes = [8, 8], strides = [1, 1]} : vector<16x96xf32> to vector<8x8xf32>
    %305 = vector.extract_strided_slice %298 {offsets = [0, 64], sizes = [8, 8], strides = [1, 1]} : vector<16x96xf32> to vector<8x8xf32>
    %cst_134 = arith.constant dense<0.000000e+00> : vector<8x8xf32>
    %306 = tpu.matmul %303, %304, %cst_134 {dimension_numbers = #tpu.dot_dimension_numbers<[1], [1], [0], [0], [0, 0, 1, 0], [], []>} : vector<8x8xf32>, vector<8x8xf32>, vector<8x8xf32> -> vector<8x8xf32>
    %cst_135 = arith.constant 0.353553385 : f32
    %307 = vector.broadcast %cst_135 : f32 to vector<8x8xf32>
    %308 = arith.mulf %306, %307 : vector<8x8xf32>
    %309 = vector.broadcast %301 : vector<1x8xf32> to vector<8x8xf32>
    %310 = arith.addf %308, %309 : vector<8x8xf32>
    %cst_136 = arith.constant dense<0xFF800000> : vector<8xf32>
    %311 = vector.multi_reduction <maximumf>, %310, %cst_136 [1] : vector<8x8xf32> to vector<8xf32>
    %312 = vector.shape_cast %311 : vector<8xf32> to vector<8x1xf32>
    %313 = vector.broadcast %312 : vector<8x1xf32> to vector<8x8xf32>
    %314 = arith.subf %310, %313 : vector<8x8xf32>
    %315 = math.exp %314 : vector<8x8xf32>
    %cst_137 = arith.constant dense<0.000000e+00> : vector<8xf32>
    %316 = vector.multi_reduction <add>, %315, %cst_137 [1] : vector<8x8xf32> to vector<8xf32>
    %317 = vector.shape_cast %316 : vector<8xf32> to vector<8x1xf32>
    %318 = vector.broadcast %317 : vector<8x1xf32> to vector<8x8xf32>
    %319 = arith.divf %315, %318 : vector<8x8xf32>
    %cst_138 = arith.constant dense<0.000000e+00> : vector<8x8xf32>
    %320 = tpu.matmul %319, %305, %cst_138 {dimension_numbers = #tpu.dot_dimension_numbers<[1], [0], [0], [1], [0, 0, 1, 1], [], []>} : vector<8x8xf32>, vector<8x8xf32>, vector<8x8xf32> -> vector<8x8xf32>
    %321 = vector.extract_strided_slice %300 {offsets = [0, 0], sizes = [8, 32], strides = [1, 1]} : vector<32x32xf32> to vector<8x32xf32>
    %cst_139 = arith.constant dense<0.000000e+00> : vector<8x32xf32>
    %322 = tpu.matmul %320, %321, %cst_139 {dimension_numbers = #tpu.dot_dimension_numbers<[1], [0], [0], [1], [0, 0, 1, 1], [], []>} : vector<8x8xf32>, vector<8x32xf32>, vector<8x32xf32> -> vector<8x32xf32>
    %323 = arith.addf %302, %322 : vector<8x32xf32>
    %324 = vector.extract_strided_slice %298 {offsets = [0, 8], sizes = [8, 8], strides = [1, 1]} : vector<16x96xf32> to vector<8x8xf32>
    %325 = vector.extract_strided_slice %298 {offsets = [0, 40], sizes = [8, 8], strides = [1, 1]} : vector<16x96xf32> to vector<8x8xf32>
    %326 = vector.extract_strided_slice %298 {offsets = [0, 72], sizes = [8, 8], strides = [1, 1]} : vector<16x96xf32> to vector<8x8xf32>
    %cst_140 = arith.constant dense<0.000000e+00> : vector<8x8xf32>
    %327 = tpu.matmul %324, %325, %cst_140 {dimension_numbers = #tpu.dot_dimension_numbers<[1], [1], [0], [0], [0, 0, 1, 0], [], []>} : vector<8x8xf32>, vector<8x8xf32>, vector<8x8xf32> -> vector<8x8xf32>
    %cst_141 = arith.constant 0.353553385 : f32
    %328 = vector.broadcast %cst_141 : f32 to vector<8x8xf32>
    %329 = arith.mulf %327, %328 : vector<8x8xf32>
    %330 = vector.broadcast %301 : vector<1x8xf32> to vector<8x8xf32>
    %331 = arith.addf %329, %330 : vector<8x8xf32>
    %cst_142 = arith.constant dense<0xFF800000> : vector<8xf32>
    %332 = vector.multi_reduction <maximumf>, %331, %cst_142 [1] : vector<8x8xf32> to vector<8xf32>
    %333 = vector.shape_cast %332 : vector<8xf32> to vector<8x1xf32>
    %334 = vector.broadcast %333 : vector<8x1xf32> to vector<8x8xf32>
    %335 = arith.subf %331, %334 : vector<8x8xf32>
    %336 = math.exp %335 : vector<8x8xf32>
    %cst_143 = arith.constant dense<0.000000e+00> : vector<8xf32>
    %337 = vector.multi_reduction <add>, %336, %cst_143 [1] : vector<8x8xf32> to vector<8xf32>
    %338 = vector.shape_cast %337 : vector<8xf32> to vector<8x1xf32>
    %339 = vector.broadcast %338 : vector<8x1xf32> to vector<8x8xf32>
    %340 = arith.divf %336, %339 : vector<8x8xf32>
    %cst_144 = arith.constant dense<0.000000e+00> : vector<8x8xf32>
    %341 = tpu.matmul %340, %326, %cst_144 {dimension_numbers = #tpu.dot_dimension_numbers<[1], [0], [0], [1], [0, 0, 1, 1], [], []>} : vector<8x8xf32>, vector<8x8xf32>, vector<8x8xf32> -> vector<8x8xf32>
    %342 = vector.extract_strided_slice %300 {offsets = [8, 0], sizes = [8, 32], strides = [1, 1]} : vector<32x32xf32> to vector<8x32xf32>
    %cst_145 = arith.constant dense<0.000000e+00> : vector<8x32xf32>
    %343 = tpu.matmul %341, %342, %cst_145 {dimension_numbers = #tpu.dot_dimension_numbers<[1], [0], [0], [1], [0, 0, 1, 1], [], []>} : vector<8x8xf32>, vector<8x32xf32>, vector<8x32xf32> -> vector<8x32xf32>
    %344 = arith.addf %323, %343 : vector<8x32xf32>
    %345 = vector.extract_strided_slice %298 {offsets = [0, 16], sizes = [8, 8], strides = [1, 1]} : vector<16x96xf32> to vector<8x8xf32>
    %346 = vector.extract_strided_slice %298 {offsets = [0, 48], sizes = [8, 8], strides = [1, 1]} : vector<16x96xf32> to vector<8x8xf32>
    %347 = vector.extract_strided_slice %298 {offsets = [0, 80], sizes = [8, 8], strides = [1, 1]} : vector<16x96xf32> to vector<8x8xf32>
    %cst_146 = arith.constant dense<0.000000e+00> : vector<8x8xf32>
    %348 = tpu.matmul %345, %346, %cst_146 {dimension_numbers = #tpu.dot_dimension_numbers<[1], [1], [0], [0], [0, 0, 1, 0], [], []>} : vector<8x8xf32>, vector<8x8xf32>, vector<8x8xf32> -> vector<8x8xf32>
    %cst_147 = arith.constant 0.353553385 : f32
    %349 = vector.broadcast %cst_147 : f32 to vector<8x8xf32>
    %350 = arith.mulf %348, %349 : vector<8x8xf32>
    %351 = vector.broadcast %301 : vector<1x8xf32> to vector<8x8xf32>
    %352 = arith.addf %350, %351 : vector<8x8xf32>
    %cst_148 = arith.constant dense<0xFF800000> : vector<8xf32>
    %353 = vector.multi_reduction <maximumf>, %352, %cst_148 [1] : vector<8x8xf32> to vector<8xf32>
    %354 = vector.shape_cast %353 : vector<8xf32> to vector<8x1xf32>
    %355 = vector.broadcast %354 : vector<8x1xf32> to vector<8x8xf32>
    %356 = arith.subf %352, %355 : vector<8x8xf32>
    %357 = math.exp %356 : vector<8x8xf32>
    %cst_149 = arith.constant dense<0.000000e+00> : vector<8xf32>
    %358 = vector.multi_reduction <add>, %357, %cst_149 [1] : vector<8x8xf32> to vector<8xf32>
    %359 = vector.shape_cast %358 : vector<8xf32> to vector<8x1xf32>
    %360 = vector.broadcast %359 : vector<8x1xf32> to vector<8x8xf32>
    %361 = arith.divf %357, %360 : vector<8x8xf32>
    %cst_150 = arith.constant dense<0.000000e+00> : vector<8x8xf32>
    %362 = tpu.matmul %361, %347, %cst_150 {dimension_numbers = #tpu.dot_dimension_numbers<[1], [0], [0], [1], [0, 0, 1, 1], [], []>} : vector<8x8xf32>, vector<8x8xf32>, vector<8x8xf32> -> vector<8x8xf32>
    %363 = vector.extract_strided_slice %300 {offsets = [16, 0], sizes = [8, 32], strides = [1, 1]} : vector<32x32xf32> to vector<8x32xf32>
    %cst_151 = arith.constant dense<0.000000e+00> : vector<8x32xf32>
    %364 = tpu.matmul %362, %363, %cst_151 {dimension_numbers = #tpu.dot_dimension_numbers<[1], [0], [0], [1], [0, 0, 1, 1], [], []>} : vector<8x8xf32>, vector<8x32xf32>, vector<8x32xf32> -> vector<8x32xf32>
    %365 = arith.addf %344, %364 : vector<8x32xf32>
    %366 = vector.extract_strided_slice %298 {offsets = [0, 24], sizes = [8, 8], strides = [1, 1]} : vector<16x96xf32> to vector<8x8xf32>
    %367 = vector.extract_strided_slice %298 {offsets = [0, 56], sizes = [8, 8], strides = [1, 1]} : vector<16x96xf32> to vector<8x8xf32>
    %368 = vector.extract_strided_slice %298 {offsets = [0, 88], sizes = [8, 8], strides = [1, 1]} : vector<16x96xf32> to vector<8x8xf32>
    %cst_152 = arith.constant dense<0.000000e+00> : vector<8x8xf32>
    %369 = tpu.matmul %366, %367, %cst_152 {dimension_numbers = #tpu.dot_dimension_numbers<[1], [1], [0], [0], [0, 0, 1, 0], [], []>} : vector<8x8xf32>, vector<8x8xf32>, vector<8x8xf32> -> vector<8x8xf32>
    %cst_153 = arith.constant 0.353553385 : f32
    %370 = vector.broadcast %cst_153 : f32 to vector<8x8xf32>
    %371 = arith.mulf %369, %370 : vector<8x8xf32>
    %372 = vector.broadcast %301 : vector<1x8xf32> to vector<8x8xf32>
    %373 = arith.addf %371, %372 : vector<8x8xf32>
    %cst_154 = arith.constant dense<0xFF800000> : vector<8xf32>
    %374 = vector.multi_reduction <maximumf>, %373, %cst_154 [1] : vector<8x8xf32> to vector<8xf32>
    %375 = vector.shape_cast %374 : vector<8xf32> to vector<8x1xf32>
    %376 = vector.broadcast %375 : vector<8x1xf32> to vector<8x8xf32>
    %377 = arith.subf %373, %376 : vector<8x8xf32>
    %378 = math.exp %377 : vector<8x8xf32>
    %cst_155 = arith.constant dense<0.000000e+00> : vector<8xf32>
    %379 = vector.multi_reduction <add>, %378, %cst_155 [1] : vector<8x8xf32> to vector<8xf32>
    %380 = vector.shape_cast %379 : vector<8xf32> to vector<8x1xf32>
    %381 = vector.broadcast %380 : vector<8x1xf32> to vector<8x8xf32>
    %382 = arith.divf %378, %381 : vector<8x8xf32>
    %cst_156 = arith.constant dense<0.000000e+00> : vector<8x8xf32>
    %383 = tpu.matmul %382, %368, %cst_156 {dimension_numbers = #tpu.dot_dimension_numbers<[1], [0], [0], [1], [0, 0, 1, 1], [], []>} : vector<8x8xf32>, vector<8x8xf32>, vector<8x8xf32> -> vector<8x8xf32>
    %384 = vector.extract_strided_slice %300 {offsets = [24, 0], sizes = [8, 32], strides = [1, 1]} : vector<32x32xf32> to vector<8x32xf32>
    %cst_157 = arith.constant dense<0.000000e+00> : vector<8x32xf32>
    %385 = tpu.matmul %383, %384, %cst_157 {dimension_numbers = #tpu.dot_dimension_numbers<[1], [0], [0], [1], [0, 0, 1, 1], [], []>} : vector<8x8xf32>, vector<8x32xf32>, vector<8x32xf32> -> vector<8x32xf32>
    %386 = arith.addf %365, %385 : vector<8x32xf32>
    %c1_158 = arith.constant 1 : index
    %c0_159 = arith.constant 0 : index
    %387 = vector.load %arg1[%c1_158, %c0_159] : memref<2x8xf32, #tpu.memory_space<vmem>>, vector<1x8xf32>
    %cst_160 = arith.constant 0.000000e+00 : f32
    %388 = vector.broadcast %cst_160 : f32 to vector<8x32xf32>
    %389 = vector.extract_strided_slice %298 {offsets = [8, 0], sizes = [8, 8], strides = [1, 1]} : vector<16x96xf32> to vector<8x8xf32>
    %390 = vector.extract_strided_slice %298 {offsets = [8, 32], sizes = [8, 8], strides = [1, 1]} : vector<16x96xf32> to vector<8x8xf32>
    %391 = vector.extract_strided_slice %298 {offsets = [8, 64], sizes = [8, 8], strides = [1, 1]} : vector<16x96xf32> to vector<8x8xf32>
    %cst_161 = arith.constant dense<0.000000e+00> : vector<8x8xf32>
    %392 = tpu.matmul %389, %390, %cst_161 {dimension_numbers = #tpu.dot_dimension_numbers<[1], [1], [0], [0], [0, 0, 1, 0], [], []>} : vector<8x8xf32>, vector<8x8xf32>, vector<8x8xf32> -> vector<8x8xf32>
    %cst_162 = arith.constant 0.353553385 : f32
    %393 = vector.broadcast %cst_162 : f32 to vector<8x8xf32>
    %394 = arith.mulf %392, %393 : vector<8x8xf32>
    %395 = vector.broadcast %387 : vector<1x8xf32> to vector<8x8xf32>
    %396 = arith.addf %394, %395 : vector<8x8xf32>
    %cst_163 = arith.constant dense<0xFF800000> : vector<8xf32>
    %397 = vector.multi_reduction <maximumf>, %396, %cst_163 [1] : vector<8x8xf32> to vector<8xf32>
    %398 = vector.shape_cast %397 : vector<8xf32> to vector<8x1xf32>
    %399 = vector.broadcast %398 : vector<8x1xf32> to vector<8x8xf32>
    %400 = arith.subf %396, %399 : vector<8x8xf32>
    %401 = math.exp %400 : vector<8x8xf32>
    %cst_164 = arith.constant dense<0.000000e+00> : vector<8xf32>
    %402 = vector.multi_reduction <add>, %401, %cst_164 [1] : vector<8x8xf32> to vector<8xf32>
    %403 = vector.shape_cast %402 : vector<8xf32> to vector<8x1xf32>
    %404 = vector.broadcast %403 : vector<8x1xf32> to vector<8x8xf32>
    %405 = arith.divf %401, %404 : vector<8x8xf32>
    %cst_165 = arith.constant dense<0.000000e+00> : vector<8x8xf32>
    %406 = tpu.matmul %405, %391, %cst_165 {dimension_numbers = #tpu.dot_dimension_numbers<[1], [0], [0], [1], [0, 0, 1, 1], [], []>} : vector<8x8xf32>, vector<8x8xf32>, vector<8x8xf32> -> vector<8x8xf32>
    %407 = vector.extract_strided_slice %300 {offsets = [0, 0], sizes = [8, 32], strides = [1, 1]} : vector<32x32xf32> to vector<8x32xf32>
    %cst_166 = arith.constant dense<0.000000e+00> : vector<8x32xf32>
    %408 = tpu.matmul %406, %407, %cst_166 {dimension_numbers = #tpu.dot_dimension_numbers<[1], [0], [0], [1], [0, 0, 1, 1], [], []>} : vector<8x8xf32>, vector<8x32xf32>, vector<8x32xf32> -> vector<8x32xf32>
    %409 = arith.addf %388, %408 : vector<8x32xf32>
    %410 = vector.extract_strided_slice %298 {offsets = [8, 8], sizes = [8, 8], strides = [1, 1]} : vector<16x96xf32> to vector<8x8xf32>
    %411 = vector.extract_strided_slice %298 {offsets = [8, 40], sizes = [8, 8], strides = [1, 1]} : vector<16x96xf32> to vector<8x8xf32>
    %412 = vector.extract_strided_slice %298 {offsets = [8, 72], sizes = [8, 8], strides = [1, 1]} : vector<16x96xf32> to vector<8x8xf32>
    %cst_167 = arith.constant dense<0.000000e+00> : vector<8x8xf32>
    %413 = tpu.matmul %410, %411, %cst_167 {dimension_numbers = #tpu.dot_dimension_numbers<[1], [1], [0], [0], [0, 0, 1, 0], [], []>} : vector<8x8xf32>, vector<8x8xf32>, vector<8x8xf32> -> vector<8x8xf32>
    %cst_168 = arith.constant 0.353553385 : f32
    %414 = vector.broadcast %cst_168 : f32 to vector<8x8xf32>
    %415 = arith.mulf %413, %414 : vector<8x8xf32>
    %416 = vector.broadcast %387 : vector<1x8xf32> to vector<8x8xf32>
    %417 = arith.addf %415, %416 : vector<8x8xf32>
    %cst_169 = arith.constant dense<0xFF800000> : vector<8xf32>
    %418 = vector.multi_reduction <maximumf>, %417, %cst_169 [1] : vector<8x8xf32> to vector<8xf32>
    %419 = vector.shape_cast %418 : vector<8xf32> to vector<8x1xf32>
    %420 = vector.broadcast %419 : vector<8x1xf32> to vector<8x8xf32>
    %421 = arith.subf %417, %420 : vector<8x8xf32>
    %422 = math.exp %421 : vector<8x8xf32>
    %cst_170 = arith.constant dense<0.000000e+00> : vector<8xf32>
    %423 = vector.multi_reduction <add>, %422, %cst_170 [1] : vector<8x8xf32> to vector<8xf32>
    %424 = vector.shape_cast %423 : vector<8xf32> to vector<8x1xf32>
    %425 = vector.broadcast %424 : vector<8x1xf32> to vector<8x8xf32>
    %426 = arith.divf %422, %425 : vector<8x8xf32>
    %cst_171 = arith.constant dense<0.000000e+00> : vector<8x8xf32>
    %427 = tpu.matmul %426, %412, %cst_171 {dimension_numbers = #tpu.dot_dimension_numbers<[1], [0], [0], [1], [0, 0, 1, 1], [], []>} : vector<8x8xf32>, vector<8x8xf32>, vector<8x8xf32> -> vector<8x8xf32>
    %428 = vector.extract_strided_slice %300 {offsets = [8, 0], sizes = [8, 32], strides = [1, 1]} : vector<32x32xf32> to vector<8x32xf32>
    %cst_172 = arith.constant dense<0.000000e+00> : vector<8x32xf32>
    %429 = tpu.matmul %427, %428, %cst_172 {dimension_numbers = #tpu.dot_dimension_numbers<[1], [0], [0], [1], [0, 0, 1, 1], [], []>} : vector<8x8xf32>, vector<8x32xf32>, vector<8x32xf32> -> vector<8x32xf32>
    %430 = arith.addf %409, %429 : vector<8x32xf32>
    %431 = vector.extract_strided_slice %298 {offsets = [8, 16], sizes = [8, 8], strides = [1, 1]} : vector<16x96xf32> to vector<8x8xf32>
    %432 = vector.extract_strided_slice %298 {offsets = [8, 48], sizes = [8, 8], strides = [1, 1]} : vector<16x96xf32> to vector<8x8xf32>
    %433 = vector.extract_strided_slice %298 {offsets = [8, 80], sizes = [8, 8], strides = [1, 1]} : vector<16x96xf32> to vector<8x8xf32>
    %cst_173 = arith.constant dense<0.000000e+00> : vector<8x8xf32>
    %434 = tpu.matmul %431, %432, %cst_173 {dimension_numbers = #tpu.dot_dimension_numbers<[1], [1], [0], [0], [0, 0, 1, 0], [], []>} : vector<8x8xf32>, vector<8x8xf32>, vector<8x8xf32> -> vector<8x8xf32>
    %cst_174 = arith.constant 0.353553385 : f32
    %435 = vector.broadcast %cst_174 : f32 to vector<8x8xf32>
    %436 = arith.mulf %434, %435 : vector<8x8xf32>
    %437 = vector.broadcast %387 : vector<1x8xf32> to vector<8x8xf32>
    %438 = arith.addf %436, %437 : vector<8x8xf32>
    %cst_175 = arith.constant dense<0xFF800000> : vector<8xf32>
    %439 = vector.multi_reduction <maximumf>, %438, %cst_175 [1] : vector<8x8xf32> to vector<8xf32>
    %440 = vector.shape_cast %439 : vector<8xf32> to vector<8x1xf32>
    %441 = vector.broadcast %440 : vector<8x1xf32> to vector<8x8xf32>
    %442 = arith.subf %438, %441 : vector<8x8xf32>
    %443 = math.exp %442 : vector<8x8xf32>
    %cst_176 = arith.constant dense<0.000000e+00> : vector<8xf32>
    %444 = vector.multi_reduction <add>, %443, %cst_176 [1] : vector<8x8xf32> to vector<8xf32>
    %445 = vector.shape_cast %444 : vector<8xf32> to vector<8x1xf32>
    %446 = vector.broadcast %445 : vector<8x1xf32> to vector<8x8xf32>
    %447 = arith.divf %443, %446 : vector<8x8xf32>
    %cst_177 = arith.constant dense<0.000000e+00> : vector<8x8xf32>
    %448 = tpu.matmul %447, %433, %cst_177 {dimension_numbers = #tpu.dot_dimension_numbers<[1], [0], [0], [1], [0, 0, 1, 1], [], []>} : vector<8x8xf32>, vector<8x8xf32>, vector<8x8xf32> -> vector<8x8xf32>
    %449 = vector.extract_strided_slice %300 {offsets = [16, 0], sizes = [8, 32], strides = [1, 1]} : vector<32x32xf32> to vector<8x32xf32>
    %cst_178 = arith.constant dense<0.000000e+00> : vector<8x32xf32>
    %450 = tpu.matmul %448, %449, %cst_178 {dimension_numbers = #tpu.dot_dimension_numbers<[1], [0], [0], [1], [0, 0, 1, 1], [], []>} : vector<8x8xf32>, vector<8x32xf32>, vector<8x32xf32> -> vector<8x32xf32>
    %451 = arith.addf %430, %450 : vector<8x32xf32>
    %452 = vector.extract_strided_slice %298 {offsets = [8, 24], sizes = [8, 8], strides = [1, 1]} : vector<16x96xf32> to vector<8x8xf32>
    %453 = vector.extract_strided_slice %298 {offsets = [8, 56], sizes = [8, 8], strides = [1, 1]} : vector<16x96xf32> to vector<8x8xf32>
    %454 = vector.extract_strided_slice %298 {offsets = [8, 88], sizes = [8, 8], strides = [1, 1]} : vector<16x96xf32> to vector<8x8xf32>
    %cst_179 = arith.constant dense<0.000000e+00> : vector<8x8xf32>
    %455 = tpu.matmul %452, %453, %cst_179 {dimension_numbers = #tpu.dot_dimension_numbers<[1], [1], [0], [0], [0, 0, 1, 0], [], []>} : vector<8x8xf32>, vector<8x8xf32>, vector<8x8xf32> -> vector<8x8xf32>
    %cst_180 = arith.constant 0.353553385 : f32
    %456 = vector.broadcast %cst_180 : f32 to vector<8x8xf32>
    %457 = arith.mulf %455, %456 : vector<8x8xf32>
    %458 = vector.broadcast %387 : vector<1x8xf32> to vector<8x8xf32>
    %459 = arith.addf %457, %458 : vector<8x8xf32>
    %cst_181 = arith.constant dense<0xFF800000> : vector<8xf32>
    %460 = vector.multi_reduction <maximumf>, %459, %cst_181 [1] : vector<8x8xf32> to vector<8xf32>
    %461 = vector.shape_cast %460 : vector<8xf32> to vector<8x1xf32>
    %462 = vector.broadcast %461 : vector<8x1xf32> to vector<8x8xf32>
    %463 = arith.subf %459, %462 : vector<8x8xf32>
    %464 = math.exp %463 : vector<8x8xf32>
    %cst_182 = arith.constant dense<0.000000e+00> : vector<8xf32>
    %465 = vector.multi_reduction <add>, %464, %cst_182 [1] : vector<8x8xf32> to vector<8xf32>
    %466 = vector.shape_cast %465 : vector<8xf32> to vector<8x1xf32>
    %467 = vector.broadcast %466 : vector<8x1xf32> to vector<8x8xf32>
    %468 = arith.divf %464, %467 : vector<8x8xf32>
    %cst_183 = arith.constant dense<0.000000e+00> : vector<8x8xf32>
    %469 = tpu.matmul %468, %454, %cst_183 {dimension_numbers = #tpu.dot_dimension_numbers<[1], [0], [0], [1], [0, 0, 1, 1], [], []>} : vector<8x8xf32>, vector<8x8xf32>, vector<8x8xf32> -> vector<8x8xf32>
    %470 = vector.extract_strided_slice %300 {offsets = [24, 0], sizes = [8, 32], strides = [1, 1]} : vector<32x32xf32> to vector<8x32xf32>
    %cst_184 = arith.constant dense<0.000000e+00> : vector<8x32xf32>
    %471 = tpu.matmul %469, %470, %cst_184 {dimension_numbers = #tpu.dot_dimension_numbers<[1], [0], [0], [1], [0, 0, 1, 1], [], []>} : vector<8x8xf32>, vector<8x32xf32>, vector<8x32xf32> -> vector<8x32xf32>
    %472 = arith.addf %451, %471 : vector<8x32xf32>
    %473 = tpu.concatenate %386, %472 in 0 : vector<8x32xf32>, vector<8x32xf32> -> vector<16x32xf32>
    %c1_185 = arith.constant 1 : index
    %c0_186 = arith.constant 0 : index
    %c0_187 = arith.constant 0 : index
    %474 = vector.load %arg8[%c1_185, %c0_186, %c0_187] : memref<2x1x32xf32, #tpu.memory_space<vmem>>, vector<1x1x32xf32>
    %475 = vector.shape_cast %474 : vector<1x1x32xf32> to vector<1x32xf32>
    %476 = vector.broadcast %475 : vector<1x32xf32> to vector<16x32xf32>
    %477 = arith.addf %473, %476 : vector<16x32xf32>
    %478 = arith.addf %477, %288 : vector<16x32xf32>
    %c1_188 = arith.constant 1 : index
    %c0_189 = arith.constant 0 : index
    %c0_190 = arith.constant 0 : index
    %479 = vector.load %arg9[%c1_188, %c0_189, %c0_190] : memref<2x1x32xf32, #tpu.memory_space<vmem>>, vector<1x1x32xf32>
    %480 = vector.shape_cast %479 : vector<1x1x32xf32> to vector<1x32xf32>
    %c1_191 = arith.constant 1 : index
    %c0_192 = arith.constant 0 : index
    %c0_193 = arith.constant 0 : index
    %481 = vector.load %arg10[%c1_191, %c0_192, %c0_193] : memref<2x1x32xf32, #tpu.memory_space<vmem>>, vector<1x1x32xf32>
    %482 = vector.shape_cast %481 : vector<1x1x32xf32> to vector<1x32xf32>
    %cst_194 = arith.constant dense<0.000000e+00> : vector<16xf32>
    %483 = vector.multi_reduction <add>, %478, %cst_194 [1] : vector<16x32xf32> to vector<16xf32>
    %484 = vector.shape_cast %483 : vector<16xf32> to vector<16x1xf32>
    %cst_195 = arith.constant 3.200000e+01 : f32
    %485 = vector.broadcast %cst_195 : f32 to vector<16x1xf32>
    %486 = arith.divf %484, %485 : vector<16x1xf32>
    %487 = vector.broadcast %486 : vector<16x1xf32> to vector<16x32xf32>
    %488 = arith.subf %478, %487 : vector<16x32xf32>
    %489 = arith.mulf %488, %488 : vector<16x32xf32>
    %cst_196 = arith.constant dense<0.000000e+00> : vector<16xf32>
    %490 = vector.multi_reduction <add>, %489, %cst_196 [1] : vector<16x32xf32> to vector<16xf32>
    %491 = vector.shape_cast %490 : vector<16xf32> to vector<16x1xf32>
    %cst_197 = arith.constant 3.200000e+01 : f32
    %492 = vector.broadcast %cst_197 : f32 to vector<16x1xf32>
    %493 = arith.divf %491, %492 : vector<16x1xf32>
    %cst_198 = arith.constant 9.99999996E-13 : f32
    %494 = vector.broadcast %cst_198 : f32 to vector<16x1xf32>
    %495 = arith.addf %493, %494 : vector<16x1xf32>
    %496 = math.rsqrt %495 : vector<16x1xf32>
    %497 = vector.broadcast %496 : vector<16x1xf32> to vector<16x32xf32>
    %498 = arith.mulf %488, %497 : vector<16x32xf32>
    %499 = vector.broadcast %480 : vector<1x32xf32> to vector<16x32xf32>
    %500 = arith.mulf %498, %499 : vector<16x32xf32>
    %501 = vector.broadcast %482 : vector<1x32xf32> to vector<16x32xf32>
    %502 = arith.addf %500, %501 : vector<16x32xf32>
    %c1_199 = arith.constant 1 : index
    %c0_200 = arith.constant 0 : index
    %c0_201 = arith.constant 0 : index
    %503 = vector.load %arg11[%c1_199, %c0_200, %c0_201] : memref<2x32x64xf32, #tpu.memory_space<vmem>>, vector<1x32x64xf32>
    %504 = vector.shape_cast %503 : vector<1x32x64xf32> to vector<32x64xf32>
    %cst_202 = arith.constant dense<0.000000e+00> : vector<16x64xf32>
    %505 = tpu.matmul %502, %504, %cst_202 {dimension_numbers = #tpu.dot_dimension_numbers<[1], [0], [0], [1], [0, 0, 1, 1], [], []>} : vector<16x32xf32>, vector<32x64xf32>, vector<16x64xf32> -> vector<16x64xf32>
    %c1_203 = arith.constant 1 : index
    %c0_204 = arith.constant 0 : index
    %c0_205 = arith.constant 0 : index
    %506 = vector.load %arg12[%c1_203, %c0_204, %c0_205] : memref<2x1x64xf32, #tpu.memory_space<vmem>>, vector<1x1x64xf32>
    %507 = vector.shape_cast %506 : vector<1x1x64xf32> to vector<1x64xf32>
    %508 = vector.broadcast %507 : vector<1x64xf32> to vector<16x64xf32>
    %509 = arith.addf %505, %508 : vector<16x64xf32>
    %cst_206 = arith.constant 5.000000e-01 : f32
    %510 = vector.broadcast %cst_206 : f32 to vector<16x64xf32>
    %511 = arith.mulf %510, %509 : vector<16x64xf32>
    %cst_207 = arith.constant 4.471500e-02 : f32
    %512 = vector.broadcast %cst_207 : f32 to vector<16x64xf32>
    %513 = arith.mulf %512, %509 : vector<16x64xf32>
    %514 = arith.mulf %513, %509 : vector<16x64xf32>
    %515 = arith.mulf %514, %509 : vector<16x64xf32>
    %516 = arith.addf %509, %515 : vector<16x64xf32>
    %cst_208 = arith.constant 0.797884583 : f32
    %517 = vector.broadcast %cst_208 : f32 to vector<16x64xf32>
    %518 = arith.mulf %517, %516 : vector<16x64xf32>
    %519 = math.tanh %518 : vector<16x64xf32>
    %cst_209 = arith.constant 1.000000e+00 : f32
    %520 = vector.broadcast %cst_209 : f32 to vector<16x64xf32>
    %521 = arith.addf %520, %519 : vector<16x64xf32>
    %522 = arith.mulf %511, %521 : vector<16x64xf32>
    %c1_210 = arith.constant 1 : index
    %c0_211 = arith.constant 0 : index
    %c0_212 = arith.constant 0 : index
    %523 = vector.load %arg13[%c1_210, %c0_211, %c0_212] : memref<2x64x32xf32, #tpu.memory_space<vmem>>, vector<1x64x32xf32>
    %524 = vector.shape_cast %523 : vector<1x64x32xf32> to vector<64x32xf32>
    %cst_213 = arith.constant dense<0.000000e+00> : vector<16x32xf32>
    %525 = tpu.matmul %522, %524, %cst_213 {dimension_numbers = #tpu.dot_dimension_numbers<[1], [0], [0], [1], [0, 0, 1, 1], [], []>} : vector<16x64xf32>, vector<64x32xf32>, vector<16x32xf32> -> vector<16x32xf32>
    %c1_214 = arith.constant 1 : index
    %c0_215 = arith.constant 0 : index
    %c0_216 = arith.constant 0 : index
    %526 = vector.load %arg14[%c1_214, %c0_215, %c0_216] : memref<2x1x32xf32, #tpu.memory_space<vmem>>, vector<1x1x32xf32>
    %527 = vector.shape_cast %526 : vector<1x1x32xf32> to vector<1x32xf32>
    %528 = vector.broadcast %527 : vector<1x32xf32> to vector<16x32xf32>
    %529 = arith.addf %525, %528 : vector<16x32xf32>
    %530 = arith.addf %529, %502 : vector<16x32xf32>
    %c1_217 = arith.constant 1 : index
    %c0_218 = arith.constant 0 : index
    %c0_219 = arith.constant 0 : index
    %531 = vector.load %arg15[%c1_217, %c0_218, %c0_219] : memref<2x1x32xf32, #tpu.memory_space<vmem>>, vector<1x1x32xf32>
    %532 = vector.shape_cast %531 : vector<1x1x32xf32> to vector<1x32xf32>
    %c1_220 = arith.constant 1 : index
    %c0_221 = arith.constant 0 : index
    %c0_222 = arith.constant 0 : index
    %533 = vector.load %arg16[%c1_220, %c0_221, %c0_222] : memref<2x1x32xf32, #tpu.memory_space<vmem>>, vector<1x1x32xf32>
    %534 = vector.shape_cast %533 : vector<1x1x32xf32> to vector<1x32xf32>
    %cst_223 = arith.constant dense<0.000000e+00> : vector<16xf32>
    %535 = vector.multi_reduction <add>, %530, %cst_223 [1] : vector<16x32xf32> to vector<16xf32>
    %536 = vector.shape_cast %535 : vector<16xf32> to vector<16x1xf32>
    %cst_224 = arith.constant 3.200000e+01 : f32
    %537 = vector.broadcast %cst_224 : f32 to vector<16x1xf32>
    %538 = arith.divf %536, %537 : vector<16x1xf32>
    %539 = vector.broadcast %538 : vector<16x1xf32> to vector<16x32xf32>
    %540 = arith.subf %530, %539 : vector<16x32xf32>
    %541 = arith.mulf %540, %540 : vector<16x32xf32>
    %cst_225 = arith.constant dense<0.000000e+00> : vector<16xf32>
    %542 = vector.multi_reduction <add>, %541, %cst_225 [1] : vector<16x32xf32> to vector<16xf32>
    %543 = vector.shape_cast %542 : vector<16xf32> to vector<16x1xf32>
    %cst_226 = arith.constant 3.200000e+01 : f32
    %544 = vector.broadcast %cst_226 : f32 to vector<16x1xf32>
    %545 = arith.divf %543, %544 : vector<16x1xf32>
    %cst_227 = arith.constant 9.99999996E-13 : f32
    %546 = vector.broadcast %cst_227 : f32 to vector<16x1xf32>
    %547 = arith.addf %545, %546 : vector<16x1xf32>
    %548 = math.rsqrt %547 : vector<16x1xf32>
    %549 = vector.broadcast %548 : vector<16x1xf32> to vector<16x32xf32>
    %550 = arith.mulf %540, %549 : vector<16x32xf32>
    %551 = vector.broadcast %532 : vector<1x32xf32> to vector<16x32xf32>
    %552 = arith.mulf %550, %551 : vector<16x32xf32>
    %553 = vector.broadcast %534 : vector<1x32xf32> to vector<16x32xf32>
    %554 = arith.addf %552, %553 : vector<16x32xf32>
    %c2 = arith.constant 2 : index
    %c0_228 = arith.constant 0 : index
    %c0_229 = arith.constant 0 : index
    %555 = vector.load %arg21[%c2, %c0_228, %c0_229] : memref<3x16x32xf32, #tpu.memory_space<vmem>>, vector<1x16x32xf32>
    %556 = vector.shape_cast %555 : vector<1x16x32xf32> to vector<16x32xf32>
    %557 = vector.shape_cast %554 : vector<16x32xf32> to vector<1x16x32xf32>
    tpu.vector_store %arg21[%c2, %c0_228, %c0_229], %557 {strides = array<i32>} : memref<3x16x32xf32, #tpu.memory_space<vmem>>, vector<1x16x32xf32>,
    %558 = tpu.iota {dimensions = array<i32: 0>} : vector<2x16xi32>
    %559 = tpu.iota {dimensions = array<i32: 1>} : vector<2x16xi32>
    %c8_i32 = arith.constant 8 : i32
    %560 = vector.broadcast %c8_i32 : i32 to vector<2x16xi32>
    %561 = arith.muli %558, %560 : vector<2x16xi32>
    %562 = arith.cmpi eq, %559, %561 : vector<2x16xi32>
    %563 = arith.extui %562 : vector<2x16xi1> to vector<2x16xi32>
    %564 = arith.sitofp %563 : vector<2x16xi32> to vector<2x16xf32>
    %cst_230 = arith.constant dense<0.000000e+00> : vector<2x32xf32>
    %565 = tpu.matmul %564, %554, %cst_230 {dimension_numbers = #tpu.dot_dimension_numbers<[1], [0], [0], [1], [0, 0, 1, 1], [], []>} : vector<2x16xf32>, vector<16x32xf32>, vector<2x32xf32> -> vector<2x32xf32>
    %c0_231 = arith.constant 0 : index
    %c0_232 = arith.constant 0 : index
    %566 = vector.load %arg17[%c0_231, %c0_232] : memref<32x32xf32, #tpu.memory_space<vmem>>, vector<32x32xf32>
    %cst_233 = arith.constant dense<0.000000e+00> : vector<2x32xf32>
    %567 = tpu.matmul %565, %566, %cst_233 {dimension_numbers = #tpu.dot_dimension_numbers<[1], [0], [0], [1], [0, 0, 1, 1], [], []>} : vector<2x32xf32>, vector<32x32xf32>, vector<2x32xf32> -> vector<2x32xf32>
    %c0_234 = arith.constant 0 : index
    %c0_235 = arith.constant 0 : index
    %568 = vector.load %arg18[%c0_234, %c0_235] : memref<1x32xf32, #tpu.memory_space<vmem>>, vector<1x32xf32>
    %569 = vector.broadcast %568 : vector<1x32xf32> to vector<2x32xf32>
    %570 = arith.addf %567, %569 : vector<2x32xf32>
    %571 = math.tanh %570 : vector<2x32xf32>
    %c0_236 = arith.constant 0 : index
    %c0_237 = arith.constant 0 : index
    %572 = vector.load %arg19[%c0_236, %c0_237] : memref<32x3xf32, #tpu.memory_space<vmem>>, vector<32x3xf32>
    %cst_238 = arith.constant dense<0.000000e+00> : vector<2x3xf32>
    %573 = tpu.matmul %571, %572, %cst_238 {dimension_numbers = #tpu.dot_dimension_numbers<[1], [0], [0], [1], [0, 0, 1, 1], [], []>} : vector<2x32xf32>, vector<32x3xf32>, vector<2x3xf32> -> vector<2x3xf32>
    %c0_239 = arith.constant 0 : index
    %c0_240 = arith.constant 0 : index
    %574 = vector.load %arg20[%c0_239, %c0_240] : memref<1x3xf32, #tpu.memory_space<vmem>>, vector<1x3xf32>
    %575 = vector.broadcast %574 : vector<1x3xf32> to vector<2x3xf32>
    %576 = arith.addf %573, %575 : vector<2x3xf32>
    %c0_241 = arith.constant 0 : index
    %c0_242 = arith.constant 0 : index
    %577 = vector.load %arg22[%c0_241, %c0_242] : memref<2x3xf32, #tpu.memory_space<vmem>>, vector<2x3xf32>
    tpu.vector_store %arg22[%c0_241, %c0_242], %576 {strides = array<i32>} : memref<2x3xf32, #tpu.memory_space<vmem>>, vector<2x3xf32>,
    %cst_243 = arith.constant dense<0xFF800000> : vector<2xf32>
    %578 = vector.multi_reduction <maximumf>, %576, %cst_243 [1] : vector<2x3xf32> to vector<2xf32>
    %579 = vector.shape_cast %578 : vector<2xf32> to vector<2x1xf32>
    %580 = vector.broadcast %579 : vector<2x1xf32> to vector<2x3xf32>
    %581 = arith.subf %576, %580 : vector<2x3xf32>
    %582 = math.exp %581 : vector<2x3xf32>
    %cst_244 = arith.constant dense<0.000000e+00> : vector<2xf32>
    %583 = vector.multi_reduction <add>, %582, %cst_244 [1] : vector<2x3xf32> to vector<2xf32>
    %584 = vector.shape_cast %583 : vector<2xf32> to vector<2x1xf32>
    %585 = math.log %584 : vector<2x1xf32>
    %586 = vector.broadcast %585 : vector<2x1xf32> to vector<2x3xf32>
    %587 = arith.subf %581, %586 : vector<2x3xf32>
    %588 = tpu.iota {dimensions = array<i32: 1>} : vector<2x3xi32>
    %c0_245 = arith.constant 0 : index
    %c0_246 = arith.constant 0 : index
    %589 = vector.load %arg2[%c0_245, %c0_246] : memref<2x1xi32, #tpu.memory_space<vmem>>, vector<2x1xi32>
    %590 = vector.broadcast %589 : vector<2x1xi32> to vector<2x3xi32>
    %591 = arith.cmpi eq, %588, %590 : vector<2x3xi32>
    %592 = arith.extui %591 : vector<2x3xi1> to vector<2x3xi32>
    %593 = arith.sitofp %592 : vector<2x3xi32> to vector<2x3xf32>
    %594 = arith.mulf %593, %587 : vector<2x3xf32>
    %cst_247 = arith.constant dense<0.000000e+00> : vector<2xf32>
    %595 = vector.multi_reduction <add>, %594, %cst_247 [1] : vector<2x3xf32> to vector<2xf32>
    %596 = vector.shape_cast %595 : vector<2xf32> to vector<2x1xf32>
    %cst_248 = arith.constant 0.000000e+00 : f32
    %597 = vector.broadcast %cst_248 : f32 to vector<2x1xf32>
    %598 = arith.subf %597, %596 : vector<2x1xf32>
    %cst_249 = arith.constant dense<0.000000e+00> : vector<1xf32>
    %599 = vector.multi_reduction <add>, %598, %cst_249 [0] : vector<2x1xf32> to vector<1xf32>
    %600 = vector.shape_cast %599 : vector<1xf32> to vector<1x1xf32>
    %cst_250 = arith.constant 2.000000e+00 : f32
    %601 = vector.broadcast %cst_250 : f32 to vector<1x1xf32>
    %602 = arith.divf %600, %601 : vector<1x1xf32>
    %c0_251 = arith.constant 0 : index
    %c0_252 = arith.constant 0 : index
    %603 = vector.load %arg23[%c0_251, %c0_252] : memref<1x1xf32, #tpu.memory_space<vmem>>, vector<1x1xf32>
    tpu.vector_store %arg23[%c0_251, %c0_252], %602 {strides = array<i32>} : memref<1x1xf32, #tpu.memory_space<vmem>>, vector<1x1xf32>,
    return
  }
}

</mosaic_0001>

<bundles_post_ra>
// kernel: tpu_custom_call.1
= control target key start
LH: loop header
LB: loop body
LE: loop exit
PB: predicated region body
PF: predicated region fallthrough
CT: control target
= control target key end

     0   :  { %s7541_s0 = inlined_call_operand.hbm [shape: f32[16,32], index: 0, kind: input, shape index: {}]   ;;  %s7542_s1 = inlined_call_operand.hbm [shape: f32[2,8], index: 1, kind: input, shape index: {}]   ;;  %s7543_s2 = inlined_call_operand.vmem [shape: s32[2,1], index: 2, kind: input, shape index: {}]   ;;  %s7544_s3 = inlined_call_operand.hbm [shape: f32[1,32], index: 3, kind: input, shape index: {}]   ;;  %s7545_s4 = inlined_call_operand.hbm [shape: f32[1,32], index: 4, kind: input, shape index: {}]   ;;  %s7546_s5 = inlined_call_operand.vmem [shape: f32[2,32,96], index: 5, kind: input, shape index: {}]   ;;  %s7547_s6 = inlined_call_operand.hbm [shape: f32[2,1,96], index: 6, kind: input, shape index: {}]   ;;  %s7548_s7 = inlined_call_operand.vmem [shape: f32[2,32,32], index: 7, kind: input, shape index: {}]   ;;  %s7549_s8 = inlined_call_operand.hbm [shape: f32[2,1,32], index: 8, kind: input, shape index: {}]   ;;  %s7550_s9 = inlined_call_operand.hbm [shape: f32[2,1,32], index: 9, kind: input, shape index: {}]   ;;  %s7551_s10 = inlined_call_operand.hbm [shape: f32[2,1,32], index: 10, kind: input, shape index: {}]   ;;  %s7552_s11 = inlined_call_operand.vmem [shape: f32[2,32,64], index: 11, kind: input, shape index: {}]   ;;  %s7553_s12 = inlined_call_operand.hbm [shape: f32[2,1,64], index: 12, kind: input, shape index: {}]   ;;  %s7554_s13 = inlined_call_operand.vmem [shape: f32[2,64,32], index: 13, kind: input, shape index: {}]   ;;  %s7555_s14 = inlined_call_operand.hbm [shape: f32[2,1,32], index: 14, kind: input, shape index: {}]   ;;  %s7556_s15 = inlined_call_operand.hbm [shape: f32[2,1,32], index: 15, kind: input, shape index: {}]   ;;  %s7557_s16 = inlined_call_operand.hbm [shape: f32[2,1,32], index: 16, kind: input, shape index: {}]   ;;  %s7558_s17 = inlined_call_operand.vmem [shape: f32[32,32], index: 17, kind: input, shape index: {}]   ;;  %s7559_s18 = inlined_call_operand.vmem [shape: f32[1,32], index: 18, kind: input, shape index: {}]   ;;  %s7560_s19 = inlined_call_operand.vmem [shape: f32[32,3], index: 19, kind: input, shape index: {}]   ;;  %s7561_s20 = inlined_call_operand.vmem [shape: f32[1,3], index: 20, kind: input, shape index: {}]   ;;  %s7562_s21 = inlined_call_operand.hbm [shape: f32[3,16,32], index: 21, kind: output, shape index: {0}]   ;;  %s7563_s22 = inlined_call_operand.hbm [shape: f32[2,3], index: 22, kind: output, shape index: {1}]   ;;  %s7564_s23 = inlined_call_operand.hbm [shape: f32[1,1], index: 23, kind: output, shape index: {2}]  }
   0x1   :  { %7580 = sst [smem:[#allocation35_spill]] %s7541_s0 }
   0x2   :  { %7581 = sst [smem:[#allocation36_spill]] %s7542_s1 }
   0x3   :  { %7582 = sst [smem:[#allocation37_spill]] %s7543_s2 }
   0x4   :  { %7583 = sst [smem:[#allocation38_spill]] %s7544_s3 }
   0x5   :  { %7584 = sst [smem:[#allocation39_spill]] %s7545_s4 }
   0x6   :  { %7585 = sst [smem:[#allocation40_spill]] %s7546_s5 }
   0x7   :  { %7586 = sst [smem:[#allocation41_spill]] %s7547_s6 }
   0x8   :  { %7587 = sst [smem:[#allocation42_spill]] %s7548_s7 }
   0x9   :  { %29 = vsyncpa [#allocation3], 0 }
   0xa   :  { %30 = vsyncpa [#allocation6], 0 }
   0xb   :  { %31 = vsyncpa [#allocation9], 0 }
   0xc   :  { %32 = vsyncpa [#allocation12], 0 }
   0xd   :  { %33 = vsyncpa [#allocation15], 0 }
   0xe   :  { %34 = vsyncpa [#allocation18], 0 }
   0xf   :  { %35 = vsyncpa [#allocation21], 0 }
  0x10   :  { %36 = vsyncpa [#allocation4], 0 }
  0x11   :  { %37 = vsyncpa [#allocation24], 0  ;;  %s6501_s4 = smov [#allocation5]   ;;  %s6502_s24 = smov [#allocation8]  }
  0x12   :  { %s56_s30 = sshll.u32 %s6501_s4, 4  ;;  %s78_s25 = sshll.u32 %s6502_s24, 4  ;;  %s57_s30 = int_to_ptr.vmem [resolvable:$true] %s56_s30  ;;  %s79_s25 = int_to_ptr.vmem [resolvable:$true] %s78_s25 }
  0x13   :  { %s7588_s26 = sld [smem:[#allocation36_spill]] }
  0x19   :  { %s6153_s2 = scalar_lea.hbm %s7588_s26, 32 }
  0x1a   :  { %p6154_p0 = scmp.ne.s32.totalorder %s7588_s26, %s6153_s2  ;;  %p6157_p1 = scmp.lt.u32.totalorder %s6153_s2, %s7588_s26 }
  0x1c   :  { %p6159_p2 = pnand %p6157_p1, %p6154_p0 }
  0x1e   :  { %6162 = shalt.err (!%p6159_p2)
}
  0x1f   :  { %s6163_s29 = scalar_lea.vmem %s57_s30, 32  ;;  %p6168_p4 = scmp.lt.s32.totalorder %s57_s30, %s57_s30 }
  0x20   :  { %p6164_p3 = scmp.ne.s32.totalorder %s57_s30, %s6163_s29  ;;  %p6169_p5 = scmp.lt.s32.totalorder %s6163_s29, %s6163_s29 }
  0x22   :  { %p6170_p6 = por %p6169_p5, %p6168_p4 }
  0x24   :  { %p6171_p7 = pnand %p6170_p6, %p6164_p3 }
  0x26   :  { %6174 = shalt.err (!%p6171_p7)
}
  0x27   :  { %59 = dma.hbm_to_vmem [thread:$0]  %s7588_s26, 32, %s57_s30, [#allocation6]  }
  0x28   :  { %s7589_s5 = sld [smem:[#allocation39_spill]] }
  0x2e   :  { %s6175_s1 = scalar_lea.hbm %s7589_s5, 16 }
  0x2f   :  { %p6176_p8 = scmp.ne.s32.totalorder %s7589_s5, %s6175_s1  ;;  %p6179_p9 = scmp.lt.u32.totalorder %s6175_s1, %s7589_s5 }
  0x31   :  { %p6181_p10 = pnand %p6179_p9, %p6176_p8 }
  0x33   :  { %6184 = shalt.err (!%p6181_p10)
}
  0x34   :  { %s6185_s28 = scalar_lea.vmem %s79_s25, 16  ;;  %s6189_s29 = scalar_lea.vmem %s79_s25, 32 }
  0x35   :  { %p6186_p11 = scmp.ne.s32.totalorder %s79_s25, %s6185_s28  ;;  %p6190_p12 = scmp.lt.s32.totalorder %s79_s25, %s79_s25 }
  0x36   :  { %p6191_p13 = scmp.lt.s32.totalorder %s6189_s29, %s6185_s28 }
  0x38   :  { %p6192_p0 = por %p6191_p13, %p6190_p12 }
  0x3a   :  { %p6193_p1 = pnand %p6192_p0, %p6186_p11 }
  0x3c   :  { %6196 = shalt.err (!%p6193_p1)
}
  0x3d   :  { %81 = dma.hbm_to_vmem [thread:$0]  %s7589_s5, 16, %s79_s25, [#allocation9]  }
  0x3e   :  { %s6503_s3 = smov [#allocation11]   ;;  %s6504_s4 = smov [#allocation14]  }
  0x3f   :  { %s103_s0 = sshll.u32 %s6503_s3, 4  ;;  %s127_s24 = sshll.u32 %s6504_s4, 4  ;;  %s104_s0 = int_to_ptr.vmem [resolvable:$true] %s103_s0  ;;  %s6679_s24 = int_to_ptr.vmem [resolvable:$true] %s127_s24 }
  0x40   :  { %s6197_s27 = scalar_lea.hbm %s7549_s8, 32 }
  0x41   :  { %p6198_p2 = scmp.ne.s32.totalorder %s7549_s8, %s6197_s27  ;;  %p6201_p3 = scmp.lt.u32.totalorder %s6197_s27, %s7549_s8 }
  0x43   :  { %p6203_p4 = pnand %p6201_p3, %p6198_p2 }
  0x45   :  { %6206 = shalt.err (!%p6203_p4)
}
  0x46   :  { %s6207_s25 = scalar_lea.vmem %s104_s0, 32  ;;  %p6212_p6 = scmp.lt.s32.totalorder %s104_s0, %s104_s0 }
  0x47   :  { %p6208_p5 = scmp.ne.s32.totalorder %s104_s0, %s6207_s25  ;;  %p6213_p7 = scmp.lt.s32.totalorder %s6207_s25, %s6207_s25 }
  0x49   :  { %p6214_p8 = por %p6213_p7, %p6212_p6 }
  0x4b   :  { %p6215_p9 = pnand %p6214_p8, %p6208_p5 }
  0x4d   :  { %6218 = shalt.err (!%p6215_p9)
}
  0x4e   :  { %s7572_s5 = smov 16   ;;  %s7574_s30 = smov 1  }
  0x4f   :  { %109 = dma.hbm_to_vmem [thread:$0]  %s7549_s8, 32, %s104_s0, [#allocation12], %s7572_s5, %s7572_s5, %s7574_s30  }
  0x50   :  { %s6219_s6 = scalar_lea.hbm %s7551_s10, 32 }
  0x51   :  { %p6220_p10 = scmp.ne.s32.totalorder %s7551_s10, %s6219_s6  ;;  %p6223_p11 = scmp.lt.u32.totalorder %s6219_s6, %s7551_s10 }
  0x53   :  { %p6225_p12 = pnand %p6223_p11, %p6220_p10 }
  0x55   :  { %6228 = shalt.err (!%p6225_p12)
}
  0x56   :  { %s6229_s29 = scalar_lea.vmem %s6679_s24, 32  ;;  %p6234_p0 = scmp.lt.s32.totalorder %s6679_s24, %s6679_s24 }
  0x57   :  { %p6230_p13 = scmp.ne.s32.totalorder %s6679_s24, %s6229_s29  ;;  %p6235_p1 = scmp.lt.s32.totalorder %s6229_s29, %s6229_s29 }
  0x59   :  { %p6236_p2 = por %p6235_p1, %p6234_p0 }
  0x5b   :  { %p6237_p3 = pnand %p6236_p2, %p6230_p13 }
  0x5d   :  { %6240 = shalt.err (!%p6237_p3)
}
  0x5e   :  { %133 = dma.hbm_to_vmem [thread:$0]  %s7551_s10, 32, %s6679_s24, [#allocation15], %s7572_s5, %s7572_s5, %s7574_s30  }
  0x5f   :  { %s6507_s25 = smov [#allocation17]   ;;  %s6508_s3 = smov [#allocation2]  }
  0x60   :  { %s155_s26 = sshll.u32 %s6507_s25, 4  ;;  %s43_s4 = sshll.u32 %s6508_s3, 4  ;;  %s156_s26 = int_to_ptr.vmem [resolvable:$true] %s155_s26  ;;  %s6716_s4 = int_to_ptr.vmem [resolvable:$true] %s43_s4 }
  0x61   :  { %s6241_s27 = scalar_lea.hbm %s7555_s14, 32 }
  0x62   :  { %p6242_p4 = scmp.ne.s32.totalorder %s7555_s14, %s6241_s27  ;;  %p6245_p5 = scmp.lt.u32.totalorder %s6241_s27, %s7555_s14 }
  0x64   :  { %p6247_p6 = pnand %p6245_p5, %p6242_p4 }
  0x66   :  { %6250 = shalt.err (!%p6247_p6)
}
  0x67   :  { %s6251_s10 = scalar_lea.vmem %s156_s26, 32  ;;  %p6256_p8 = scmp.lt.s32.totalorder %s156_s26, %s156_s26 }
  0x68   :  { %p6252_p7 = scmp.ne.s32.totalorder %s156_s26, %s6251_s10  ;;  %p6257_p9 = scmp.lt.s32.totalorder %s6251_s10, %s6251_s10 }
  0x6a   :  { %p6258_p10 = por %p6257_p9, %p6256_p8 }
  0x6c   :  { %p6259_p11 = pnand %p6258_p10, %p6252_p7 }
  0x6e   :  { %6262 = shalt.err (!%p6259_p11)
}
  0x6f   :  { %161 = dma.hbm_to_vmem [thread:$0]  %s7555_s14, 32, %s156_s26, [#allocation18], %s7572_s5, %s7572_s5, %s7574_s30  }
  0x70   :  { %s7590_s3 = sld [smem:[#allocation35_spill]] }
  0x76   :  { %s6263_s1 = scalar_lea.hbm %s7590_s3, 256 }
  0x77   :  { %p6264_p12 = scmp.ne.s32.totalorder %s7590_s3, %s6263_s1  ;;  %p6267_p13 = scmp.lt.u32.totalorder %s6263_s1, %s7590_s3 }
  0x79   :  { %p6269_p0 = pnand %p6267_p13, %p6264_p12 }
  0x7b   :  { %6272 = shalt.err (!%p6269_p0)
}
  0x7c   :  { %s6273_s28 = scalar_lea.vmem %s6716_s4, 256  ;;  %p6278_p2 = scmp.lt.s32.totalorder %s6716_s4, %s6716_s4 }
  0x7d   :  { %p6274_p1 = scmp.ne.s32.totalorder %s6716_s4, %s6273_s28  ;;  %p6279_p3 = scmp.lt.s32.totalorder %s6273_s28, %s6273_s28 }
  0x7f   :  { %p6280_p4 = por %p6279_p3, %p6278_p2 }
  0x81   :  { %p6281_p5 = pnand %p6280_p4, %p6274_p1 }
  0x83   :  { %6284 = shalt.err (!%p6281_p5)
}
  0x84   :  { %s7576_s14 = smov 128   ;;  %s7577_s26 = smov 8  }
  0x85   :  { %49 = dma.hbm_to_vmem [thread:$0]  %s7590_s3, 256, %s6716_s4, [#allocation3], %s7576_s14, %s7576_s14, %s7577_s26  }
  0x86   :  { %s6511_s24 = smov [#allocation7]   ;;  %s6512_s0 = smov [#allocation10]  }
  0x87   :  { %s68_s8 = sshll.u32 %s6511_s24, 4  ;;  %s89_s25 = sshll.u32 %s6512_s0, 4  ;;  %s69_s8 = int_to_ptr.vmem [resolvable:$true] %s68_s8  ;;  %s6753_s25 = int_to_ptr.vmem [resolvable:$true] %s89_s25 }
  0x88   :  { %s7591_s27 = sld [smem:[#allocation38_spill]] }
  0x8e   :  { %s6285_s2 = scalar_lea.hbm %s7591_s27, 16 }
  0x8f   :  { %p6286_p6 = scmp.ne.s32.totalorder %s7591_s27, %s6285_s2  ;;  %p6289_p7 = scmp.lt.u32.totalorder %s6285_s2, %s7591_s27 }
  0x91   :  { %p6291_p8 = pnand %p6289_p7, %p6286_p6 }
  0x93   :  { %6294 = shalt.err (!%p6291_p8)
}
  0x94   :  { %s6295_s4 = scalar_lea.vmem %s69_s8, 16  ;;  %s6299_s3 = scalar_lea.vmem %s69_s8, 32 }
  0x95   :  { %p6296_p9 = scmp.ne.s32.totalorder %s69_s8, %s6295_s4  ;;  %p6300_p10 = scmp.lt.s32.totalorder %s69_s8, %s69_s8 }
  0x96   :  { %p6301_p11 = scmp.lt.s32.totalorder %s6299_s3, %s6295_s4 }
  0x98   :  { %p6302_p12 = por %p6301_p11, %p6300_p10 }
  0x9a   :  { %p6303_p13 = pnand %p6302_p12, %p6296_p9 }
  0x9c   :  { %6306 = shalt.err (!%p6303_p13)
}
  0x9d   :  { %71 = dma.hbm_to_vmem [thread:$0]  %s7591_s27, 16, %s69_s8, [#allocation6]  }
  0x9e   :  { %s7592_s1 = sld [smem:[#allocation41_spill]] }
  0xa4   :  { %s6307_s6 = scalar_lea.hbm %s7592_s1, 32 }
  0xa5   :  { %p6308_p0 = scmp.ne.s32.totalorder %s7592_s1, %s6307_s6  ;;  %p6311_p1 = scmp.lt.u32.totalorder %s6307_s6, %s7592_s1 }
  0xa7   :  { %p6313_p2 = pnand %p6311_p1, %p6308_p0 }
  0xa9   :  { %6316 = shalt.err (!%p6313_p2)
}
  0xaa   :  { %s6317_s28 = scalar_lea.vmem %s6753_s25, 32  ;;  %p6322_p4 = scmp.lt.s32.totalorder %s6753_s25, %s6753_s25 }
  0xab   :  { %p6318_p3 = scmp.ne.s32.totalorder %s6753_s25, %s6317_s28  ;;  %p6323_p5 = scmp.lt.s32.totalorder %s6317_s28, %s6317_s28 }
  0xad   :  { %p6324_p6 = por %p6323_p5, %p6322_p4 }
  0xaf   :  { %p6325_p7 = pnand %p6324_p6, %p6318_p3 }
  0xb1   :  { %6328 = shalt.err (!%p6325_p7)
}
  0xb2   :  { %s7593_s8 = smov 1   ;;  %s7594_s27 = smov 16  }
  0xb3   :  { %95 = dma.hbm_to_vmem [thread:$0]  %s7592_s1, 32, %s6753_s25, [#allocation9], %s7594_s27, %s7594_s27, %s7593_s8  }
  0xb4   :  { %s6513_s29 = smov [#allocation13]   ;;  %s6514_s24 = smov [#allocation16]  }
  0xb5   :  { %s115_s10 = sshll.u32 %s6513_s29, 4  ;;  %s141_s0 = sshll.u32 %s6514_s24, 4  ;;  %s116_s10 = int_to_ptr.vmem [resolvable:$true] %s115_s10  ;;  %s6787_s0 = int_to_ptr.vmem [resolvable:$true] %s141_s0 }
  0xb6   :  { %s6329_s30 = scalar_lea.hbm %s7550_s9, 32 }
  0xb7   :  { %p6330_p8 = scmp.ne.s32.totalorder %s7550_s9, %s6329_s30  ;;  %p6333_p9 = scmp.lt.u32.totalorder %s6329_s30, %s7550_s9 }
  0xb9   :  { %p6335_p10 = pnand %p6333_p9, %p6330_p8 }
  0xbb   :  { %6338 = shalt.err (!%p6335_p10)
}
  0xbc   :  { %s6339_s25 = scalar_lea.vmem %s116_s10, 32  ;;  %p6344_p12 = scmp.lt.s32.totalorder %s116_s10, %s116_s10 }
  0xbd   :  { %p6340_p11 = scmp.ne.s32.totalorder %s116_s10, %s6339_s25  ;;  %p6345_p13 = scmp.lt.s32.totalorder %s6339_s25, %s6339_s25 }
  0xbf   :  { %p6346_p0 = por %p6345_p13, %p6344_p12 }
  0xc1   :  { %p6347_p1 = pnand %p6346_p0, %p6340_p11 }
  0xc3   :  { %6350 = shalt.err (!%p6347_p1)
}
  0xc4   :  { %121 = dma.hbm_to_vmem [thread:$0]  %s7550_s9, 32, %s116_s10, [#allocation12], %s7594_s27, %s7594_s27, %s7593_s8  }
  0xc5   :  { %s6351_s14 = scalar_lea.hbm %s7553_s12, 32 }
  0xc6   :  { %p6352_p2 = scmp.ne.s32.totalorder %s7553_s12, %s6351_s14  ;;  %p6355_p3 = scmp.lt.u32.totalorder %s6351_s14, %s7553_s12 }
  0xc8   :  { %p6357_p4 = pnand %p6355_p3, %p6352_p2 }
  0xca   :  { %6360 = shalt.err (!%p6357_p4)
}
  0xcb   :  { %s6361_s2 = scalar_lea.vmem %s6787_s0, 32  ;;  %p6366_p6 = scmp.lt.s32.totalorder %s6787_s0, %s6787_s0 }
  0xcc   :  { %p6362_p5 = scmp.ne.s32.totalorder %s6787_s0, %s6361_s2  ;;  %p6367_p7 = scmp.lt.s32.totalorder %s6361_s2, %s6361_s2 }
  0xce   :  { %p6368_p8 = por %p6367_p7, %p6366_p6 }
  0xd0   :  { %p6369_p9 = pnand %p6368_p8, %p6362_p5 }
  0xd2   :  { %6372 = shalt.err (!%p6369_p9)
}
  0xd3   :  { %147 = dma.hbm_to_vmem [thread:$0]  %s7553_s12, 32, %s6787_s0, [#allocation15], %s7594_s27, %s7594_s27, %s7593_s8  }
  0xd4   :  { %s6515_s7 = smov [#allocation19]   ;;  %s6516_s25 = smov [#allocation20]  }
  0xd5   :  { %s167_s28 = sshll.u32 %s6515_s7, 4  ;;  %s179_s1 = sshll.u32 %s6516_s25, 4  ;;  %s168_s28 = int_to_ptr.vmem [resolvable:$true] %s167_s28  ;;  %s6824_s1 = int_to_ptr.vmem [resolvable:$true] %s179_s1 }
  0xd6   :  { %s6373_s29 = scalar_lea.hbm %s7556_s15, 32 }
  0xd7   :  { %p6374_p10 = scmp.ne.s32.totalorder %s7556_s15, %s6373_s29  ;;  %p6377_p11 = scmp.lt.u32.totalorder %s6373_s29, %s7556_s15 }
  0xd9   :  { %p6379_p12 = pnand %p6377_p11, %p6374_p10 }
  0xdb   :  { %6382 = shalt.err (!%p6379_p12)
}
  0xdc   :  { %s6383_s12 = scalar_lea.vmem %s168_s28, 32  ;;  %p6388_p0 = scmp.lt.s32.totalorder %s168_s28, %s168_s28 }
  0xdd   :  { %p6384_p13 = scmp.ne.s32.totalorder %s168_s28, %s6383_s12  ;;  %p6389_p1 = scmp.lt.s32.totalorder %s6383_s12, %s6383_s12 }
  0xdf   :  { %p6390_p2 = por %p6389_p1, %p6388_p0 }
  0xe1   :  { %p6391_p3 = pnand %p6390_p2, %p6384_p13 }
  0xe3   :  { %6394 = shalt.err (!%p6391_p3)
}
  0xe4   :  { %173 = dma.hbm_to_vmem [thread:$0]  %s7556_s15, 32, %s168_s28, [#allocation18], %s7594_s27, %s7594_s27, %s7593_s8  }
  0xe5   :  { %s6395_s10 = scalar_lea.hbm %s7557_s16, 32 }
  0xe6   :  { %p6396_p4 = scmp.ne.s32.totalorder %s7557_s16, %s6395_s10  ;;  %p6399_p5 = scmp.lt.u32.totalorder %s6395_s10, %s7557_s16 }
  0xe8   :  { %p6401_p6 = pnand %p6399_p5, %p6396_p4 }
  0xea   :  { %6404 = shalt.err (!%p6401_p6)
}
  0xeb   :  { %s6405_s29 = scalar_lea.vmem %s6824_s1, 32  ;;  %p6410_p8 = scmp.lt.s32.totalorder %s6824_s1, %s6824_s1 }
  0xec   :  { %p6406_p7 = scmp.ne.s32.totalorder %s6824_s1, %s6405_s29  ;;  %p6411_p9 = scmp.lt.s32.totalorder %s6405_s29, %s6405_s29 }
  0xee   :  { %p6412_p10 = por %p6411_p9, %p6410_p8 }
  0xf0   :  { %p6413_p11 = pnand %p6412_p10, %p6406_p7 }
  0xf2   :  { %6416 = shalt.err (!%p6413_p11)
}
  0xf3   :  { %185 = dma.hbm_to_vmem [thread:$0]  %s7557_s16, 32, %s6824_s1, [#allocation21], %s7594_s27, %s7594_s27, %s7593_s8  }
  0xf4   :  { %6483 = dma.done.wait [#allocation3], 256  }
  0xf5   :  { %6484 = vsyncadd [#allocation3], 4294967040 }
  0xf6   :  { %6485 = dma.done.wait [#allocation6], 48  }
  0xf7   :  { %6486 = vsyncadd [#allocation6], 4294967248 }
  0xf8   :  { %6487 = dma.done.wait [#allocation9], 48  }
  0xf9   :  { %6488 = vsyncadd [#allocation9], 4294967248 }
  0xfa   :  { %6489 = dma.done.wait [#allocation12], 64  }
  0xfb   :  { %6490 = vsyncadd [#allocation12], 4294967232 }
  0xfc   :  { %6491 = dma.done.wait [#allocation15], 64  }
  0xfd   :  { %6492 = vsyncadd [#allocation15], 4294967232 }
  0xfe   :  { %6493 = dma.done.wait [#allocation18], 64  }
  0xff   :  { %6494 = vsyncadd [#allocation18], 4294967232 }
 0x100   :  { %6495 = dma.done.wait [#allocation21], 32  }
 0x101   :  { %6496 = vsyncadd [#allocation21], 4294967264  ;;  %vm234_vm0 = vcmask 261120   ;;  %v230_v0 = vld [vmem:[#allocation2] sm:$0xff]  ;;  %v231_v1 = vld [vmem:[#allocation2 + $0x8] sm:$0xff]  ;;  %s7595_s27 = sld [smem:[#allocation40_spill]] }
 0x102   :  { %v235_v2 = vsel %vm234_vm0, %v230_v0, 0.0  ;;  %v238_v3 = vsel %vm234_vm0, %v231_v1, 0.0  ;;  %v5309_v27 = vld [vmem:[#allocation7] ss:$0 sm:$0xff]  ;;  %v5310_v29 = vld [vmem:[#allocation8] ss:$0 sm:$0xff] }
 0x103   :  { %236 = vadd.xlane.f32.xlu0 %v235_v2  ;;  %v6517_v36 = vmov 0.0   ;;  %vm6518_vm1 = vmmov 0   ;;  %v5311_v37 = vld [vmem:[#allocation10] ss:$0 sm:$0xff]  ;;  %s6519_s0 = smov 88   ;;  %s6520_s30 = smov 96  }
 0x104   :  { %5598 = vmatprep.subr.mxu1 %v6517_v36  ;;  %5600 = vmatprep.mubr.msk.f32.mxu1 %vm6518_vm1, %v6517_v36  ;;  %s6521_s2 = smov 120   ;;  %vm380_vm2 = vcmask 64512   ;;  %v6916_v46 = vld [vmem:[#allocation5] ss:$0 sm:$0xff]  ;;  %s6522_s9 = smov 64   ;;  %vm2489_vm3 = vcmask 523264  }
 0x105   :  { %s6523_s10 = smov 80   ;;  %s6524_s7 = smov 112   ;;  %vm4978_vm5 = vcmask 130048   ;;  %vm5221_vm6 = vcmask 17408  }
 0x106   :  { %s6525_s25 = smov 56   ;;  %s7596_s29 = sld [smem:[#allocation42_spill]] }
 0x107   :  { %239 = vadd.xlane.f32.xlu0 %v238_v3  ;;  %v280_v14 = vld [vmem:[%s7595_s27] sm:$0xff]  ;;  %v281_v15 = vld [vmem:[%s7595_s27 + $0x8] sm:$0xff]  ;;  %v282_v16 = vld [vmem:[%s7595_s27 + $0x10] sm:$0xff]  ;;  %s6526_s16 = smov 72   ;;  %s6527_s8 = smov 104  }
 0x108   :  { %v5938_v17 = vpack.c.bf16 %v281_v15, %v280_v14  ;;  %v283_v18 = vld [vmem:[%s7595_s27 + $0x18] sm:$0xff]  ;;  %s6528_s1 = smov 48   ;;  %s7578_s6 = smov 40  }
 0x109   :  { %v5942_v19 = vpack.c.bf16 %v283_v18, %v282_v16  ;;  %s7597_s12 = smov 40   ;;  %s6532_s5 = smov [#allocation23]  }
 0x10a   :  { %5939 = vmatprep.subr.bf16.mxu0 %v5938_v17 }
 0x10b   :  { %5941 = vmatpush3.bf16.msra.mxu0 %v5938_v17 }
 0x10c   :  { %5943 = vmatprep.subr.bf16.mxu0 %v5942_v19  ;;  %v6936_v3 = vld [vmem:[%s7596_s29 + $0x8] sm:$0xff] }
 0x10f   :  { %5945 = vmatpush3.bf16.msra.mxu0 %v5942_v19 }
 0x110   :  { %5608 = vmatprep.subr.mxu0 %v6517_v36 }
 0x190   :  { %v237_v4 = vpop.xlane.xlu0 %236 }
 0x191   :  { %v242_v5 = vmul.f32 0.03125, %v237_v4 }
 0x193   :  { %v244_v6 = vsub.f32 %v230_v0, %v242_v5 }
 0x194   :  { %v240_v7 = vpop.xlane.xlu0 %239 }
 0x195   :  { %v243_v8 = vmul.f32 0.03125, %v240_v7  ;;  %v246_v9 = vmul.f32 %v244_v6, %v244_v6 }
 0x197   :  { %v245_v10 = vsub.f32 %v231_v1, %v243_v8  ;;  %v248_v11 = vsel %vm234_vm0, %v246_v9, 0.0 }
 0x198   :  { %249 = vadd.xlane.f32.xlu1 %v248_v11  ;;  %v6950_v11 = vld [vmem:[%s7596_s29] sm:$0xff] }
 0x199   :  { %v247_v12 = vmul.f32 %v245_v10, %v245_v10 }
 0x19b   :  { %v251_v13 = vsel %vm234_vm0, %v247_v12, 0.0 }
 0x19c   :  { %252 = vadd.xlane.f32.xlu1 %v251_v13 }
 0x225   :  { %v250_v20 = vpop.xlane.xlu1 %249 }
 0x226   :  { %v254_v21 = vmul.f32 0.03125, %v250_v20 }
 0x228   :  { %v256_v22 = vadd.f32 1e-12, %v254_v21 }
 0x229   :  { %v253_v23 = vpop.xlane.xlu1 %252 }
 0x22a   :  { %6053 = vrsqrt.f32 %v256_v22  ;;  %v255_v24 = vmul.f32 0.03125, %v253_v23 }
 0x22c   :  { %v257_v25 = vadd.f32 1e-12, %v255_v24 }
 0x22e   :  { %6055 = vrsqrt.f32 %v257_v25 }
 0x234   :  { %v6054_v26 = vpop.eup %6053 }
 0x235   :  { %v260_v28 = vmul.f32 %v6054_v26, %v244_v6 }
 0x237   :  { %v268_v30 = vmul.f32 %v5309_v27, %v260_v28 }
 0x238   :  { %v6056_v31 = vpop.eup %6055 }
 0x239   :  { %v261_v32 = vmul.f32 %v6056_v31, %v245_v10  ;;  %v6877_v33 = vadd.f32 %v5310_v29, %v268_v30 }
 0x23b   :  { %v269_v34 = vmul.f32 %v5309_v27, %v261_v32  ;;  %278 = vst.msk [vmem:[#allocation22] sm:$0xff] %vm234_vm0, %v6877_v33  ;;  %5595 = vmatprep.mubr.msk.f32.mxu0 %vm234_vm0, %v6877_v33 }
 0x23d   :  { %v6883_v35 = vadd.f32 %v5310_v29, %v269_v34 }
 0x23f   :  { %279 = vst.msk [vmem:[#allocation22 + $0x8] sm:$0xff] %vm234_vm0, %v6883_v35  ;;  %5596 = vmatmul.mubr.msk.f32.vlgmr.msra.gmra.mrb[0].mxu0 %vm234_vm0, %v6883_v35 }
 0x240   :  { %5610 = vmatprep.mubr.msk.f32.mxu0 %vm6518_vm1, %v6517_v36 }
 0x312   :  { %v5597_v38 = vpop.f32.mrb[0].mxu0 }
 0x313   :  { %v6895_v39 = vadd.f32 %v5597_v38, %v5311_v37  ;;  %v363_v40 = vpop.f32.mrb[1].mxu0 }
 0x314   :  { %v6897_v41 = vadd.f32 %v5311_v37, %v363_v40 }
 0x316   :  { %550 = vrot.lane.b32.xlu1 %v6897_v41, %s6519_s0  ;;  %378 = vrot.lane.b32.xlu0 %v6897_v41, %s6520_s30 }
 0x31a   :  { %548 = vrot.lane.b32.xlu1 %v6897_v41, %s6521_s2 }
 0x388   :  { %v551_v42 = vpop.permute.xlu1 %550  ;;  %v379_v43 = vpop.permute.xlu0 %378 }
 0x389   :  { %5599 = vmatpush3.xpose.msk.msra.mxu1 %vm380_vm2, %v379_v43  ;;  %5609 = vmatpush3.xpose.msk.msra.mxu0 %vm380_vm2, %v551_v42 }
 0x38a   :  { %5603 = vmatprep.subr.mxu1 %v6517_v36  ;;  %5618 = vmatprep.subr.mxu0 %v6517_v36 }
 0x38c   :  { %v549_v44 = vpop.permute.xlu1 %548  ;;  %5601 = vmatmul.mubr.msk.f32.vlgmr.msra.gmra.mrb[0].mxu1 %vm380_vm2, %v6897_v41 }
 0x38d   :  { %5611 = vmatmul.mubr.msk.f32.vlgmr.msra.gmra.mrb[2].mxu0 %vm380_vm2, %v549_v44  ;;  %5605 = vmatprep.mubr.msk.f32.mxu1 %vm6518_vm1, %v6517_v36  ;;  %v6990_v44 = vld [vmem:[%s7596_s29 + $0x10] sm:$0xff] }
 0x38e   :  { %5620 = vmatprep.mubr.msk.f32.mxu0 %vm6518_vm1, %v6517_v36  ;;  %5619 = vmatpush3.msra.mxu0 %v6936_v3 }
 0x38f   :  { %5628 = vmatprep.subr.mxu0 %v6517_v36 }
 0x45f   :  { %v451_v45 = vpop.f32.mrb[0].mxu1 }
 0x460   :  { %v455_v47 = vmul.f32 0.35355338, %v451_v45  ;;  %v5602_v48 = vpop.f32.mrb[1].mxu1  ;;  %v622_v49 = vpop.f32.mrb[2].mxu0 }
 0x461   :  { %v626_v50 = vmul.f32 0.35355338, %v622_v49  ;;  %v5612_v51 = vpop.f32.mrb[3].mxu0 }
 0x462   :  { %v460_v52 = vadd.f32 %v6916_v46, %v455_v47 }
 0x463   :  { %v627_v53 = vadd.f32 %v6916_v46, %v626_v50 }
 0x464   :  { %v461_v54 = vsel %vm380_vm2, %v460_v52, -inf }
 0x465   :  { %462 = vmax.xlane.f32.xlu1 %v461_v54  ;;  %v628_v55 = vsel %vm380_vm2, %v627_v53, -inf }
 0x466   :  { %629 = vmax.xlane.f32.xlu0 %v628_v55 }
 0x476   :  { %472 = vrot.lane.b32.xlu1 %v6897_v41, %s6522_s9 }
 0x47a   :  { %863 = vrot.lane.b32.xlu1 %v6897_v41, %s6523_s10 }
 0x47e   :  { %861 = vrot.lane.b32.xlu1 %v6897_v41, %s6524_s7 }
 0x4f2   :  { %v463_v56 = vpop.xlane.xlu1 %462 }
 0x4f3   :  { %v464_v57 = vsub.f32 %v460_v52, %v463_v56  ;;  %v630_v58 = vpop.xlane.xlu0 %629 }
 0x4f4   :  { %v631_v59 = vsub.f32 %v627_v53, %v630_v58 }
 0x4f5   :  { %v465_v60 = vmul.f32 1.442695, %v464_v57 }
 0x4f6   :  { %v632_v61 = vmul.f32 1.442695, %v631_v59  ;;  %v473_v62 = vpop.permute.xlu1 %472 }
 0x4f7   :  { %6057 = vpow2.f32 %v465_v60  ;;  %5604 = vmatpush3.msra.mxu1 %v473_v62 }
 0x4f8   :  { %5613 = vmatprep.subr.mxu1 %v6517_v36  ;;  %6059 = vpow2.f32 %v632_v61 }
 0x4fa   :  { %v864_v14 = vpop.permute.xlu1 %863 }
 0x4fe   :  { %v862_v17 = vpop.permute.xlu1 %861 }
 0x501   :  { %v6058_v63 = vpop.eup %6057 }
 0x502   :  { %v467_v0 = vsel %vm380_vm2, %v6058_v63, 0.0  ;;  %v6060_v1 = vpop.eup %6059 }
 0x503   :  { %468 = vadd.xlane.f32.xlu0 %v467_v0  ;;  %v634_v2 = vsel %vm380_vm2, %v6060_v1, 0.0 }
 0x507   :  { %635 = vadd.xlane.f32.xlu0 %v634_v2 }
 0x51d   :  { %639 = vrot.lane.b32.xlu0 %v6897_v41, %s6525_s25 }
 0x590   :  { %v469_v4 = vpop.xlane.xlu0 %468 }
 0x591   :  { %6061 = vrcp.f32 %v469_v4  ;;  %v7027_v4 = vld [vmem:[%s7596_s29 + $0x18] sm:$0xff] }
 0x594   :  { %v636_v5 = vpop.xlane.xlu0 %635 }
 0x595   :  { %6063 = vrcp.f32 %v636_v5 }
 0x598   :  { %v640_v8 = vpop.permute.xlu0 %639 }
 0x59b   :  { %v6062_v6 = vpop.eup %6061 }
 0x59c   :  { %v471_v7 = vmul.f32 %v6062_v6, %v6058_v63 }
 0x59e   :  { %5606 = vmatmul.mubr.msk.f32.vlgmr.msra.gmra.mrb[2].mxu1 %vm380_vm2, %v471_v7  ;;  %v7034_v7 = vld [vmem:[#allocation5 + $0x1] ss:$0 sm:$0xff] }
 0x59f   :  { %v6064_v9 = vpop.eup %6063  ;;  %5614 = vmatpush3.msra.mxu1 %v640_v8  ;;  %5615 = vmatprep.mubr.msk.f32.mxu1 %vm6518_vm1, %v6517_v36 }
 0x5a0   :  { %v638_v10 = vmul.f32 %v6064_v9, %v6060_v1  ;;  %5623 = vmatprep.subr.mxu1 %v6517_v36 }
 0x5a2   :  { %5616 = vmatmul.mubr.msk.f32.vlgmr.msra.gmra.mrb[4].mxu1 %vm380_vm2, %v638_v10 }
 0x5a3   :  { %5625 = vmatprep.mubr.msk.f32.mxu1 %vm6518_vm1, %v6517_v36  ;;  %5624 = vmatpush3.msra.mxu1 %v6950_v11 }
 0x5a4   :  { %5633 = vmatprep.subr.mxu1 %v6517_v36 }
 0x671   :  { %v544_v12 = vpop.f32.mrb[2].mxu1 }
 0x672   :  { %v5607_v13 = vpop.f32.mrb[3].mxu1  ;;  %5626 = vmatmul.mubr.msk.f32.vlgmr.msra.gmra.mrb[6].mxu1 %vm380_vm2, %v544_v12 }
 0x673   :  { %5635 = vmatprep.mubr.msk.f32.mxu1 %vm6518_vm1, %v6517_v36 }
 0x675   :  { %v711_v15 = vpop.f32.mrb[4].mxu1 }
 0x676   :  { %v5617_v16 = vpop.f32.mrb[5].mxu1  ;;  %5621 = vmatmul.mubr.msk.f32.vlgmr.msra.gmra.mrb[4].mxu0 %vm380_vm2, %v711_v15 }
 0x677   :  { %5629 = vmatpush3.xpose.msk.msra.mxu0 %vm380_vm2, %v864_v14  ;;  %5630 = vmatprep.mubr.msk.f32.mxu0 %vm6518_vm1, %v6517_v36 }
 0x678   :  { %5638 = vmatprep.subr.mxu0 %v6517_v36 }
 0x67a   :  { %5631 = vmatmul.mubr.msk.f32.vlgmr.msra.gmra.mrb[6].mxu0 %vm380_vm2, %v862_v17 }
 0x67b   :  { %5640 = vmatprep.mubr.msk.f32.mxu0 %vm6518_vm1, %v6517_v36  ;;  %5639 = vmatpush3.msra.mxu0 %v6990_v44 }
 0x67c   :  { %5648 = vmatprep.subr.mxu0 %v6517_v36 }
 0x745   :  { %v857_v18 = vpop.f32.mrb[6].mxu1 }
 0x746   :  { %v5627_v19 = vpop.f32.mrb[7].mxu1 }
 0x749   :  { %v784_v20 = vpop.f32.mrb[4].mxu0 }
 0x74a   :  { %v6965_v21 = vadd.f32 %v857_v18, %v784_v20  ;;  %v5622_v22 = vpop.f32.mrb[5].mxu0 }
 0x74d   :  { %v935_v23 = vpop.f32.mrb[6].mxu0 }
 0x74e   :  { %v939_v24 = vmul.f32 0.35355338, %v935_v23  ;;  %v5632_v25 = vpop.f32.mrb[7].mxu0 }
 0x750   :  { %v940_v26 = vadd.f32 %v6916_v46, %v939_v24 }
 0x752   :  { %v941_v27 = vsel %vm380_vm2, %v940_v26, -inf }
 0x753   :  { %942 = vmax.xlane.f32.xlu1 %v941_v27 }
 0x764   :  { %1104 = vrot.lane.b32.xlu1 %v6897_v41, %s6526_s16 }
 0x768   :  { %1102 = vrot.lane.b32.xlu1 %v6897_v41, %s6527_s8 }
 0x76c   :  { %1345 = vrot.lane.b32.xlu1 %v6895_v39, %s6520_s30 }
 0x7e0   :  { %v943_v28 = vpop.xlane.xlu1 %942 }
 0x7e1   :  { %v944_v29 = vsub.f32 %v940_v26, %v943_v28 }
 0x7e3   :  { %v945_v30 = vmul.f32 1.442695, %v944_v29 }
 0x7e4   :  { %v1105_v40 = vpop.permute.xlu1 %1104 }
 0x7e5   :  { %6065 = vpow2.f32 %v945_v30 }
 0x7e8   :  { %v1103_v43 = vpop.permute.xlu1 %1102 }
 0x7ec   :  { %v1346_v61 = vpop.permute.xlu1 %1345 }
 0x7ef   :  { %v6066_v31 = vpop.eup %6065 }
 0x7f0   :  { %v947_v32 = vsel %vm380_vm2, %v6066_v31, 0.0 }
 0x7f1   :  { %948 = vadd.xlane.f32.xlu0 %v947_v32 }
 0x807   :  { %952 = vrot.lane.b32.xlu0 %v6897_v41, %s6528_s1 }
 0x87e   :  { %v949_v34 = vpop.xlane.xlu0 %948 }
 0x87f   :  { %6067 = vrcp.f32 %v949_v34 }
 0x882   :  { %v953_v37 = vpop.permute.xlu0 %952 }
 0x883   :  { %5634 = vmatpush3.msra.mxu1 %v953_v37 }
 0x884   :  { %5643 = vmatprep.subr.mxu1 %v6517_v36 }
 0x889   :  { %v6068_v38 = vpop.eup %6067 }
 0x88a   :  { %v951_v42 = vmul.f32 %v6068_v38, %v6066_v31 }
 0x88c   :  { %5636 = vmatmul.mubr.msk.f32.vlgmr.msra.gmra.mrb[8].mxu1 %vm380_vm2, %v951_v42 }
 0x88d   :  { %5644 = vmatpush3.xpose.msk.msra.mxu1 %vm380_vm2, %v1105_v40  ;;  %5645 = vmatprep.mubr.msk.f32.mxu1 %vm6518_vm1, %v6517_v36 }
 0x88e   :  { %5653 = vmatprep.subr.mxu1 %v6517_v36 }
 0x890   :  { %5646 = vmatmul.mubr.msk.f32.vlgmr.msra.gmra.mrb[10].mxu1 %vm380_vm2, %v1103_v43 }
 0x891   :  { %5655 = vmatprep.mubr.msk.f32.mxu1 %vm6518_vm1, %v6517_v36  ;;  %5654 = vmatpush3.msra.mxu1 %v7027_v4 }
 0x892   :  { %5663 = vmatprep.subr.mxu1 %v6517_v36 }
 0x95f   :  { %v1024_v45 = vpop.f32.mrb[8].mxu1 }
 0x960   :  { %v5637_v47 = vpop.f32.mrb[9].mxu1  ;;  %5641 = vmatmul.mubr.msk.f32.vlgmr.msra.gmra.mrb[8].mxu0 %vm380_vm2, %v1024_v45 }
 0x961   :  { %5650 = vmatprep.mubr.msk.f32.mxu0 %vm6518_vm1, %v6517_v36 }
 0x963   :  { %v1176_v48 = vpop.f32.mrb[10].mxu1 }
 0x964   :  { %v1180_v49 = vmul.f32 0.35355338, %v1176_v48  ;;  %v5647_v50 = vpop.f32.mrb[11].mxu1 }
 0x966   :  { %v1181_v51 = vadd.f32 %v6916_v46, %v1180_v49 }
 0x968   :  { %v1182_v52 = vsel %vm380_vm2, %v1181_v51, -inf }
 0x969   :  { %1183 = vmax.xlane.f32.xlu0 %v1182_v52 }
 0x97f   :  { %1193 = vrot.lane.b32.xlu0 %v6897_v41, %s7578_s6 }
 0x983   :  { %1516 = vrot.lane.b32.xlu0 %v6895_v39, %s6519_s0 }
 0x9f6   :  { %v1184_v53 = vpop.xlane.xlu0 %1183 }
 0x9f7   :  { %v1185_v54 = vsub.f32 %v1181_v51, %v1184_v53 }
 0x9f9   :  { %v1186_v55 = vmul.f32 1.442695, %v1185_v54 }
 0x9fa   :  { %v1194_v56 = vpop.permute.xlu0 %1193 }
 0x9fb   :  { %6069 = vpow2.f32 %v1186_v55  ;;  %5649 = vmatpush3.msra.mxu0 %v1194_v56 }
 0x9fc   :  { %5658 = vmatprep.subr.mxu0 %v6517_v36 }
 0x9fe   :  { %v1517_v1 = vpop.permute.xlu0 %1516 }
 0xa05   :  { %v6070_v57 = vpop.eup %6069 }
 0xa06   :  { %v1188_v58 = vsel %vm380_vm2, %v6070_v57, 0.0 }
 0xa07   :  { %1189 = vadd.xlane.f32.xlu1 %v1188_v58 }
 0xa18   :  { %1514 = vrot.lane.b32.xlu1 %v6895_v39, %s6521_s2 }
 0xa33   :  { %v1097_v59 = vpop.f32.mrb[8].mxu0 }
 0xa34   :  { %v1101_v41 = vadd.f32 %v1097_v59, %v6965_v21  ;;  %v5642_v60 = vpop.f32.mrb[9].mxu0 }
 0xa94   :  { %v1190_v62 = vpop.xlane.xlu1 %1189 }
 0xa95   :  { %6071 = vrcp.f32 %v1190_v62 }
 0xa98   :  { %v1515_v2 = vpop.permute.xlu1 %1514 }
 0xa9f   :  { %v6072_v63 = vpop.eup %6071 }
 0xaa0   :  { %v1192_v0 = vmul.f32 %v6072_v63, %v6070_v57 }
 0xaa2   :  { %5651 = vmatmul.mubr.msk.f32.vlgmr.msra.gmra.mrb[10].mxu0 %vm380_vm2, %v1192_v0 }
 0xaa3   :  { %5659 = vmatpush3.xpose.msk.msra.mxu0 %vm380_vm2, %v1346_v61  ;;  %5660 = vmatprep.mubr.msk.f32.mxu0 %vm6518_vm1, %v6517_v36 }
 0xaa4   :  { %5668 = vmatprep.subr.mxu0 %v6517_v36 }
 0xaa6   :  { %5661 = vmatmul.mubr.msk.f32.vlgmr.msra.gmra.mrb[12].mxu0 %vm380_vm2, %v6895_v39 }
 0xaa7   :  { %5669 = vmatpush3.xpose.msk.msra.mxu0 %vm380_vm2, %v1517_v1  ;;  %5670 = vmatprep.mubr.msk.f32.mxu0 %vm6518_vm1, %v6517_v36 }
 0xaa8   :  { %5678 = vmatprep.subr.mxu0 %v6517_v36 }
 0xaaa   :  { %5671 = vmatmul.mubr.msk.f32.vlgmr.msra.gmra.mrb[14].mxu0 %vm380_vm2, %v1515_v2 }
 0xaab   :  { %5679 = vmatpush3.msra.mxu0 %v6936_v3  ;;  %5680 = vmatprep.mubr.msk.f32.mxu0 %vm6518_vm1, %v6517_v36 }
 0xaac   :  { %5688 = vmatprep.subr.mxu0 %v6517_v36 }
 0xb75   :  { %v1265_v5 = vpop.f32.mrb[10].mxu0 }
 0xb76   :  { %v5652_v6 = vpop.f32.mrb[11].mxu0  ;;  %5656 = vmatmul.mubr.msk.f32.vlgmr.msra.gmra.mrb[12].mxu1 %vm380_vm2, %v1265_v5 }
 0xb77   :  { %5665 = vmatprep.mubr.msk.f32.mxu1 %vm6518_vm1, %v6517_v36 }
 0xb79   :  { %v1417_v3 = vpop.f32.mrb[12].mxu0 }
 0xb7a   :  { %v1421_v8 = vmul.f32 0.35355338, %v1417_v3  ;;  %v5662_v9 = vpop.f32.mrb[13].mxu0 }
 0xb7c   :  { %v1426_v10 = vadd.f32 %v7034_v7, %v1421_v8 }
 0xb7d   :  { %v1588_v12 = vpop.f32.mrb[14].mxu0 }
 0xb7e   :  { %v1592_v13 = vmul.f32 0.35355338, %v1588_v12  ;;  %v5672_v14 = vpop.f32.mrb[15].mxu0  ;;  %v1427_v15 = vsel %vm380_vm2, %v1426_v10, -inf }
 0xb7f   :  { %1428 = vmax.xlane.f32.xlu0 %v1427_v15 }
 0xb80   :  { %v1593_v16 = vadd.f32 %v7034_v7, %v1592_v13 }
 0xb82   :  { %v1594_v17 = vsel %vm380_vm2, %v1593_v16, -inf }
 0xb83   :  { %1595 = vmax.xlane.f32.xlu1 %v1594_v17 }
 0xb94   :  { %1605 = vrot.lane.b32.xlu1 %v6895_v39, %s6525_s25 }
 0xb98   :  { %1829 = vrot.lane.b32.xlu1 %v6895_v39, %s6523_s10 }
 0xb9c   :  { %1827 = vrot.lane.b32.xlu1 %v6895_v39, %s6524_s7 }
 0xc0c   :  { %v1429_v18 = vpop.xlane.xlu0 %1428 }
 0xc0d   :  { %v1430_v19 = vsub.f32 %v1426_v10, %v1429_v18  ;;  %v5348_v10 = vld [vmem:[#allocation11] ss:$0 sm:$0xff] }
 0xc0f   :  { %v1431_v20 = vmul.f32 1.442695, %v1430_v19 }
 0xc10   :  { %v1596_v21 = vpop.xlane.xlu1 %1595 }
 0xc11   :  { %6073 = vpow2.f32 %v1431_v20  ;;  %v1597_v22 = vsub.f32 %v1593_v16, %v1596_v21 }
 0xc13   :  { %v1598_v23 = vmul.f32 1.442695, %v1597_v22 }
 0xc14   :  { %v1606_v40 = vpop.permute.xlu1 %1605 }
 0xc15   :  { %6075 = vpow2.f32 %v1598_v23 }
 0xc18   :  { %v1830_v48 = vpop.permute.xlu1 %1829 }
 0xc1b   :  { %v6074_v24 = vpop.eup %6073 }
 0xc1c   :  { %v1433_v25 = vsel %vm380_vm2, %v6074_v24, 0.0 }
 0xc1d   :  { %1434 = vadd.xlane.f32.xlu0 %v1433_v25 }
 0xc1f   :  { %v6076_v26 = vpop.eup %6075 }
 0xc20   :  { %v1600_v27 = vsel %vm380_vm2, %v6076_v26, 0.0 }
 0xc21   :  { %1601 = vadd.xlane.f32.xlu0 %v1600_v27 }
 0xc37   :  { %1438 = vrot.lane.b32.xlu0 %v6895_v39, %s6522_s9 }
 0xc49   :  { %v1338_v28 = vpop.f32.mrb[12].mxu1 }
 0xc4a   :  { %v7050_v29 = vadd.f32 %v1338_v28, %v1101_v41  ;;  %v5657_v30 = vpop.f32.mrb[13].mxu1 }
 0xc4c   :  { %v2316_v13 = vadd.f32 %v5348_v10, %v7050_v29 }
 0xc4e   :  { %v2318_v17 = vadd.f32 %v2316_v13, %v6877_v33 }
 0xc50   :  { %v2322_v18 = vsel %vm234_vm0, %v2318_v17, 0.0 }
 0xcaa   :  { %v1435_v31 = vpop.xlane.xlu0 %1434 }
 0xcab   :  { %6077 = vrcp.f32 %v1435_v31 }
 0xcae   :  { %v1602_v32 = vpop.xlane.xlu0 %1601 }
 0xcaf   :  { %6079 = vrcp.f32 %v1602_v32 }
 0xcb2   :  { %v1439_v34 = vpop.permute.xlu0 %1438 }
 0xcb3   :  { %5664 = vmatpush3.msra.mxu1 %v1439_v34 }
 0xcb4   :  { %5673 = vmatprep.subr.mxu1 %v6517_v36 }
 0xcb5   :  { %v6078_v37 = vpop.eup %6077 }
 0xcb6   :  { %v1437_v38 = vmul.f32 %v6078_v37, %v6074_v24 }
 0xcb8   :  { %5666 = vmatmul.mubr.msk.f32.vlgmr.msra.gmra.mrb[14].mxu1 %vm380_vm2, %v1437_v38 }
 0xcb9   :  { %v6080_v42 = vpop.eup %6079  ;;  %5674 = vmatpush3.msra.mxu1 %v1606_v40  ;;  %5675 = vmatprep.mubr.msk.f32.mxu1 %vm6518_vm1, %v6517_v36 }
 0xcba   :  { %v1604_v43 = vmul.f32 %v6080_v42, %v6076_v26  ;;  %5683 = vmatprep.subr.mxu1 %v6517_v36 }
 0xcbc   :  { %5676 = vmatmul.mubr.msk.f32.vlgmr.msra.gmra.mrb[16].mxu1 %vm380_vm2, %v1604_v43 }
 0xcbd   :  { %5684 = vmatpush3.msra.mxu1 %v6950_v11  ;;  %5685 = vmatprep.mubr.msk.f32.mxu1 %vm6518_vm1, %v6517_v36  ;;  %v1828_v11 = vpop.permute.xlu1 %1827 }
 0xcbe   :  { %5693 = vmatprep.subr.mxu1 %v6517_v36 }
 0xd8b   :  { %v1510_v45 = vpop.f32.mrb[14].mxu1 }
 0xd8c   :  { %v5667_v47 = vpop.f32.mrb[15].mxu1  ;;  %5686 = vmatmul.mubr.msk.f32.vlgmr.msra.gmra.mrb[18].mxu1 %vm380_vm2, %v1510_v45 }
 0xd8d   :  { %5695 = vmatprep.mubr.msk.f32.mxu1 %vm6518_vm1, %v6517_v36 }
 0xd8f   :  { %v1677_v49 = vpop.f32.mrb[16].mxu1 }
 0xd90   :  { %v5677_v50 = vpop.f32.mrb[17].mxu1  ;;  %5681 = vmatmul.mubr.msk.f32.vlgmr.msra.gmra.mrb[16].mxu0 %vm380_vm2, %v1677_v49 }
 0xd91   :  { %5689 = vmatpush3.xpose.msk.msra.mxu0 %vm380_vm2, %v1830_v48  ;;  %5690 = vmatprep.mubr.msk.f32.mxu0 %vm6518_vm1, %v6517_v36 }
 0xd92   :  { %5698 = vmatprep.subr.mxu0 %v6517_v36 }
 0xd94   :  { %5691 = vmatmul.mubr.msk.f32.vlgmr.msra.gmra.mrb[18].mxu0 %vm380_vm2, %v1828_v11 }
 0xd95   :  { %5699 = vmatpush3.msra.mxu0 %v6990_v44  ;;  %5700 = vmatprep.mubr.msk.f32.mxu0 %vm6518_vm1, %v6517_v36 }
 0xd96   :  { %5708 = vmatprep.subr.mxu0 %v6517_v36 }
 0xe5f   :  { %v1823_v51 = vpop.f32.mrb[18].mxu1 }
 0xe60   :  { %v5687_v52 = vpop.f32.mrb[19].mxu1 }
 0xe63   :  { %v1750_v53 = vpop.f32.mrb[16].mxu0 }
 0xe64   :  { %v1824_v54 = vadd.f32 %v1823_v51, %v1750_v53  ;;  %v5682_v55 = vpop.f32.mrb[17].mxu0 }
 0xe67   :  { %v1901_v56 = vpop.f32.mrb[18].mxu0 }
 0xe68   :  { %v1905_v57 = vmul.f32 0.35355338, %v1901_v56  ;;  %v5692_v58 = vpop.f32.mrb[19].mxu0 }
 0xe69   :  { %v5350_v58 = vld [vmem:[#allocation14] ss:$0 sm:$0xff] }
 0xe6a   :  { %v1906_v59 = vadd.f32 %v7034_v7, %v1905_v57 }
 0xe6c   :  { %v1907_v41 = vsel %vm380_vm2, %v1906_v59, -inf }
 0xe6d   :  { %1908 = vmax.xlane.f32.xlu0 %v1907_v41 }
 0xe83   :  { %1918 = vrot.lane.b32.xlu0 %v6895_v39, %s6528_s1 }
 0xe87   :  { %2068 = vrot.lane.b32.xlu0 %v6895_v39, %s6527_s8 }
 0xefa   :  { %v1909_v44 = vpop.xlane.xlu0 %1908 }
 0xefb   :  { %v1910_v60 = vsub.f32 %v1906_v59, %v1909_v44  ;;  %v2364_v44 = vld [vmem:[%s7552_s11] sm:$0xff] }
 0xefd   :  { %v1911_v61 = vmul.f32 1.442695, %v1910_v60  ;;  %v2365_v60 = vld [vmem:[%s7552_s11 + $0x8] sm:$0xff] }
 0xefe   :  { %v1919_v62 = vpop.permute.xlu0 %1918 }
 0xeff   :  { %6081 = vpow2.f32 %v1911_v61  ;;  %5694 = vmatpush3.msra.mxu1 %v1919_v62  ;;  %v5946_v61 = vpack.c.bf16 %v2365_v60, %v2364_v44  ;;  %v2366_v62 = vld [vmem:[%s7552_s11 + $0x10] sm:$0xff] }
 0xf00   :  { %5703 = vmatprep.subr.mxu1 %v6517_v36 }
 0xf02   :  { %v2069_v3 = vpop.permute.xlu0 %2068 }
 0xf09   :  { %v6082_v63 = vpop.eup %6081 }
 0xf0a   :  { %v1913_v0 = vsel %vm380_vm2, %v6082_v63, 0.0 }
 0xf0b   :  { %1914 = vadd.xlane.f32.xlu1 %v1913_v0 }
 0xf1c   :  { %2070 = vrot.lane.b32.xlu1 %v6895_v39, %s6526_s16 }
 0xf98   :  { %v1915_v1 = vpop.xlane.xlu1 %1914 }
 0xf99   :  { %6083 = vrcp.f32 %v1915_v1 }
 0xf9c   :  { %v2071_v6 = vpop.permute.xlu1 %2070 }
 0xfa3   :  { %v6084_v2 = vpop.eup %6083 }
 0xfa4   :  { %v1917_v5 = vmul.f32 %v6084_v2, %v6082_v63  ;;  %v2367_v63 = vld [vmem:[%s7552_s11 + $0x18] sm:$0xff] }
 0xfa5   :  { %v5950_v0 = vpack.c.bf16 %v2367_v63, %v2366_v62 }
 0xfa6   :  { %5696 = vmatmul.mubr.msk.f32.vlgmr.msra.gmra.mrb[20].mxu1 %vm380_vm2, %v1917_v5 }
 0xfa7   :  { %5704 = vmatpush3.xpose.msk.msra.mxu1 %vm380_vm2, %v2071_v6  ;;  %5705 = vmatprep.mubr.msk.f32.mxu1 %vm6518_vm1, %v6517_v36 }
 0xfa8   :  { %5713 = vmatprep.subr.mxu1 %v6517_v36 }
 0xfaa   :  { %5706 = vmatmul.mubr.msk.f32.vlgmr.msra.gmra.mrb[22].mxu1 %vm380_vm2, %v2069_v3 }
 0xfab   :  { %5714 = vmatpush3.msra.mxu1 %v7027_v4  ;;  %5715 = vmatprep.mubr.msk.f32.mxu1 %vm6518_vm1, %v6517_v36 }
0x1079   :  { %v1990_v8 = vpop.f32.mrb[20].mxu1 }
0x107a   :  { %v5697_v9 = vpop.f32.mrb[21].mxu1  ;;  %5701 = vmatmul.mubr.msk.f32.vlgmr.msra.gmra.mrb[20].mxu0 %vm380_vm2, %v1990_v8 }
0x107b   :  { %5710 = vmatprep.mubr.msk.f32.mxu0 %vm6518_vm1, %v6517_v36 }
0x107d   :  { %v2142_v12 = vpop.f32.mrb[22].mxu1 }
0x107e   :  { %v2146_v14 = vmul.f32 0.35355338, %v2142_v12  ;;  %v5707_v15 = vpop.f32.mrb[23].mxu1  ;;  %v2475_v12 = vld [vmem:[%s7554_s13 + $0x8] sm:$0xff] }
0x107f   :  { %v2477_v15 = vld [vmem:[%s7554_s13 + $0x18] sm:$0xff] }
0x1080   :  { %v2147_v16 = vadd.f32 %v7034_v7, %v2146_v14  ;;  %v2476_v14 = vld [vmem:[%s7554_s13 + $0x10] sm:$0xff] }
0x1082   :  { %v2148_v4 = vsel %vm380_vm2, %v2147_v16, -inf }
0x1083   :  { %2149 = vmax.xlane.f32.xlu1 %v2148_v4  ;;  %v2478_v4 = vld [vmem:[%s7554_s13 + $0x20] sm:$0xff] }
0x1087   :  { %2323 = vadd.xlane.f32.xlu1 %v2322_v18 }
0x1110   :  { %v2150_v19 = vpop.xlane.xlu1 %2149 }
0x1111   :  { %v2151_v20 = vsub.f32 %v2147_v16, %v2150_v19  ;;  %v5958_v16 = vpack.c.bf16 %v2477_v15, %v2476_v14  ;;  %v2480_v19 = vld [vmem:[%s7554_s13 + $0x30] sm:$0xff] }
0x1113   :  { %v2152_v21 = vmul.f32 1.442695, %v2151_v20  ;;  %v2481_v20 = vld [vmem:[%s7554_s13 + $0x38] sm:$0xff] }
0x1114   :  { %v2324_v32 = vpop.xlane.xlu1 %2323 }
0x1115   :  { %6085 = vpow2.f32 %v2152_v21  ;;  %v2328_v34 = vmul.f32 0.03125, %v2324_v32  ;;  %v5966_v21 = vpack.c.bf16 %v2481_v20, %v2480_v19 }
0x1117   :  { %v2330_v40 = vsub.f32 %v2318_v17, %v2328_v34  ;;  %v2479_v17 = vld [vmem:[%s7554_s13 + $0x28] sm:$0xff] }
0x1118   :  { %v5962_v18 = vpack.c.bf16 %v2479_v17, %v2478_v4  ;;  %v5357_v4 = vld [vmem:[#allocation19] ss:$0 sm:$0xff] }
0x1119   :  { %v2332_v47 = vmul.f32 %v2330_v40, %v2330_v40 }
0x111b   :  { %v2334_v48 = vsel %vm234_vm0, %v2332_v47, 0.0 }
0x111f   :  { %v6086_v22 = vpop.eup %6085 }
0x1120   :  { %v2154_v23 = vsel %vm380_vm2, %v6086_v22, 0.0 }
0x1121   :  { %2155 = vadd.xlane.f32.xlu0 %v2154_v23 }
0x1137   :  { %2159 = vrot.lane.b32.xlu0 %v6895_v39, %s7578_s6 }
0x114d   :  { %v2063_v24 = vpop.f32.mrb[20].mxu0 }
0x114e   :  { %v2067_v25 = vadd.f32 %v2063_v24, %v1824_v54  ;;  %v5702_v26 = vpop.f32.mrb[21].mxu0 }
0x11ae   :  { %v2156_v27 = vpop.xlane.xlu0 %2155 }
0x11af   :  { %6087 = vrcp.f32 %v2156_v27 }
0x11b2   :  { %v2160_v33 = vpop.permute.xlu0 %2159 }
0x11b3   :  { %5709 = vmatpush3.msra.mxu0 %v2160_v33 }
0x11b4   :  { %5947 = vmatprep.subr.bf16.mxu0 %v5946_v61 }
0x11b9   :  { %v6088_v28 = vpop.eup %6087 }
0x11ba   :  { %v2158_v29 = vmul.f32 %v6088_v28, %v6086_v22  ;;  %v5351_v22 = vld [vmem:[#allocation16] ss:$0 sm:$0xff] }
0x11bc   :  { %5711 = vmatmul.mubr.msk.f32.vlgmr.msra.gmra.mrb[22].mxu0 %vm380_vm2, %v2158_v29 }
0x11bd   :  { %5949 = vmatpush3.bf16.msra.mxu0 %v5946_v61 }
0x11be   :  { %5951 = vmatprep.subr.bf16.mxu0 %v5950_v0 }
0x11c1   :  { %5953 = vmatpush3.bf16.msra.mxu0 %v5950_v0 }
0x128f   :  { %v2231_v30 = vpop.f32.mrb[22].mxu0 }
0x1290   :  { %v5712_v31 = vpop.f32.mrb[23].mxu0  ;;  %5716 = vmatmul.mubr.msk.f32.vlgmr.msra.gmra.mrb[24].mxu1 %vm380_vm2, %v2231_v30 }
0x1363   :  { %v2304_v37 = vpop.f32.mrb[24].mxu1 }
0x1364   :  { %v2308_v38 = vadd.f32 %v2304_v37, %v2067_v25  ;;  %v5717_v39 = vpop.f32.mrb[25].mxu1 }
0x1366   :  { %v2317_v42 = vadd.f32 %v5348_v10, %v2308_v38  ;;  %v2474_v10 = vld [vmem:[%s7554_s13] sm:$0xff] }
0x1367   :  { %v5954_v13 = vpack.c.bf16 %v2475_v12, %v2474_v10 }
0x1368   :  { %v2319_v43 = vadd.f32 %v2317_v42, %v6883_v35  ;;  %v5349_v35 = vld [vmem:[#allocation13] ss:$0 sm:$0xff] }
0x1369   :  { %5955 = vmatprep.subr.bf16.mxu1 %v5954_v13 }
0x136a   :  { %v2325_v45 = vsel %vm234_vm0, %v2319_v43, 0.0  ;;  %5957 = vmatpush3.bf16.msra.mxu1 %v5954_v13 }
0x136b   :  { %2326 = vadd.xlane.f32.xlu1 %v2325_v45  ;;  %5959 = vmatprep.subr.bf16.mxu1 %v5958_v16 }
0x136e   :  { %5961 = vmatpush3.bf16.msra.mxu1 %v5958_v16 }
0x136f   :  { %2335 = vadd.xlane.f32.xlu1 %v2334_v48  ;;  %5963 = vmatprep.subr.bf16.mxu1 %v5962_v18 }
0x1372   :  { %5965 = vmatpush3.bf16.msra.mxu1 %v5962_v18  ;;  %v5358_v18 = vld [vmem:[#allocation20] ss:$0 sm:$0xff] }
0x1373   :  { %5967 = vmatprep.subr.bf16.mxu1 %v5966_v21 }
0x1376   :  { %5969 = vmatpush3.bf16.msra.mxu1 %v5966_v21 }
0x1377   :  { %5764 = vmatprep.subr.mxu1 %v6517_v36 }
0x13f8   :  { %v2327_v49 = vpop.xlane.xlu1 %2326 }
0x13f9   :  { %v2329_v50 = vmul.f32 0.03125, %v2327_v49 }
0x13fb   :  { %v2331_v11 = vsub.f32 %v2319_v43, %v2329_v50  ;;  %v5354_v50 = vld [vmem:[#allocation17] ss:$0 sm:$0xff] }
0x13fc   :  { %v2336_v51 = vpop.xlane.xlu1 %2335 }
0x13fd   :  { %v2340_v52 = vmul.f32 0.03125, %v2336_v51  ;;  %v2333_v53 = vmul.f32 %v2331_v11, %v2331_v11 }
0x13ff   :  { %v2342_v54 = vadd.f32 1e-12, %v2340_v52  ;;  %v2337_v55 = vsel %vm234_vm0, %v2333_v53, 0.0 }
0x1400   :  { %2338 = vadd.xlane.f32.xlu1 %v2337_v55 }
0x1401   :  { %6089 = vrsqrt.f32 %v2342_v54 }
0x140b   :  { %v6090_v56 = vpop.eup %6089 }
0x140c   :  { %v2346_v57 = vmul.f32 %v6090_v56, %v2330_v40 }
0x140e   :  { %v2354_v59 = vmul.f32 %v5349_v35, %v2346_v57 }
0x1410   :  { %v7111_v41 = vadd.f32 %v5350_v58, %v2354_v59 }
0x1412   :  { %5726 = vmatprep.mubr.msk.f32.mxu0 %vm234_vm0, %v7111_v41 }
0x148d   :  { %v2339_v1 = vpop.xlane.xlu1 %2338 }
0x148e   :  { %v2341_v2 = vmul.f32 0.03125, %v2339_v1 }
0x1490   :  { %v2343_v5 = vadd.f32 1e-12, %v2341_v2  ;;  %v5360_v2 = vld [vmem:[%s7595_s27 + $0x28] sm:$0xff] }
0x1492   :  { %6091 = vrsqrt.f32 %v2343_v5 }
0x149c   :  { %v6092_v6 = vpop.eup %6091 }
0x149d   :  { %v2347_v3 = vmul.f32 %v6092_v6, %v2331_v11  ;;  %v5361_v6 = vld [vmem:[%s7595_s27 + $0x30] sm:$0xff] }
0x149f   :  { %v2355_v8 = vmul.f32 %v5349_v35, %v2347_v3  ;;  %v5362_v3 = vld [vmem:[%s7595_s27 + $0x38] sm:$0xff] }
0x14a1   :  { %v2363_v9 = vadd.f32 %v5350_v58, %v2355_v8  ;;  %v5974_v8 = vpack.c.bf16 %v5362_v3, %v5361_v6 }
0x14a3   :  { %5727 = vmatmul.mubr.msk.f32.vlgmr.msra.gmra.mrb[24].mxu0 %vm234_vm0, %v2363_v9 }
0x1576   :  { %v5728_v23 = vpop.f32.mrb[24].mxu0 }
0x1577   :  { %v2453_v24 = vadd.f32 %v5728_v23, %v5351_v22  ;;  %v2447_v25 = vpop.f32.mrb[25].mxu0 }
0x1578   :  { %v2448_v26 = vadd.f32 %v5351_v22, %v2447_v25  ;;  %v5363_v25 = vld [vmem:[#allocation10 + $0x1] ss:$0 sm:$0xff] }
0x1579   :  { %v2459_v27 = vmul.f32 0.044715, %v2453_v24  ;;  %v2457_v47 = vmul.f32 0.5, %v2453_v24 }
0x157a   :  { %v2458_v33 = vmul.f32 0.044715, %v2448_v26  ;;  %v2456_v43 = vmul.f32 0.5, %v2448_v26 }
0x157b   :  { %v2461_v28 = vmul.f32 %v2459_v27, %v2453_v24 }
0x157c   :  { %v2460_v29 = vmul.f32 %v2458_v33, %v2448_v26 }
0x157d   :  { %v2463_v30 = vmul.f32 %v2461_v28, %v2453_v24 }
0x157e   :  { %v2462_v31 = vmul.f32 %v2460_v29, %v2448_v26 }
0x157f   :  { %v2465_v32 = vadd.f32 %v2463_v30, %v2453_v24 }
0x1580   :  { %v2464_v34 = vadd.f32 %v2462_v31, %v2448_v26 }
0x1581   :  { %v2467_v37 = vmul.f32 0.7978846, %v2465_v32 }
0x1582   :  { %v2466_v38 = vmul.f32 0.7978846, %v2464_v34 }
0x1583   :  { %6093 = vtanh.f32 %v2467_v37 }
0x1584   :  { %6095 = vtanh.f32 %v2466_v38 }
0x158d   :  { %v6094_v39 = vpop.eup %6093 }
0x158e   :  { %v6096_v40 = vpop.eup %6095  ;;  %v2471_v42 = vadd.f32 1.0, %v6094_v39 }
0x158f   :  { %v2470_v45 = vadd.f32 1.0, %v6096_v40 }
0x1590   :  { %v2473_v49 = vmul.f32 %v2471_v42, %v2457_v47 }
0x1591   :  { %v2472_v48 = vmul.f32 %v2470_v45, %v2456_v43 }
0x1593   :  { %5745 = vmatprep.mubr.msk.f32.mxu1 %vm2489_vm3, %v2472_v48 }
0x1594   :  { %5746 = vmatmul.mubr.msk.f32.vlgmr.msra.gmra.mrb[26].mxu1 %vm2489_vm3, %v2473_v49 }
0x1595   :  { %5766 = vmatprep.mubr.msk.f32.mxu1 %vm6518_vm1, %v6517_v36 }
0x1667   :  { %v5747_v11 = vpop.f32.mrb[26].mxu1 }
0x1668   :  { %v2568_v51 = vadd.f32 %v5747_v11, %v5354_v50  ;;  %v2562_v52 = vpop.f32.mrb[27].mxu1 }
0x1669   :  { %v2563_v53 = vadd.f32 %v5354_v50, %v2562_v52 }
0x166a   :  { %v2572_v54 = vadd.f32 %v2568_v51, %v2363_v9 }
0x166b   :  { %v2571_v55 = vadd.f32 %v2563_v53, %v7111_v41  ;;  %v5359_v41 = vld [vmem:[%s7595_s27 + $0x20] sm:$0xff] }
0x166c   :  { %v2578_v56 = vsel %vm234_vm0, %v2572_v54, 0.0  ;;  %v5970_v5 = vpack.c.bf16 %v5360_v2, %v5359_v41 }
0x166d   :  { %2579 = vadd.xlane.f32.xlu0 %v2578_v56  ;;  %v2575_v35 = vsel %vm234_vm0, %v2571_v55, 0.0  ;;  %v7227_v56 = vld [vmem:[%s7596_s29 + $0x28] sm:$0xff] }
0x166e   :  { %2576 = vadd.xlane.f32.xlu1 %v2575_v35  ;;  %5971 = vmatprep.subr.bf16.mxu0 %v5970_v5 }
0x166f   :  { %5973 = vmatpush3.bf16.msra.mxu0 %v5970_v5 }
0x1670   :  { %5975 = vmatprep.subr.bf16.mxu0 %v5974_v8 }
0x1673   :  { %5977 = vmatpush3.bf16.msra.mxu0 %v5974_v8 }
0x1674   :  { %5759 = vmatprep.subr.mxu0 %v6517_v36 }
0x16fa   :  { %v2580_v57 = vpop.xlane.xlu0 %2579 }
0x16fb   :  { %v2582_v58 = vmul.f32 0.03125, %v2580_v57  ;;  %v2577_v59 = vpop.xlane.xlu1 %2576 }
0x16fc   :  { %v2581_v44 = vmul.f32 0.03125, %v2577_v59 }
0x16fd   :  { %v2584_v60 = vsub.f32 %v2572_v54, %v2582_v58 }
0x16fe   :  { %v2583_v61 = vsub.f32 %v2571_v55, %v2581_v44 }
0x16ff   :  { %v2586_v0 = vmul.f32 %v2584_v60, %v2584_v60 }
0x1700   :  { %v2585_v62 = vmul.f32 %v2583_v61, %v2583_v61 }
0x1701   :  { %v2590_v1 = vsel %vm234_vm0, %v2586_v0, 0.0 }
0x1702   :  { %v2587_v63 = vsel %vm234_vm0, %v2585_v62, 0.0 }
0x1703   :  { %2588 = vadd.xlane.f32.xlu1 %v2587_v63  ;;  %v7242_v63 = vld [vmem:[%s7596_s29 + $0x20] sm:$0xff] }
0x1707   :  { %2591 = vadd.xlane.f32.xlu1 %v2590_v1 }
0x1790   :  { %v2589_v9 = vpop.xlane.xlu1 %2588 }
0x1791   :  { %v2593_v10 = vmul.f32 0.03125, %v2589_v9 }
0x1793   :  { %v2595_v12 = vadd.f32 1e-12, %v2593_v10 }
0x1794   :  { %v2592_v13 = vpop.xlane.xlu1 %2591 }
0x1795   :  { %6097 = vrsqrt.f32 %v2595_v12  ;;  %v2594_v14 = vmul.f32 0.03125, %v2592_v13 }
0x1797   :  { %v2596_v15 = vadd.f32 1e-12, %v2594_v14 }
0x1799   :  { %6099 = vrsqrt.f32 %v2596_v15 }
0x179f   :  { %v6098_v16 = vpop.eup %6097 }
0x17a0   :  { %v2599_v17 = vmul.f32 %v6098_v16, %v2583_v61  ;;  %v6151_v16 = vld [vmem:[#allocation5] ss:$0 sm:$0xff] }
0x17a2   :  { %v2607_v19 = vmul.f32 %v5357_v4, %v2599_v17 }
0x17a3   :  { %v6100_v20 = vpop.eup %6099 }
0x17a4   :  { %v2600_v21 = vmul.f32 %v6100_v20, %v2584_v60  ;;  %v7175_v22 = vadd.f32 %v5358_v18, %v2607_v19 }
0x17a6   :  { %v2608_v23 = vmul.f32 %v5357_v4, %v2600_v21  ;;  %2618 = vst.msk [vmem:[#allocation22 + $0x10] sm:$0xff] %vm234_vm0, %v7175_v22  ;;  %5756 = vmatprep.mubr.msk.f32.mxu0 %vm234_vm0, %v7175_v22 }
0x17a8   :  { %v7181_v24 = vadd.f32 %v5358_v18, %v2608_v23 }
0x17aa   :  { %2619 = vst.msk [vmem:[#allocation22 + $0x18] sm:$0xff] %vm234_vm0, %v7181_v24  ;;  %5757 = vmatmul.mubr.msk.f32.vlgmr.msra.gmra.mrb[26].mxu0 %vm234_vm0, %v7181_v24 }
0x17ab   :  { %5761 = vmatprep.mubr.msk.f32.mxu0 %vm6518_vm1, %v6517_v36 }
0x187d   :  { %v5758_v26 = vpop.f32.mrb[26].mxu0 }
0x187e   :  { %v7189_v27 = vadd.f32 %v5758_v26, %v5363_v25  ;;  %v2705_v33 = vpop.f32.mrb[27].mxu0 }
0x187f   :  { %v7191_v28 = vadd.f32 %v5363_v25, %v2705_v33 }
0x1881   :  { %2890 = vrot.lane.b32.xlu0 %v7191_v28, %s6521_s2  ;;  %2721 = vrot.lane.b32.xlu1 %v7191_v28, %s6520_s30 }
0x1885   :  { %2892 = vrot.lane.b32.xlu1 %v7191_v28, %s6519_s0 }
0x18f3   :  { %v2722_v29 = vpop.permute.xlu1 %2721  ;;  %v2891_v31 = vpop.permute.xlu0 %2890 }
0x18f4   :  { %5760 = vmatpush3.xpose.msk.msra.mxu0 %vm380_vm2, %v2722_v29 }
0x18f5   :  { %5769 = vmatprep.subr.mxu0 %v6517_v36 }
0x18f7   :  { %5762 = vmatmul.mubr.msk.f32.vlgmr.msra.gmra.mrb[28].mxu0 %vm380_vm2, %v7191_v28  ;;  %v2893_v30 = vpop.permute.xlu1 %2892 }
0x18f8   :  { %5770 = vmatpush3.xpose.msk.msra.mxu0 %vm380_vm2, %v2893_v30  ;;  %5771 = vmatprep.mubr.msk.f32.mxu0 %vm6518_vm1, %v6517_v36 }
0x18f9   :  { %5779 = vmatprep.subr.mxu0 %v6517_v36 }
0x18fb   :  { %5772 = vmatmul.mubr.msk.f32.vlgmr.msra.gmra.mrb[30].mxu0 %vm380_vm2, %v2891_v31 }
0x18fc   :  { %5781 = vmatprep.mubr.msk.f32.mxu0 %vm6518_vm1, %v6517_v36  ;;  %5780 = vmatpush3.msra.mxu0 %v7227_v56 }
0x18fd   :  { %5789 = vmatprep.subr.mxu0 %v6517_v36 }
0x19ca   :  { %v2793_v32 = vpop.f32.mrb[28].mxu0 }
0x19cb   :  { %v2797_v34 = vmul.f32 0.35355338, %v2793_v32  ;;  %v5763_v37 = vpop.f32.mrb[29].mxu0  ;;  %v7277_v32 = vld [vmem:[%s7596_s29 + $0x30] sm:$0xff] }
0x19cd   :  { %v2802_v38 = vadd.f32 %v6916_v46, %v2797_v34 }
0x19ce   :  { %v2964_v39 = vpop.f32.mrb[30].mxu0 }
0x19cf   :  { %v2968_v40 = vmul.f32 0.35355338, %v2964_v39  ;;  %v5773_v42 = vpop.f32.mrb[31].mxu0  ;;  %v2803_v43 = vsel %vm380_vm2, %v2802_v38, -inf }
0x19d0   :  { %2804 = vmax.xlane.f32.xlu1 %v2803_v43 }
0x19d1   :  { %v2969_v45 = vadd.f32 %v6916_v46, %v2968_v40 }
0x19d3   :  { %v2970_v47 = vsel %vm380_vm2, %v2969_v45, -inf }
0x19d4   :  { %2971 = vmax.xlane.f32.xlu0 %v2970_v47 }
0x19ea   :  { %2981 = vrot.lane.b32.xlu0 %v7191_v28, %s6525_s25 }
0x1a5d   :  { %v2805_v48 = vpop.xlane.xlu1 %2804 }
0x1a5e   :  { %v2806_v49 = vsub.f32 %v2802_v38, %v2805_v48 }
0x1a60   :  { %v2807_v50 = vmul.f32 1.442695, %v2806_v49 }
0x1a61   :  { %v2972_v11 = vpop.xlane.xlu0 %2971 }
0x1a62   :  { %6101 = vpow2.f32 %v2807_v50  ;;  %v2973_v51 = vsub.f32 %v2969_v45, %v2972_v11 }
0x1a64   :  { %v2974_v52 = vmul.f32 1.442695, %v2973_v51 }
0x1a65   :  { %v2982_v60 = vpop.permute.xlu0 %2981 }
0x1a66   :  { %6103 = vpow2.f32 %v2974_v52 }
0x1a6c   :  { %v6102_v53 = vpop.eup %6101 }
0x1a6d   :  { %v2809_v54 = vsel %vm380_vm2, %v6102_v53, 0.0 }
0x1a6e   :  { %2810 = vadd.xlane.f32.xlu1 %v2809_v54 }
0x1a70   :  { %v6104_v55 = vpop.eup %6103 }
0x1a71   :  { %v2976_v46 = vsel %vm380_vm2, %v6104_v55, 0.0 }
0x1a72   :  { %2977 = vadd.xlane.f32.xlu1 %v2976_v46 }
0x1a83   :  { %2814 = vrot.lane.b32.xlu1 %v7191_v28, %s6522_s9 }
0x1a87   :  { %3205 = vrot.lane.b32.xlu1 %v7191_v28, %s6523_s10 }
0x1a8b   :  { %3203 = vrot.lane.b32.xlu1 %v7191_v28, %s6524_s7 }
0x1afb   :  { %v2811_v35 = vpop.xlane.xlu1 %2810 }
0x1afc   :  { %6105 = vrcp.f32 %v2811_v35 }
0x1aff   :  { %v2978_v57 = vpop.xlane.xlu1 %2977 }
0x1b00   :  { %6107 = vrcp.f32 %v2978_v57 }
0x1b03   :  { %v2815_v58 = vpop.permute.xlu1 %2814 }
0x1b04   :  { %5765 = vmatpush3.msra.mxu1 %v2815_v58  ;;  %v7314_v58 = vld [vmem:[%s7596_s29 + $0x38] sm:$0xff] }
0x1b05   :  { %5774 = vmatprep.subr.mxu1 %v6517_v36 }
0x1b06   :  { %v6106_v59 = vpop.eup %6105 }
0x1b07   :  { %v2813_v44 = vmul.f32 %v6106_v59, %v6102_v53  ;;  %v3206_v41 = vpop.permute.xlu1 %3205 }
0x1b09   :  { %5767 = vmatmul.mubr.msk.f32.vlgmr.msra.gmra.mrb[28].mxu1 %vm380_vm2, %v2813_v44 }
0x1b0a   :  { %v6108_v61 = vpop.eup %6107  ;;  %5775 = vmatpush3.msra.mxu1 %v2982_v60  ;;  %5776 = vmatprep.mubr.msk.f32.mxu1 %vm6518_vm1, %v6517_v36 }
0x1b0b   :  { %v2980_v62 = vmul.f32 %v6108_v61, %v6104_v55  ;;  %5784 = vmatprep.subr.mxu1 %v6517_v36  ;;  %v3204_v6 = vpop.permute.xlu1 %3203 }
0x1b0d   :  { %5777 = vmatmul.mubr.msk.f32.vlgmr.msra.gmra.mrb[30].mxu1 %vm380_vm2, %v2980_v62 }
0x1b0e   :  { %5786 = vmatprep.mubr.msk.f32.mxu1 %vm6518_vm1, %v6517_v36  ;;  %5785 = vmatpush3.msra.mxu1 %v7242_v63 }
0x1b0f   :  { %5794 = vmatprep.subr.mxu1 %v6517_v36 }
0x1bdc   :  { %v2886_v0 = vpop.f32.mrb[28].mxu1 }
0x1bdd   :  { %v5768_v1 = vpop.f32.mrb[29].mxu1  ;;  %5787 = vmatmul.mubr.msk.f32.vlgmr.msra.gmra.mrb[32].mxu1 %vm380_vm2, %v2886_v0 }
0x1bde   :  { %5796 = vmatprep.mubr.msk.f32.mxu1 %vm6518_vm1, %v6517_v36 }
0x1be0   :  { %v3053_v2 = vpop.f32.mrb[30].mxu1 }
0x1be1   :  { %v5778_v5 = vpop.f32.mrb[31].mxu1  ;;  %5782 = vmatmul.mubr.msk.f32.vlgmr.msra.gmra.mrb[32].mxu0 %vm380_vm2, %v3053_v2 }
0x1be2   :  { %5790 = vmatpush3.xpose.msk.msra.mxu0 %vm380_vm2, %v3206_v41  ;;  %5791 = vmatprep.mubr.msk.f32.mxu0 %vm6518_vm1, %v6517_v36 }
0x1be3   :  { %5799 = vmatprep.subr.mxu0 %v6517_v36 }
0x1be5   :  { %5792 = vmatmul.mubr.msk.f32.vlgmr.msra.gmra.mrb[34].mxu0 %vm380_vm2, %v3204_v6 }
0x1be6   :  { %5801 = vmatprep.mubr.msk.f32.mxu0 %vm6518_vm1, %v6517_v36  ;;  %5800 = vmatpush3.msra.mxu0 %v7277_v32 }
0x1be7   :  { %5809 = vmatprep.subr.mxu0 %v6517_v36 }
0x1cb0   :  { %v3199_v3 = vpop.f32.mrb[32].mxu1 }
0x1cb1   :  { %v5788_v8 = vpop.f32.mrb[33].mxu1 }
0x1cb4   :  { %v3126_v9 = vpop.f32.mrb[32].mxu0 }
0x1cb5   :  { %v3200_v10 = vadd.f32 %v3199_v3, %v3126_v9  ;;  %v5783_v12 = vpop.f32.mrb[33].mxu0 }
0x1cb8   :  { %v3277_v13 = vpop.f32.mrb[34].mxu0 }
0x1cb9   :  { %v3281_v14 = vmul.f32 0.35355338, %v3277_v13  ;;  %v5793_v15 = vpop.f32.mrb[35].mxu0 }
0x1cbb   :  { %v3282_v4 = vadd.f32 %v6151_v16, %v3281_v14 }
0x1cbd   :  { %v3283_v17 = vsel %vm380_vm2, %v3282_v4, -inf }
0x1cbe   :  { %3284 = vmax.xlane.f32.xlu1 %v3283_v17 }
0x1ccf   :  { %3294 = vrot.lane.b32.xlu1 %v7191_v28, %s6528_s1 }
0x1cd3   :  { %3444 = vrot.lane.b32.xlu1 %v7191_v28, %s6527_s8 }
0x1d4b   :  { %v3285_v18 = vpop.xlane.xlu1 %3284 }
0x1d4c   :  { %v3286_v19 = vsub.f32 %v3282_v4, %v3285_v18 }
0x1d4e   :  { %v3287_v20 = vmul.f32 1.442695, %v3286_v19 }
0x1d4f   :  { %v3295_v21 = vpop.permute.xlu1 %3294 }
0x1d50   :  { %6109 = vpow2.f32 %v3287_v20  ;;  %5795 = vmatpush3.msra.mxu1 %v3295_v21 }
0x1d51   :  { %5804 = vmatprep.subr.mxu1 %v6517_v36 }
0x1d53   :  { %v3445_v31 = vpop.permute.xlu1 %3444 }
0x1d5a   :  { %v6110_v23 = vpop.eup %6109 }
0x1d5b   :  { %v3289_v25 = vsel %vm380_vm2, %v6110_v23, 0.0 }
0x1d5c   :  { %3290 = vadd.xlane.f32.xlu0 %v3289_v25 }
0x1d72   :  { %3446 = vrot.lane.b32.xlu0 %v7191_v28, %s6526_s16 }
0x1de9   :  { %v3291_v26 = vpop.xlane.xlu0 %3290 }
0x1dea   :  { %6111 = vrcp.f32 %v3291_v26 }
0x1ded   :  { %v3447_v30 = vpop.permute.xlu0 %3446 }
0x1df4   :  { %v6112_v33 = vpop.eup %6111 }
0x1df5   :  { %v3293_v29 = vmul.f32 %v6112_v33, %v6110_v23 }
0x1df7   :  { %5797 = vmatmul.mubr.msk.f32.vlgmr.msra.gmra.mrb[34].mxu1 %vm380_vm2, %v3293_v29 }
0x1df8   :  { %5805 = vmatpush3.xpose.msk.msra.mxu1 %vm380_vm2, %v3447_v30  ;;  %5806 = vmatprep.mubr.msk.f32.mxu1 %vm6518_vm1, %v6517_v36 }
0x1df9   :  { %5814 = vmatprep.subr.mxu1 %v6517_v36 }
0x1dfb   :  { %5807 = vmatmul.mubr.msk.f32.vlgmr.msra.gmra.mrb[36].mxu1 %vm380_vm2, %v3445_v31 }
0x1dfc   :  { %5816 = vmatprep.mubr.msk.f32.mxu1 %vm6518_vm1, %v6517_v36  ;;  %5815 = vmatpush3.msra.mxu1 %v7314_v58 }
0x1dfd   :  { %5824 = vmatprep.subr.mxu1 %v6517_v36 }
0x1eca   :  { %v3366_v34 = vpop.f32.mrb[34].mxu1 }
0x1ecb   :  { %v5798_v37 = vpop.f32.mrb[35].mxu1  ;;  %5802 = vmatmul.mubr.msk.f32.vlgmr.msra.gmra.mrb[36].mxu0 %vm380_vm2, %v3366_v34 }
0x1ecc   :  { %5811 = vmatprep.mubr.msk.f32.mxu0 %vm6518_vm1, %v6517_v36 }
0x1ece   :  { %v3518_v38 = vpop.f32.mrb[36].mxu1 }
0x1ecf   :  { %v3522_v39 = vmul.f32 0.35355338, %v3518_v38  ;;  %v5808_v40 = vpop.f32.mrb[37].mxu1 }
0x1ed1   :  { %v3523_v42 = vadd.f32 %v6151_v16, %v3522_v39 }
0x1ed3   :  { %v3524_v43 = vsel %vm380_vm2, %v3523_v42, -inf }
0x1ed4   :  { %3525 = vmax.xlane.f32.xlu1 %v3524_v43 }
0x1ee5   :  { %3687 = vrot.lane.b32.xlu1 %v7189_v27, %s6520_s30 }
0x1ee9   :  { %3858 = vrot.lane.b32.xlu1 %v7189_v27, %s6519_s0  ;;  %s6533_s0 = smov [#allocation22]  }
0x1eea   :  { %s5264_s30 = sshll.u32 %s6533_s0, 4  ;;  %s7495_s30 = int_to_ptr.vmem [resolvable:$true] %s5264_s30 }
0x1f61   :  { %v3526_v45 = vpop.xlane.xlu1 %3525 }
0x1f62   :  { %v3527_v47 = vsub.f32 %v3523_v42, %v3526_v45 }
0x1f64   :  { %v3528_v48 = vmul.f32 1.442695, %v3527_v47 }
0x1f65   :  { %v3688_v46 = vpop.permute.xlu1 %3687 }
0x1f66   :  { %6113 = vpow2.f32 %v3528_v48 }
0x1f70   :  { %v6114_v49 = vpop.eup %6113 }
0x1f71   :  { %v3530_v50 = vsel %vm380_vm2, %v6114_v49, 0.0 }
0x1f72   :  { %3531 = vadd.xlane.f32.xlu0 %v3530_v50  ;;  %v6152_v50 = vld [vmem:[#allocation5 + $0x1] ss:$0 sm:$0xff] }
0x1f88   :  { %3535 = vrot.lane.b32.xlu0 %v7191_v28, %s7597_s12  ;;  %v3859_v28 = vpop.permute.xlu1 %3858 }
0x1f8c   :  { %3856 = vrot.lane.b32.xlu0 %v7189_v27, %s6521_s2 }
0x1f9e   :  { %v3439_v11 = vpop.f32.mrb[36].mxu0 }
0x1f9f   :  { %v3443_v51 = vadd.f32 %v3439_v11, %v3200_v10  ;;  %v5803_v52 = vpop.f32.mrb[37].mxu0 }
0x1fff   :  { %v3532_v53 = vpop.xlane.xlu0 %3531 }
0x2000   :  { %6115 = vrcp.f32 %v3532_v53 }
0x2003   :  { %v3536_v54 = vpop.permute.xlu0 %3535 }
0x2004   :  { %5810 = vmatpush3.msra.mxu0 %v3536_v54 }
0x2005   :  { %5819 = vmatprep.subr.mxu0 %v6517_v36 }
0x2007   :  { %v3857_v57 = vpop.permute.xlu0 %3856 }
0x200a   :  { %v6116_v55 = vpop.eup %6115 }
0x200b   :  { %v3534_v35 = vmul.f32 %v6116_v55, %v6114_v49 }
0x200d   :  { %5812 = vmatmul.mubr.msk.f32.vlgmr.msra.gmra.mrb[38].mxu0 %vm380_vm2, %v3534_v35 }
0x200e   :  { %5820 = vmatpush3.xpose.msk.msra.mxu0 %vm380_vm2, %v3688_v46  ;;  %5821 = vmatprep.mubr.msk.f32.mxu0 %vm6518_vm1, %v6517_v36 }
0x200f   :  { %5829 = vmatprep.subr.mxu0 %v6517_v36 }
0x2011   :  { %5822 = vmatmul.mubr.msk.f32.vlgmr.msra.gmra.mrb[40].mxu0 %vm380_vm2, %v7189_v27 }
0x2012   :  { %5830 = vmatpush3.xpose.msk.msra.mxu0 %vm380_vm2, %v3859_v28  ;;  %5831 = vmatprep.mubr.msk.f32.mxu0 %vm6518_vm1, %v6517_v36 }
0x2013   :  { %5839 = vmatprep.subr.mxu0 %v6517_v36 }
0x2015   :  { %5832 = vmatmul.mubr.msk.f32.vlgmr.msra.gmra.mrb[42].mxu0 %vm380_vm2, %v3857_v57 }
0x2016   :  { %5840 = vmatpush3.msra.mxu0 %v7227_v56  ;;  %5841 = vmatprep.mubr.msk.f32.mxu0 %vm6518_vm1, %v6517_v36 }
0x2017   :  { %5849 = vmatprep.subr.mxu0 %v6517_v36 }
0x20e0   :  { %v3607_v59 = vpop.f32.mrb[38].mxu0 }
0x20e1   :  { %v5813_v44 = vpop.f32.mrb[39].mxu0  ;;  %5817 = vmatmul.mubr.msk.f32.vlgmr.msra.gmra.mrb[38].mxu1 %vm380_vm2, %v3607_v59 }
0x20e2   :  { %5826 = vmatprep.mubr.msk.f32.mxu1 %vm6518_vm1, %v6517_v36 }
0x20e4   :  { %v3759_v56 = vpop.f32.mrb[40].mxu0 }
0x20e5   :  { %v3763_v60 = vmul.f32 0.35355338, %v3759_v56  ;;  %v5823_v61 = vpop.f32.mrb[41].mxu0 }
0x20e7   :  { %v3768_v62 = vadd.f32 %v7034_v7, %v3763_v60 }
0x20e8   :  { %v3930_v0 = vpop.f32.mrb[42].mxu0 }
0x20e9   :  { %v3934_v1 = vmul.f32 0.35355338, %v3930_v0  ;;  %v5833_v41 = vpop.f32.mrb[43].mxu0  ;;  %v3769_v2 = vsel %vm380_vm2, %v3768_v62, -inf }
0x20ea   :  { %3770 = vmax.xlane.f32.xlu1 %v3769_v2 }
0x20eb   :  { %v3935_v5 = vadd.f32 %v7034_v7, %v3934_v1 }
0x20ed   :  { %v3936_v6 = vsel %vm380_vm2, %v3935_v5, -inf }
0x20ee   :  { %3937 = vmax.xlane.f32.xlu0 %v3936_v6 }
0x2177   :  { %v3771_v3 = vpop.xlane.xlu1 %3770 }
0x2178   :  { %v3772_v8 = vsub.f32 %v3768_v62, %v3771_v3  ;;  %v5404_v3 = vld [vmem:[#allocation11 + $0x1] ss:$0 sm:$0xff] }
0x217a   :  { %v3773_v9 = vmul.f32 1.442695, %v3772_v8 }
0x217b   :  { %v3938_v10 = vpop.xlane.xlu0 %3937 }
0x217c   :  { %6117 = vpow2.f32 %v3773_v9  ;;  %v3939_v12 = vsub.f32 %v3935_v5, %v3938_v10 }
0x217e   :  { %v3940_v13 = vmul.f32 1.442695, %v3939_v12 }
0x2180   :  { %6119 = vpow2.f32 %v3940_v13 }
0x2186   :  { %v6118_v14 = vpop.eup %6117 }
0x2187   :  { %v3775_v15 = vsel %vm380_vm2, %v6118_v14, 0.0 }
0x2188   :  { %3776 = vadd.xlane.f32.xlu0 %v3775_v15 }
0x218a   :  { %v6120_v16 = vpop.eup %6119 }
0x218b   :  { %v3942_v4 = vsel %vm380_vm2, %v6120_v16, 0.0 }
0x218c   :  { %3943 = vadd.xlane.f32.xlu1 %v3942_v4 }
0x219d   :  { %3947 = vrot.lane.b32.xlu1 %v7189_v27, %s6525_s25 }
0x219e   :  { %3780 = vrot.lane.b32.xlu0 %v7189_v27, %s6522_s9 }
0x21a1   :  { %4171 = vrot.lane.b32.xlu1 %v7189_v27, %s6523_s10 }
0x21a2   :  { %4169 = vrot.lane.b32.xlu0 %v7189_v27, %s6524_s7 }
0x21b4   :  { %v3680_v7 = vpop.f32.mrb[38].mxu1 }
0x21b5   :  { %v7335_v17 = vadd.f32 %v3680_v7, %v3443_v51  ;;  %v5818_v18 = vpop.f32.mrb[39].mxu1 }
0x21b7   :  { %v4659_v8 = vadd.f32 %v5404_v3, %v7335_v17 }
0x21b9   :  { %v4661_v12 = vadd.f32 %v4659_v8, %v7175_v22  ;;  %v5411_v8 = vld [vmem:[#allocation16 + $0x1] ss:$0 sm:$0xff] }
0x21bb   :  { %v4667_v13 = vsel %vm234_vm0, %v4661_v12, 0.0 }
0x2215   :  { %v3777_v19 = vpop.xlane.xlu0 %3776 }
0x2216   :  { %6121 = vrcp.f32 %v3777_v19 }
0x2219   :  { %v3944_v20 = vpop.xlane.xlu1 %3943  ;;  %v3781_v21 = vpop.permute.xlu0 %3780 }
0x221a   :  { %6123 = vrcp.f32 %v3944_v20  ;;  %5825 = vmatpush3.msra.mxu1 %v3781_v21 }
0x221b   :  { %5834 = vmatprep.subr.mxu1 %v6517_v36 }
0x221d   :  { %v3948_v26 = vpop.permute.xlu1 %3947 }
0x2220   :  { %v6122_v23 = vpop.eup %6121 }
0x2221   :  { %v3779_v25 = vmul.f32 %v6122_v23, %v6118_v14  ;;  %v4172_v37 = vpop.permute.xlu1 %4171 }
0x2223   :  { %5827 = vmatmul.mubr.msk.f32.vlgmr.msra.gmra.mrb[40].mxu1 %vm380_vm2, %v3779_v25 }
0x2224   :  { %v6124_v33 = vpop.eup %6123  ;;  %5835 = vmatpush3.msra.mxu1 %v3948_v26  ;;  %5836 = vmatprep.mubr.msk.f32.mxu1 %vm6518_vm1, %v6517_v36 }
0x2225   :  { %v3946_v29 = vmul.f32 %v6124_v33, %v6120_v16  ;;  %5844 = vmatprep.subr.mxu1 %v6517_v36 }
0x2227   :  { %5837 = vmatmul.mubr.msk.f32.vlgmr.msra.gmra.mrb[42].mxu1 %vm380_vm2, %v3946_v29 }
0x2228   :  { %5845 = vmatpush3.msra.mxu1 %v7242_v63  ;;  %5846 = vmatprep.mubr.msk.f32.mxu1 %vm6518_vm1, %v6517_v36  ;;  %v4170_v63 = vpop.permute.xlu0 %4169 }
0x2229   :  { %5854 = vmatprep.subr.mxu1 %v6517_v36 }
0x22f6   :  { %v3852_v30 = vpop.f32.mrb[40].mxu1 }
0x22f7   :  { %v5828_v31 = vpop.f32.mrb[41].mxu1  ;;  %5847 = vmatmul.mubr.msk.f32.vlgmr.msra.gmra.mrb[44].mxu1 %vm380_vm2, %v3852_v30 }
0x22f8   :  { %5856 = vmatprep.mubr.msk.f32.mxu1 %vm6518_vm1, %v6517_v36 }
0x22fa   :  { %v4019_v34 = vpop.f32.mrb[42].mxu1 }
0x22fb   :  { %v5838_v38 = vpop.f32.mrb[43].mxu1  ;;  %5842 = vmatmul.mubr.msk.f32.vlgmr.msra.gmra.mrb[44].mxu0 %vm380_vm2, %v4019_v34 }
0x22fc   :  { %5850 = vmatpush3.xpose.msk.msra.mxu0 %vm380_vm2, %v4172_v37  ;;  %5851 = vmatprep.mubr.msk.f32.mxu0 %vm6518_vm1, %v6517_v36 }
0x22fd   :  { %5859 = vmatprep.subr.mxu0 %v6517_v36 }
0x22ff   :  { %5852 = vmatmul.mubr.msk.f32.vlgmr.msra.gmra.mrb[46].mxu0 %vm380_vm2, %v4170_v63 }
0x2300   :  { %5860 = vmatpush3.msra.mxu0 %v7277_v32  ;;  %5861 = vmatprep.mubr.msk.f32.mxu0 %vm6518_vm1, %v6517_v36 }
0x2301   :  { %5869 = vmatprep.subr.mxu0 %v6517_v36 }
0x23ca   :  { %v4165_v39 = vpop.f32.mrb[44].mxu1 }
0x23cb   :  { %v5848_v40 = vpop.f32.mrb[45].mxu1 }
0x23ce   :  { %v4092_v42 = vpop.f32.mrb[44].mxu0 }
0x23cf   :  { %v4166_v43 = vadd.f32 %v4165_v39, %v4092_v42  ;;  %v5843_v45 = vpop.f32.mrb[45].mxu0 }
0x23d2   :  { %v4243_v47 = vpop.f32.mrb[46].mxu0 }
0x23d3   :  { %v4247_v48 = vmul.f32 0.35355338, %v4243_v47  ;;  %v5853_v49 = vpop.f32.mrb[47].mxu0 }
0x23d5   :  { %v4248_v11 = vadd.f32 %v6152_v50, %v4247_v48  ;;  %v5406_v48 = vld [vmem:[#allocation14 + $0x1] ss:$0 sm:$0xff] }
0x23d7   :  { %v4249_v51 = vsel %vm380_vm2, %v4248_v11, -inf }
0x23d8   :  { %4250 = vmax.xlane.f32.xlu1 %v4249_v51  ;;  %v5408_v51 = vld [vmem:[%s7552_s11 + $0x28] sm:$0xff] }
0x23e9   :  { %4412 = vrot.lane.b32.xlu1 %v7189_v27, %s6526_s16 }
0x23ed   :  { %4410 = vrot.lane.b32.xlu1 %v7189_v27, %s6527_s8 }
0x2465   :  { %v4251_v32 = vpop.xlane.xlu1 %4250 }
0x2466   :  { %v4252_v52 = vsub.f32 %v4248_v11, %v4251_v32  ;;  %v5407_v11 = vld [vmem:[%s7552_s11 + $0x20] sm:$0xff] }
0x2467   :  { %v5978_v32 = vpack.c.bf16 %v5408_v51, %v5407_v11 }
0x2468   :  { %v4253_v53 = vmul.f32 1.442695, %v4252_v52  ;;  %v5409_v52 = vld [vmem:[%s7552_s11 + $0x30] sm:$0xff] }
0x2469   :  { %v4413_v57 = vpop.permute.xlu1 %4412 }
0x246a   :  { %6125 = vpow2.f32 %v4253_v53  ;;  %v5410_v53 = vld [vmem:[%s7552_s11 + $0x38] sm:$0xff] }
0x246d   :  { %v4411_v44 = vpop.permute.xlu1 %4410 }
0x2474   :  { %v6126_v54 = vpop.eup %6125 }
0x2475   :  { %v4255_v55 = vsel %vm380_vm2, %v6126_v54, 0.0 }
0x2476   :  { %4256 = vadd.xlane.f32.xlu0 %v4255_v55 }
0x248c   :  { %4260 = vrot.lane.b32.xlu0 %v7189_v27, %s6528_s1 }
0x2503   :  { %v4257_v46 = vpop.xlane.xlu0 %4256 }
0x2504   :  { %6127 = vrcp.f32 %v4257_v46 }
0x2507   :  { %v4261_v35 = vpop.permute.xlu0 %4260 }
0x2508   :  { %5855 = vmatpush3.msra.mxu1 %v4261_v35 }
0x2509   :  { %5864 = vmatprep.subr.mxu1 %v6517_v36 }
0x250e   :  { %v6128_v28 = vpop.eup %6127 }
0x250f   :  { %v4259_v59 = vmul.f32 %v6128_v28, %v6126_v54  ;;  %v5982_v54 = vpack.c.bf16 %v5410_v53, %v5409_v52 }
0x2511   :  { %5857 = vmatmul.mubr.msk.f32.vlgmr.msra.gmra.mrb[46].mxu1 %vm380_vm2, %v4259_v59 }
0x2512   :  { %5865 = vmatpush3.xpose.msk.msra.mxu1 %vm380_vm2, %v4413_v57  ;;  %5866 = vmatprep.mubr.msk.f32.mxu1 %vm6518_vm1, %v6517_v36 }
0x2513   :  { %5874 = vmatprep.subr.mxu1 %v6517_v36 }
0x2515   :  { %5867 = vmatmul.mubr.msk.f32.vlgmr.msra.gmra.mrb[48].mxu1 %vm380_vm2, %v4411_v44 }
0x2516   :  { %5875 = vmatpush3.msra.mxu1 %v7314_v58  ;;  %5876 = vmatprep.mubr.msk.f32.mxu1 %vm6518_vm1, %v6517_v36 }
0x25e4   :  { %v4332_v56 = vpop.f32.mrb[46].mxu1 }
0x25e5   :  { %v5858_v60 = vpop.f32.mrb[47].mxu1  ;;  %5862 = vmatmul.mubr.msk.f32.vlgmr.msra.gmra.mrb[48].mxu0 %vm380_vm2, %v4332_v56  ;;  %v5414_v56 = vld [vmem:[%s7554_s13 + $0x40] sm:$0xff] }
0x25e6   :  { %5871 = vmatprep.mubr.msk.f32.mxu0 %vm6518_vm1, %v6517_v36  ;;  %v5415_v60 = vld [vmem:[%s7554_s13 + $0x48] sm:$0xff] }
0x25e8   :  { %v4484_v61 = vpop.f32.mrb[48].mxu1 }
0x25e9   :  { %v4488_v62 = vmul.f32 0.35355338, %v4484_v61  ;;  %v5868_v0 = vpop.f32.mrb[49].mxu1  ;;  %v5986_v61 = vpack.c.bf16 %v5415_v60, %v5414_v56  ;;  %v5425_v56 = vld [vmem:[#allocation19 + $0x1] ss:$0 sm:$0xff] }
0x25ea   :  { %v5417_v0 = vld [vmem:[%s7554_s13 + $0x58] sm:$0xff] }
0x25eb   :  { %v4489_v1 = vadd.f32 %v6152_v50, %v4488_v62  ;;  %v5416_v62 = vld [vmem:[%s7554_s13 + $0x50] sm:$0xff]  ;;  %5987 = vmatprep.subr.bf16.mxu1 %v5986_v61 }
0x25ed   :  { %v4490_v41 = vsel %vm380_vm2, %v4489_v1, -inf }
0x25ee   :  { %4491 = vmax.xlane.f32.xlu0 %v4490_v41  ;;  %v5418_v41 = vld [vmem:[%s7554_s13 + $0x60] sm:$0xff] }
0x2604   :  { %4501 = vrot.lane.b32.xlu0 %v7189_v27, %s7597_s12  ;;  %s5277_s12 = sshll.u32 %s6532_s5, 4  ;;  %s5278_s12 = int_to_ptr.vmem [resolvable:$true] %s5277_s12 }
0x2605   :  { %s6417_s2 = scalar_lea.vmem %s5278_s12, 32  ;;  %p6422_p13 = scmp.lt.s32.totalorder %s5278_s12, %s5278_s12 }
0x2606   :  { %p6418_p12 = scmp.ne.s32.totalorder %s5278_s12, %s6417_s2  ;;  %p6423_p0 = scmp.lt.s32.totalorder %s6417_s2, %s6417_s2 }
0x2608   :  { %p6424_p1 = por %p6423_p0, %p6422_p13 }
0x260a   :  { %p6425_p2 = pnand %p6424_p1, %p6418_p12 }
0x267b   :  { %v4492_v58 = vpop.xlane.xlu0 %4491 }
0x267c   :  { %v4493_v2 = vsub.f32 %v4489_v1, %v4492_v58  ;;  %v5990_v1 = vpack.c.bf16 %v5417_v0, %v5416_v62  ;;  %v5419_v58 = vld [vmem:[%s7554_s13 + $0x68] sm:$0xff] }
0x267e   :  { %v4494_v5 = vmul.f32 1.442695, %v4493_v2  ;;  %v5994_v2 = vpack.c.bf16 %v5419_v58, %v5418_v41 }
0x267f   :  { %v4502_v6 = vpop.permute.xlu0 %4501 }
0x2680   :  { %6129 = vpow2.f32 %v4494_v5  ;;  %5870 = vmatpush3.msra.mxu0 %v4502_v6  ;;  %v5420_v5 = vld [vmem:[%s7554_s13 + $0x70] sm:$0xff]  ;;  %v5421_v6 = vld [vmem:[%s7554_s13 + $0x78] sm:$0xff] }
0x2681   :  { %5979 = vmatprep.subr.bf16.mxu0 %v5978_v32 }
0x268a   :  { %v6130_v9 = vpop.eup %6129 }
0x268b   :  { %v4496_v10 = vsel %vm380_vm2, %v6130_v9, 0.0 }
0x268c   :  { %4497 = vadd.xlane.f32.xlu1 %v4496_v10 }
0x2690   :  { %4668 = vadd.xlane.f32.xlu1 %v4667_v13 }
0x26b8   :  { %v4405_v14 = vpop.f32.mrb[48].mxu0 }
0x26b9   :  { %v4409_v27 = vadd.f32 %v4405_v14, %v4166_v43  ;;  %v5863_v15 = vpop.f32.mrb[49].mxu0 }
0x2719   :  { %v4498_v16 = vpop.xlane.xlu1 %4497 }
0x271a   :  { %6131 = vrcp.f32 %v4498_v16 }
0x271d   :  { %v4669_v19 = vpop.xlane.xlu1 %4668 }
0x271e   :  { %v4673_v20 = vmul.f32 0.03125, %v4669_v19 }
0x2720   :  { %v4675_v25 = vsub.f32 %v4661_v12, %v4673_v20 }
0x2722   :  { %v4677_v30 = vmul.f32 %v4675_v25, %v4675_v25 }
0x2724   :  { %v6132_v4 = vpop.eup %6131  ;;  %v4679_v31 = vsel %vm234_vm0, %v4677_v30, 0.0 }
0x2725   :  { %v4500_v7 = vmul.f32 %v6132_v4, %v6130_v9 }
0x2727   :  { %5872 = vmatmul.mubr.msk.f32.vlgmr.msra.gmra.mrb[50].mxu0 %vm380_vm2, %v4500_v7 }
0x2728   :  { %5981 = vmatpush3.bf16.msra.mxu0 %v5978_v32 }
0x2729   :  { %5983 = vmatprep.subr.bf16.mxu0 %v5982_v54 }
0x272c   :  { %5985 = vmatpush3.bf16.msra.mxu0 %v5982_v54 }
0x27fa   :  { %v4573_v18 = vpop.f32.mrb[50].mxu0 }
0x27fb   :  { %v5873_v17 = vpop.f32.mrb[51].mxu0  ;;  %5877 = vmatmul.mubr.msk.f32.vlgmr.msra.gmra.mrb[50].mxu1 %vm380_vm2, %v4573_v18 }
0x27fc   :  { %5989 = vmatpush3.bf16.msra.mxu1 %v5986_v61  ;;  %v5426_v61 = vld [vmem:[#allocation20 + $0x1] ss:$0 sm:$0xff] }
0x27fd   :  { %5991 = vmatprep.subr.bf16.mxu1 %v5990_v1 }
0x2800   :  { %5993 = vmatpush3.bf16.msra.mxu1 %v5990_v1 }
0x2801   :  { %5995 = vmatprep.subr.bf16.mxu1 %v5994_v2 }
0x2804   :  { %5997 = vmatpush3.bf16.msra.mxu1 %v5994_v2 }
0x28ce   :  { %v4646_v22 = vpop.f32.mrb[50].mxu1 }
0x28cf   :  { %v4650_v21 = vadd.f32 %v4646_v22, %v4409_v27  ;;  %v5878_v23 = vpop.f32.mrb[51].mxu1 }
0x28d1   :  { %v4660_v26 = vadd.f32 %v5404_v3, %v4650_v21  ;;  %v5998_v3 = vpack.c.bf16 %v5421_v6, %v5420_v5 }
0x28d3   :  { %v4662_v33 = vadd.f32 %v4660_v26, %v7181_v24  ;;  %v5405_v24 = vld [vmem:[#allocation13 + $0x1] ss:$0 sm:$0xff]  ;;  %5999 = vmatprep.subr.bf16.mxu1 %v5998_v3 }
0x28d4   :  { %6001 = vmatpush3.bf16.msra.mxu1 %v5998_v3 }
0x28d5   :  { %v4670_v29 = vsel %vm234_vm0, %v4662_v33, 0.0 }
0x28d6   :  { %4671 = vadd.xlane.f32.xlu1 %v4670_v29 }
0x28da   :  { %4680 = vadd.xlane.f32.xlu1 %v4679_v31  ;;  %v5422_v31 = vld [vmem:[#allocation17 + $0x1] ss:$0 sm:$0xff] }
0x2963   :  { %v4672_v34 = vpop.xlane.xlu1 %4671 }
0x2964   :  { %v4674_v37 = vmul.f32 0.03125, %v4672_v34 }
0x2966   :  { %v4676_v38 = vsub.f32 %v4662_v33, %v4674_v37 }
0x2967   :  { %v4681_v63 = vpop.xlane.xlu1 %4680 }
0x2968   :  { %v4685_v39 = vmul.f32 0.03125, %v4681_v63  ;;  %v4678_v40 = vmul.f32 %v4676_v38, %v4676_v38 }
0x296a   :  { %v4687_v42 = vadd.f32 1e-12, %v4685_v39  ;;  %v4682_v43 = vsel %vm234_vm0, %v4678_v40, 0.0 }
0x296b   :  { %4683 = vadd.xlane.f32.xlu1 %v4682_v43 }
0x296c   :  { %6133 = vrsqrt.f32 %v4687_v42 }
0x2976   :  { %v6134_v45 = vpop.eup %6133 }
0x2977   :  { %v4691_v47 = vmul.f32 %v6134_v45, %v4675_v25 }
0x2979   :  { %v4699_v49 = vmul.f32 %v5405_v24, %v4691_v47 }
0x297b   :  { %v7394_v50 = vadd.f32 %v5406_v48, %v4699_v49 }
0x297d   :  { %5887 = vmatprep.mubr.msk.f32.mxu0 %vm234_vm0, %v7394_v50 }
0x29f8   :  { %v4684_v55 = vpop.xlane.xlu1 %4683 }
0x29f9   :  { %v4686_v46 = vmul.f32 0.03125, %v4684_v55 }
0x29fb   :  { %v4688_v35 = vadd.f32 1e-12, %v4686_v46 }
0x29fd   :  { %6135 = vrsqrt.f32 %v4688_v35 }
0x2a07   :  { %v6136_v28 = vpop.eup %6135 }
0x2a08   :  { %v4692_v57 = vmul.f32 %v6136_v28, %v4676_v38 }
0x2a0a   :  { %v4700_v59 = vmul.f32 %v5405_v24, %v4692_v57 }
0x2a0c   :  { %v4708_v44 = vadd.f32 %v5406_v48, %v4700_v59  ;;  %v4970_v59 = vlaneseq }
0x2a0e   :  { %5888 = vmatmul.mubr.msk.f32.vlgmr.msra.gmra.mrb[52].mxu0 %vm234_vm0, %v4708_v44  ;;  %v4971_v62 = vshrl.u32 %v4970_v59, 7  ;;  %v7446_v2 = vand.u32 127, %v4970_v59 }
0x2a0f   :  { %5913 = vmatprep.mubr.msk.f32.mxu0 %vm6518_vm1, %v6517_v36 }
0x2a10   :  { %v4974_v5 = vmul.u32 8, %v4971_v62 }
0x2a12   :  { %vm4975_vm4 = vcmp.eq.s32.totalorder %v7446_v2, %v4974_v5 }
0x2ae1   :  { %v5889_v9 = vpop.f32.mrb[52].mxu0 }
0x2ae2   :  { %v4800_v10 = vadd.f32 %v5889_v9, %v5411_v8  ;;  %v4794_v12 = vpop.f32.mrb[53].mxu0  ;;  %v5053_v9 = vld [vmem:[%s7558_s17 + $0x8] sm:$0xff] }
0x2ae3   :  { %v4795_v13 = vadd.f32 %v5411_v8, %v4794_v12  ;;  %v5052_v8 = vld [vmem:[%s7558_s17] sm:$0xff]  ;;  %v5427_v12 = vsel %vm4975_vm4, 1.0, %v6517_v36 }
0x2ae4   :  { %v4806_v14 = vmul.f32 0.044715, %v4800_v10  ;;  %v4804_v33 = vmul.f32 0.5, %v4800_v10 }
0x2ae5   :  { %v4805_v27 = vmul.f32 0.044715, %v4795_v13  ;;  %v4803_v25 = vmul.f32 0.5, %v4795_v13 }
0x2ae6   :  { %v4808_v15 = vmul.f32 %v4806_v14, %v4800_v10  ;;  %v5054_v14 = vld [vmem:[%s7558_s17 + $0x10] sm:$0xff] }
0x2ae7   :  { %v4807_v16 = vmul.f32 %v4805_v27, %v4795_v13  ;;  %v5055_v27 = vld [vmem:[%s7558_s17 + $0x18] sm:$0xff] }
0x2ae8   :  { %v4810_v4 = vmul.f32 %v4808_v15, %v4800_v10  ;;  %v6009_v15 = vpack.c.bf16 %v5055_v27, %v5054_v14 }
0x2ae9   :  { %v4809_v7 = vmul.f32 %v4807_v16, %v4795_v13 }
0x2aea   :  { %v4812_v18 = vadd.f32 %v4810_v4, %v4800_v10 }
0x2aeb   :  { %v4811_v17 = vadd.f32 %v4809_v7, %v4795_v13  ;;  %v6006_v13 = vpack.c.bf16 %v5053_v9, %v5052_v8  ;;  %v5137_v7 = vld [vmem:[%s7560_s19] sm:$0xff] }
0x2aec   :  { %v4814_v19 = vmul.f32 0.7978846, %v4812_v18  ;;  %v5138_v18 = vld [vmem:[%s7560_s19 + $0x8] sm:$0xff] }
0x2aed   :  { %v4813_v20 = vmul.f32 0.7978846, %v4811_v17  ;;  %v5139_v17 = vld [vmem:[%s7560_s19 + $0x10] sm:$0xff] }
0x2aee   :  { %6137 = vtanh.f32 %v4814_v19  ;;  %v6012_v19 = vpack.c.bf16 %v5138_v18, %v5137_v7 }
0x2aef   :  { %6139 = vtanh.f32 %v4813_v20  ;;  %v5140_v20 = vld [vmem:[%s7560_s19 + $0x18] sm:$0xff] }
0x2af8   :  { %v6138_v22 = vpop.eup %6137 }
0x2af9   :  { %v6140_v21 = vpop.eup %6139  ;;  %v4818_v23 = vadd.f32 1.0, %v6138_v22  ;;  %v6015_v22 = vpack.c.bf16 %v5140_v20, %v5139_v17 }
0x2afa   :  { %v4817_v26 = vadd.f32 1.0, %v6140_v21  ;;  %v5429_v21 = vld [vmem:[%s7559_s18] ss:$0 sm:$0xff] }
0x2afb   :  { %v4820_v30 = vmul.f32 %v4818_v23, %v4804_v33 }
0x2afc   :  { %v4819_v29 = vmul.f32 %v4817_v26, %v4803_v25 }
0x2afe   :  { %5906 = vmatprep.mubr.msk.f32.mxu1 %vm2489_vm3, %v4819_v29  ;;  %v5431_v29 = vld [vmem:[%s7561_s20] ss:$0 sm:$0xff]  ;;  %s7598_s20 = sld [smem:[#allocation37_spill]] }
0x2aff   :  { %5907 = vmatmul.mubr.msk.f32.vlgmr.msra.gmra.mrb[52].mxu1 %vm2489_vm3, %v4820_v30 }
0x2b00   :  { %5935 = vmatprep.mubr.msk.f32.mxu1 %vm6518_vm1, %v6517_v36 }
0x2bd2   :  { %v5908_v34 = vpop.f32.mrb[52].mxu1 }
0x2bd3   :  { %v4916_v37 = vadd.f32 %v5908_v34, %v5422_v31  ;;  %v4910_v38 = vpop.f32.mrb[53].mxu1 }
0x2bd4   :  { %v4911_v63 = vadd.f32 %v5422_v31, %v4910_v38  ;;  %v6531_v38 = vmov 0  }
0x2bd5   :  { %v4920_v39 = vadd.f32 %v4916_v37, %v4708_v44  ;;  %6051 = vset.pattern.permute.xlu1 %v6531_v38  ;;  %6052 = vset.pattern.permute.xlu0 %v6531_v38 }
0x2bd6   :  { %v4919_v40 = vadd.f32 %v4911_v63, %v7394_v50  ;;  %v6530_v50 = vmov 0.0|0.0  }
0x2bd7   :  { %v4928_v42 = vsel %vm234_vm0, %v4920_v39, 0.0  ;;  %6002 = vmatprep.subr.bf16.mxu0 %v6530_v50  ;;  %6011 = vmatprep.subr.bf16.mxu1 %v6530_v50 }
0x2bd8   :  { %4929 = vadd.xlane.f32.xlu1 %v4928_v42  ;;  %v4925_v43 = vsel %vm234_vm0, %v4919_v40, 0.0  ;;  %6013 = vmatpush3.bf16.msra.mxu1 %v6012_v19 }
0x2bd9   :  { %4926 = vadd.xlane.f32.xlu0 %v4925_v43  ;;  %6014 = vmatprep.subr.bf16.mxu1 %v6530_v50 }
0x2bdc   :  { %6016 = vmatpush3.bf16.msra.mxu1 %v6015_v22 }
0x2c65   :  { %v4930_v45 = vpop.xlane.xlu1 %4929 }
0x2c66   :  { %v4932_v24 = vmul.f32 0.03125, %v4930_v45  ;;  %v4927_v47 = vpop.xlane.xlu0 %4926  ;;  %v5235_v45 = vld [vmem:[%s7598_s20] sm:$0x3] }
0x2c67   :  { %v4931_v48 = vmul.f32 0.03125, %v4927_v47 }
0x2c68   :  { %v4934_v49 = vsub.f32 %v4920_v39, %v4932_v24 }
0x2c69   :  { %v4933_v11 = vsub.f32 %v4919_v40, %v4931_v48 }
0x2c6a   :  { %v4936_v52 = vmul.f32 %v4934_v49, %v4934_v49 }
0x2c6b   :  { %v4935_v51 = vmul.f32 %v4933_v11, %v4933_v11 }
0x2c6c   :  { %v4940_v53 = vsel %vm234_vm0, %v4936_v52, 0.0 }
0x2c6d   :  { %v4937_v32 = vsel %vm234_vm0, %v4935_v51, 0.0 }
0x2c6e   :  { %4938 = vadd.xlane.f32.xlu1 %v4937_v32 }
0x2c72   :  { %4941 = vadd.xlane.f32.xlu1 %v4940_v53 }
0x2cfb   :  { %v4939_v54 = vpop.xlane.xlu1 %4938 }
0x2cfc   :  { %v4943_v55 = vmul.f32 0.03125, %v4939_v54 }
0x2cfe   :  { %v4945_v46 = vadd.f32 1e-12, %v4943_v55 }
0x2cff   :  { %v4942_v35 = vpop.xlane.xlu1 %4941 }
0x2d00   :  { %6141 = vrsqrt.f32 %v4945_v46  ;;  %v4944_v28 = vmul.f32 0.03125, %v4942_v35 }
0x2d02   :  { %v4946_v57 = vadd.f32 1e-12, %v4944_v28 }
0x2d04   :  { %6143 = vrsqrt.f32 %v4946_v57 }
0x2d0a   :  { %v6142_v44 = vpop.eup %6141 }
0x2d0b   :  { %v4949_v60 = vmul.f32 %v6142_v44, %v4933_v11 }
0x2d0d   :  { %v4957_v0 = vmul.f32 %v5425_v56, %v4949_v60 }
0x2d0e   :  { %v6144_v1 = vpop.eup %6143 }
0x2d0f   :  { %v4950_v41 = vmul.f32 %v6144_v1, %v4934_v49  ;;  %v4965_v58 = vadd.f32 %v5426_v61, %v4957_v0 }
0x2d11   :  { %v4958_v6 = vmul.f32 %v5425_v56, %v4950_v41  ;;  %4968 = vst.msk [vmem:[#allocation22 + $0x20] sm:$0xff] %vm234_vm0, %v4965_v58 }
0x2d13   :  { %v4966_v3 = vadd.f32 %v5426_v61, %v4958_v6 }
0x2d15   :  { %4969 = vst.msk [vmem:[#allocation22 + $0x28] sm:$0xff] %vm234_vm0, %v4966_v3  ;;  %v6003_v10 = vpack.c.bf16 %v4966_v3, %v4965_v58 }
0x2d17   :  { %6004 = vmatpush3.bf16.msra.mxu0 %v6003_v10 }
0x2d18   :  { %6005 = vmatprep.subr.bf16.mxu0 %v6530_v50 }
0x2d1a   :  { %5914 = vmatmul.mubr.msk.f32.vlgmr.msra.gmra.mrb[54].mxu0 %vm4978_vm5, %v5427_v12 }
0x2d1b   :  { %6007 = vmatpush3.bf16.msra.mxu0 %v6006_v13  ;;  %5924 = vmatprep.mubr.msk.f32.mxu0 %vm6518_vm1, %v6517_v36 }
0x2d1c   :  { %6008 = vmatprep.subr.bf16.mxu0 %v6530_v50 }
0x2d1f   :  { %6010 = vmatpush3.bf16.msra.mxu0 %v6009_v15 }
0x2ded   :  { %v5048_v16 = vpop.f32.mrb[54].mxu0 }
0x2dee   :  { %v5915_v4 = vpop.f32.mrb[55].mxu0  ;;  %5925 = vmatmul.mubr.msk.f32.vlgmr.msra.gmra.mrb[56].mxu0 %vm234_vm0, %v5048_v16 }
0x2ec1   :  { %v5132_v23 = vpop.f32.mrb[56].mxu0 }
0x2ec2   :  { %v5133_v25 = vadd.f32 %v5429_v21, %v5132_v23  ;;  %v5926_v26 = vpop.f32.mrb[57].mxu0 }
0x2ec4   :  { %6145 = vtanh.f32 %v5133_v25 }
0x2ece   :  { %v6146_v33 = vpop.eup %6145 }
0x2ecf   :  { %5936 = vmatmul.mubr.msk.f32.vlgmr.msra.gmra.mrb[54].mxu1 %vm234_vm0, %v6146_v33 }
0x2fa2   :  { %v5217_v30 = vpop.f32.mrb[54].mxu1 }
0x2fa3   :  { %v5218_v31 = vadd.f32 %v5431_v29, %v5217_v30  ;;  %v5937_v34 = vpop.f32.mrb[55].mxu1 }
0x2fa5   :  { %v5223_v37 = vsel %vm5221_vm6, %v5218_v31, -inf  ;;  %5222 = vst.msk [vmem:[#allocation23] sm:$0x3] %vm5221_vm6, %v5218_v31 }
0x2fa6   :  { %5224 = vmax.xlane.f32.xlu1 %v5223_v37 }
0x3033   :  { %v5225_v63 = vpop.xlane.xlu1 %5224 }
0x3034   :  { %v5226_v39 = vsub.f32 %v5218_v31, %v5225_v63 }
0x3036   :  { %v5227_v40 = vmul.f32 1.442695, %v5226_v39 }
0x3038   :  { %6147 = vpow2.f32 %v5227_v40 }
0x3042   :  { %v6148_v42 = vpop.eup %6147 }
0x3043   :  { %v5229_v43 = vsel %vm5221_vm6, %v6148_v42, 0.0 }
0x3044   :  { %5230 = vadd.xlane.f32.xlu1 %v5229_v43 }
0x3055   :  { %5237 = vperm.xlu1 %6051, %v5235_v45  }
0x30d1   :  { %v5231_v24 = vpop.xlane.xlu1 %5230 }
0x30d2   :  { %6149 = vlog2.f32 %v5231_v24 }
0x30d5   :  { %v5238_v47 = vpop.permute.xlu1 %5237 }
0x30d6   :  { %vm5239_vm7 = vcmp.eq.s32.totalorder %v7446_v2, %v5238_v47 }
0x30d7   :  { %v5433_v11 = vsel %vm5239_vm7, 1.0, %v6517_v36 }
0x30dc   :  { %v6150_v48 = vpop.eup %6149 }
0x30dd   :  { %v5233_v49 = vmul.f32 0.6931472, %v6150_v48 }
0x30df   :  { %v5234_v51 = vsub.f32 %v5226_v39, %v5233_v49 }
0x30e1   :  { %v5242_v32 = vmul.f32 %v5433_v11, %v5234_v51 }
0x30e3   :  { %v5243_v52 = vsel %vm5221_vm6, %v5242_v32, 0.0 }
0x30e4   :  { %5244 = vadd.xlane.f32.xlu0 %v5243_v52 }
0x30e5   :  { %6428 = shalt.err (!%p6425_p2)
}
0x30e6   :  { %s6429_s10 = scalar_lea.hbm %s7563_s22, 32 }
0x30e7   :  { %p6430_p3 = scmp.ne.s32.totalorder %s7563_s22, %s6429_s10  ;;  %p6433_p4 = scmp.lt.u32.totalorder %s6429_s10, %s7563_s22 }
0x30e9   :  { %p6435_p5 = pnand %p6433_p4, %p6430_p3 }
0x30eb   :  { %6438 = shalt.err (!%p6435_p5)
}
0x30ec   :  { %5280 = dma.vmem_to_hbm [thread:$0]  %s5278_s12, 32, %s7563_s22, [#allocation24]  }
0x30ed   :  { %s6439_s4 = scalar_lea.vmem %s7495_s30, 768  ;;  %p6444_p7 = scmp.lt.s32.totalorder %s7495_s30, %s7495_s30 }
0x30ee   :  { %p6440_p6 = scmp.ne.s32.totalorder %s7495_s30, %s6439_s4  ;;  %p6445_p8 = scmp.lt.s32.totalorder %s6439_s4, %s6439_s4 }
0x30f0   :  { %p6446_p9 = por %p6445_p8, %p6444_p7 }
0x30f2   :  { %p6447_p10 = pnand %p6446_p9, %p6440_p6 }
0x30f4   :  { %6450 = shalt.err (!%p6447_p10)
}
0x30f5   :  { %s6451_s17 = scalar_lea.hbm %s7562_s21, 768 }
0x30f6   :  { %p6452_p11 = scmp.ne.s32.totalorder %s7562_s21, %s6451_s17  ;;  %p6455_p12 = scmp.lt.u32.totalorder %s6451_s17, %s7562_s21 }
0x30f8   :  { %p6457_p13 = pnand %p6455_p12, %p6452_p11 }
0x30fa   :  { %6460 = shalt.err (!%p6457_p13)
}
0x30fb   :  { %s7599_s22 = smov 8   ;;  %s7600_s24 = smov 128   ;;  %vm5247_vm8 = vcmask 1041408   ;;  %vm5257_vm9 = vcmask 0  }
0x30fc   :  { %5270 = dma.vmem_to_hbm [thread:$0]  %s7495_s30, 768, %s7562_s21, [#allocation4], %s7600_s24, %s7600_s24, %s7599_s22  }
0x30fd   :  { %s6534_s18 = smov [#allocation25]  }
0x30fe   :  { %s5287_s19 = sshll.u32 %s6534_s18, 4  ;;  %s5288_s19 = int_to_ptr.vmem [resolvable:$true] %s5287_s19 }
0x30ff   :  { %s6461_s20 = scalar_lea.vmem %s5288_s19, 16  ;;  %s6465_s5 = scalar_lea.vmem %s5288_s19, 32 }
0x3100   :  { %p6462_p0 = scmp.ne.s32.totalorder %s5288_s19, %s6461_s20  ;;  %p6466_p1 = scmp.lt.s32.totalorder %s5288_s19, %s5288_s19 }
0x3101   :  { %p6467_p2 = scmp.lt.s32.totalorder %s6465_s5, %s6461_s20 }
0x3103   :  { %p6468_p3 = por %p6467_p2, %p6466_p1 }
0x3105   :  { %p6469_p4 = pnand %p6468_p3, %p6462_p0 }
0x3171   :  { %v5245_v36 = vpop.xlane.xlu0 %5244 }
0x3172   :  { %v5246_v53 = vsub.f32 0.0, %v5245_v36 }
0x3174   :  { %v5248_v50 = vsel %vm5247_vm8, %v5246_v53, 0.0 }
0x3175   :  { %v5249_v54 = vrot.slane %v5248_v50, 4 }
0x3177   :  { %v5250_v55 = vadd.f32 %v5249_v54, %v5248_v50 }
0x3179   :  { %v5251_v46 = vrot.slane %v5250_v55, 2 }
0x317b   :  { %v5252_v35 = vadd.f32 %v5251_v46, %v5250_v55 }
0x317d   :  { %v5253_v28 = vrot.slane %v5252_v35, 1 }
0x317f   :  { %v5254_v57 = vadd.f32 %v5253_v28, %v5252_v35 }
0x3181   :  { %v5256_v59 = vmul.f32 0.5, %v5254_v57 }
0x3183   :  { %5258 = vst.msk [vmem:[#allocation25] sm:$0x1] %vm5257_vm9, %v5256_v59 }
0x3184   :  { %6472 = shalt.err (!%p6469_p4)
}
0x3185   :  { %s6473_s0 = scalar_lea.hbm %s7564_s23, 16 }
0x3186   :  { %p6474_p5 = scmp.ne.s32.totalorder %s7564_s23, %s6473_s0  ;;  %p6477_p6 = scmp.lt.u32.totalorder %s6473_s0, %s7564_s23 }
0x3188   :  { %p6479_p7 = pnand %p6477_p6, %p6474_p5 }
0x318a   :  { %6482 = shalt.err (!%p6479_p7)
}
0x318b   :  { %5290 = dma.vmem_to_hbm [thread:$0]  %s5288_s19, 16, %s7564_s23, [#allocation24]  }
0x318c   :  { %6497 = dma.done.wait [#allocation4], 768  }
0x318d   :  { %6498 = vsyncadd [#allocation4], 4294966528 }
0x318e   :  { %6499 = dma.done.wait [#allocation24], 48  }
0x318f   :  { %6500 = vsyncadd [#allocation24], 4294967248 }
0x3190   :  { %5300 = vsyncpa [#allocation3], 1 }
0x3191   :  { %5301 = vsyncpa [#allocation6], 1 }
0x3192   :  { %5302 = vsyncpa [#allocation9], 1 }
0x3193   :  { %5303 = vsyncpa [#allocation12], 1 }
0x3194   :  { %5304 = vsyncpa [#allocation15], 1 }
0x3195   :  { %5305 = vsyncpa [#allocation18], 1 }
0x3196   :  { %5306 = vsyncpa [#allocation21], 1 }
0x3197   :  { %5307 = vsyncpa [#allocation4], 1 }
0x3198   :  { %5308 = vsyncpa [#allocation24], 1 }

</bundles_post_ra>
